<compile_context>
chip_gen: v7x
topology: tpu7x:2x2x1
jax: 0.10.0
libtpu: 0.0.40
codegen_flags: <defaults>
</compile_context>

<pallas_src>
import functools

import jax
import jax.numpy as jnp
from jax.experimental import pallas as pl
from jax.experimental.pallas import tpu as pltpu


# ---------------------------------------------------------------------------
# Kernel 1: LSTM over time, returning the last hidden state (out1 = out[:, -1])
# ---------------------------------------------------------------------------
def lstm_last_kernel(x_ref, wih_ref, whh_ref, b_ref, out_ref, zx_sc, h_sc, c_sc):
    T, B, F = x_ref.shape           # B here is the padded batch (multiple of 8)
    H = whh_ref.shape[0]

    # Hoisted input projection: one large MXU matmul, bias folded in once.
    x2d = x_ref[...].reshape(T * B, F).astype(jnp.bfloat16)
    zx_sc[...] = (jnp.dot(x2d, wih_ref[...], preferred_element_type=jnp.float32)
                  + b_ref[...])                                          # (T*B, 4H)

    h_sc[...] = jnp.zeros_like(h_sc)
    c_sc[...] = jnp.zeros_like(c_sc)

    def step(t, carry):
        row = pl.multiple_of(t * B, 8)                                   # B % 8 == 0
        z = zx_sc[pl.ds(row, B), :] + jnp.dot(
            h_sc[...].astype(jnp.bfloat16), whh_ref[...],
            preferred_element_type=jnp.float32)                          # (B, 4H)
        i = jax.nn.sigmoid(z[:, 0 * H:1 * H])                            # torch gate order i,f,g,o
        f = jax.nn.sigmoid(z[:, 1 * H:2 * H])
        g = jnp.tanh(z[:, 2 * H:3 * H])
        o = jax.nn.sigmoid(z[:, 3 * H:4 * H])
        c_new = f * c_sc[...] + i * g
        h_sc[...] = o * jnp.tanh(c_new)
        c_sc[...] = c_new
        return carry

    # T is small & static: full unroll gives the scheduler cross-step visibility.
    jax.lax.fori_loop(0, T, step, 0, unroll=True)
    out_ref[...] = h_sc[...]


def lstm_last(x_btf, w_ih, w_hh, b):
    B, T, F = x_btf.shape
    H = w_hh.shape[0]
    Bp = ((B + 7) // 8) * 8                       # pad batch to the f32 sublane quantum
    xp = jnp.pad(x_btf, ((0, Bp - B), (0, 0), (0, 0)))
    x_tbf = jnp.transpose(xp, (1, 0, 2))          # time-major (T, Bp, F)
    h = pl.pallas_call(
        lstm_last_kernel,
        out_shape=jax.ShapeDtypeStruct((Bp, H), jnp.float32),
        in_specs=[pl.BlockSpec(memory_space=pltpu.MemorySpace.VMEM)] * 4,
        out_specs=pl.BlockSpec(memory_space=pltpu.MemorySpace.VMEM),
        scratch_shapes=[pltpu.VMEM((T * Bp, 4 * H), jnp.float32),
                        pltpu.VMEM((Bp, H), jnp.float32),
                        pltpu.VMEM((Bp, H), jnp.float32)],
        compiler_params=pltpu.CompilerParams(vmem_limit_bytes=32 * 1024 * 1024),
    )(x_tbf, w_ih.astype(jnp.bfloat16), w_hh.astype(jnp.bfloat16), b)
    return h[:B]                                  # drop padded batch rows


# ---------------------------------------------------------------------------
# Kernel 2: fused FCN branch: 3 x (causal Conv1d + BN(batch stats) + ReLU)
#           + AvgPool1d(output_size) + mean + concat-with-LSTM + final Linear
# ---------------------------------------------------------------------------
def fcn_head_kernel(x_ref, h_ref,
                    w1_ref, b1_ref, g1_ref, be1_ref,
                    w2_ref, b2_ref, g2_ref, be2_ref,
                    w3_ref, b3_ref, g3_ref, be3_ref,
                    wa_ref, wb_ref, bfc_ref, out_ref,
                    *, K1, K2, K3, n_keep, eps):
    B, L, _ = x_ref.shape

    def conv_bn_relu(x, w_ref, b_ref, g_ref, be_ref, K):
        # x: (B, L, Cin) f32; w_ref: (K*Cin, Cout) bf16.
        Cin = x.shape[2]
        Cout = w_ref.shape[1]
        # Causal left pad (ConstantPad1d((K-1, 0), 0)) done in-kernel (values in VMEM).
        xp = jnp.concatenate([jnp.zeros((B, K - 1, Cin), x.dtype), x], axis=1)
        # im2col: one (B*L, K*Cin) matrix, one MXU matmul (contraction K*Cin).
        cols = [xp[:, k:k + L, :] for k in range(K)]
        im2col = jnp.concatenate(cols, axis=2).reshape(B * L, K * Cin)
        acc = jnp.dot(im2col.astype(jnp.bfloat16), w_ref[...],
                      preferred_element_type=jnp.float32)
        acc = acc + b_ref[...]
        # BatchNorm1d (training mode): biased batch statistics over (batch, length).
        mean = jnp.mean(acc, axis=0, keepdims=True)
        var = jnp.mean(jnp.square(acc - mean), axis=0, keepdims=True)
        y = (acc - mean) * jax.lax.rsqrt(var + eps) * g_ref[...] + be_ref[...]
        y = jnp.maximum(y, 0.0)
        return y.reshape(B, L, Cout)

    y1 = conv_bn_relu(x_ref[...], w1_ref, b1_ref, g1_ref, be1_ref, K1)
    y2 = conv_bn_relu(y1, w2_ref, b2_ref, g2_ref, be2_ref, K2)
    y3 = conv_bn_relu(y2, w3_ref, b3_ref, g3_ref, be3_ref, K3)

    # AvgPool1d(kernel=stride=output_size) followed by mean over pooled positions
    # == mean over the first n_keep = (L // output_size) * output_size steps.
    out2 = jnp.mean(y3[:, :n_keep, :], axis=1)                           # (B, C3)

    # cat([out1, out2]) @ W_fc  expressed as split-weight matmuls (lane-padded).
    y = (jnp.dot(h_ref[...], wa_ref[...], preferred_element_type=jnp.float32)
         + jnp.dot(out2, wb_ref[...], preferred_element_type=jnp.float32)
         + bfc_ref[...])
    out_ref[...] = y


def fcn_head(x, h_last, params, output_size):
    B, L, _ = x.shape
    C3 = params['w3'].shape[2]
    out_pad = ((output_size + 127) // 128) * 128          # lane-dense output store
    n_keep = (L // output_size) * output_size

    def prep_w(w):                                        # (K, Cin, Cout) -> (K*Cin, Cout) bf16
        K, Cin, Cout = w.shape
        return w.reshape(K * Cin, Cout).astype(jnp.bfloat16)

    pad_c = out_pad - output_size
    wa = jnp.pad(params['w_fc'][:C3], ((0, 0), (0, pad_c)))
    wb = jnp.pad(params['w_fc'][C3:], ((0, 0), (0, pad_c)))
    bfc = jnp.pad(params['b_fc'], ((0, 0), (0, pad_c)))

    kernel = functools.partial(
        fcn_head_kernel,
        K1=params['w1'].shape[0], K2=params['w2'].shape[0], K3=params['w3'].shape[0],
        n_keep=n_keep, eps=1e-3)                          # ConvBlock(epsilon=0.001)

    out = pl.pallas_call(
        kernel,
        out_shape=jax.ShapeDtypeStruct((B, out_pad), jnp.float32),
        in_specs=[pl.BlockSpec(memory_space=pltpu.MemorySpace.VMEM)] * 17,
        out_specs=pl.BlockSpec(memory_space=pltpu.MemorySpace.VMEM),
        compiler_params=pltpu.CompilerParams(vmem_limit_bytes=32 * 1024 * 1024),
    )(x, h_last,
      prep_w(params['w1']), params['b1'], params['g1'], params['beta1'],
      prep_w(params['w2']), params['b2'], params['g2'], params['beta2'],
      prep_w(params['w3']), params['b3'], params['g3'], params['beta3'],
      wa, wb, bfc)
    return out[:, :output_size]


# ---------------------------------------------------------------------------
# Full forward + deterministic parameter init
# ---------------------------------------------------------------------------
def lstm_fcn_forward(x, params, output_size):
    out1 = lstm_last(x, params['w_ih'], params['w_hh'], params['b_lstm'])   # (B, 128)
    # x.permute(0, 2, 1) in torch == keeping x channels-last here.
    return fcn_head(x, out1, params, output_size)


def init_params(key, num_features, output_size,
                conv1_nf=128, conv2_nf=256, conv3_nf=128, k1=8, k2=5, k3=3):
    H = conv3_nf                                                          # LSTM hidden = conv3_nf
    ks = jax.random.split(key, 9)

    def u(k, shape, s):
        return jax.random.uniform(k, shape, jnp.float32, -s, s)

    p = {}
    s_lstm = H ** -0.5
    p['w_ih'] = u(ks[0], (num_features, 4 * H), s_lstm)
    p['w_hh'] = u(ks[1], (H, 4 * H), s_lstm)
    # b_ih and b_hh drawn separately (as in PyTorch) and summed for the forward pass.
    p['b_lstm'] = u(ks[2], (1, 4 * H), s_lstm) + u(ks[8], (1, 4 * H), s_lstm)

    def conv_init(k, K, cin, cout):
        s = (cin * K) ** -0.5
        kw, kb = jax.random.split(k)
        return (u(kw, (K, cin, cout), s), u(kb, (1, cout), s),
                jnp.ones((1, cout), jnp.float32), jnp.zeros((1, cout), jnp.float32))

    p['w1'], p['b1'], p['g1'], p['beta1'] = conv_init(ks[3], k1, num_features, conv1_nf)
    p['w2'], p['b2'], p['g2'], p['beta2'] = conv_init(ks[4], k2, conv1_nf, conv2_nf)
    p['w3'], p['b3'], p['g3'], p['beta3'] = conv_init(ks[5], k3, conv2_nf, conv3_nf)

    s_fc = (2 * conv3_nf) ** -0.5
    p['w_fc'] = u(ks[6], (2 * conv3_nf, output_size), s_fc)
    p['b_fc'] = u(ks[7], (1, output_size), s_fc)
    return p


if __name__ == "__main__":
    B, T, F = 2, 16, 8           # batch, sequence length, num_features
    output_size = 8              # number of classes; also the AvgPool1d kernel size
    key = jax.random.PRNGKey(0)
    kx, kp = jax.random.split(key)
    x = jax.random.normal(kx, (B, T, F), jnp.float32)
    params = init_params(kp, F, output_size)

    fwd = jax.jit(functools.partial(lstm_fcn_forward, output_size=output_size))
    out = fwd(x, params)
    out = jax.block_until_ready(out)
    assert out.shape == (B, output_size)
    assert bool(jnp.all(jnp.isfinite(out)))
    print("KERNEL_OK")
</pallas_src>

<mosaic_0001>
module attributes {stable_mosaic.version = 11 : i64} {
  func.func @fcn_head_kernel(%arg0: memref<2x16x8xf32, #tpu.memory_space<vmem>>, %arg1: memref<2x128xf32, #tpu.memory_space<vmem>>, %arg2: memref<64x128xbf16, #tpu.memory_space<vmem>>, %arg3: memref<1x128xf32, #tpu.memory_space<vmem>>, %arg4: memref<1x128xf32, #tpu.memory_space<vmem>>, %arg5: memref<1x128xf32, #tpu.memory_space<vmem>>, %arg6: memref<640x256xbf16, #tpu.memory_space<vmem>>, %arg7: memref<1x256xf32, #tpu.memory_space<vmem>>, %arg8: memref<1x256xf32, #tpu.memory_space<vmem>>, %arg9: memref<1x256xf32, #tpu.memory_space<vmem>>, %arg10: memref<768x128xbf16, #tpu.memory_space<vmem>>, %arg11: memref<1x128xf32, #tpu.memory_space<vmem>>, %arg12: memref<1x128xf32, #tpu.memory_space<vmem>>, %arg13: memref<1x128xf32, #tpu.memory_space<vmem>>, %arg14: memref<128x128xf32, #tpu.memory_space<vmem>>, %arg15: memref<128x128xf32, #tpu.memory_space<vmem>>, %arg16: memref<1x128xf32, #tpu.memory_space<vmem>>, %arg17: memref<2x128xf32, #tpu.memory_space<vmem>>) attributes {dimension_semantics = [], scalar_prefetch = 0 : i64, scratch_operands = 0 : i64, tpu.core_type = #tpu.core_type<tc>} {
    %c0 = arith.constant 0 : index
    %c0_0 = arith.constant 0 : index
    %c0_1 = arith.constant 0 : index
    %0 = vector.load %arg0[%c0, %c0_0, %c0_1] : memref<2x16x8xf32, #tpu.memory_space<vmem>>, vector<2x16x8xf32>
    %cst = arith.constant 0.000000e+00 : f32
    %1 = vector.broadcast %cst : f32 to vector<2x7x8xf32>
    %2 = tpu.concatenate %1, %0 in 1 : vector<2x7x8xf32>, vector<2x16x8xf32> -> vector<2x23x8xf32>
    %3 = vector.extract_strided_slice %2 {offsets = [0, 0, 0], sizes = [2, 16, 8], strides = [1, 1, 1]} : vector<2x23x8xf32> to vector<2x16x8xf32>
    %4 = vector.extract_strided_slice %2 {offsets = [0, 1, 0], sizes = [2, 16, 8], strides = [1, 1, 1]} : vector<2x23x8xf32> to vector<2x16x8xf32>
    %5 = vector.extract_strided_slice %2 {offsets = [0, 2, 0], sizes = [2, 16, 8], strides = [1, 1, 1]} : vector<2x23x8xf32> to vector<2x16x8xf32>
    %6 = vector.extract_strided_slice %2 {offsets = [0, 3, 0], sizes = [2, 16, 8], strides = [1, 1, 1]} : vector<2x23x8xf32> to vector<2x16x8xf32>
    %7 = vector.extract_strided_slice %2 {offsets = [0, 4, 0], sizes = [2, 16, 8], strides = [1, 1, 1]} : vector<2x23x8xf32> to vector<2x16x8xf32>
    %8 = vector.extract_strided_slice %2 {offsets = [0, 5, 0], sizes = [2, 16, 8], strides = [1, 1, 1]} : vector<2x23x8xf32> to vector<2x16x8xf32>
    %9 = vector.extract_strided_slice %2 {offsets = [0, 6, 0], sizes = [2, 16, 8], strides = [1, 1, 1]} : vector<2x23x8xf32> to vector<2x16x8xf32>
    %10 = vector.extract_strided_slice %2 {offsets = [0, 7, 0], sizes = [2, 16, 8], strides = [1, 1, 1]} : vector<2x23x8xf32> to vector<2x16x8xf32>
    %11 = tpu.concatenate %3, %4, %5, %6, %7, %8, %9, %10 in 2 : vector<2x16x8xf32>, vector<2x16x8xf32>, vector<2x16x8xf32>, vector<2x16x8xf32>, vector<2x16x8xf32>, vector<2x16x8xf32>, vector<2x16x8xf32>, vector<2x16x8xf32> -> vector<2x16x64xf32>
    %12 = vector.shape_cast %11 : vector<2x16x64xf32> to vector<32x64xf32>
    %13 = arith.truncf %12 : vector<32x64xf32> to vector<32x64xbf16>
    %c0_2 = arith.constant 0 : index
    %c0_3 = arith.constant 0 : index
    %14 = vector.load %arg2[%c0_2, %c0_3] : memref<64x128xbf16, #tpu.memory_space<vmem>>, vector<64x128xbf16>
    %cst_4 = arith.constant dense<0.000000e+00> : vector<32x128xf32>
    %15 = tpu.matmul %13, %14, %cst_4 {dimension_numbers = #tpu.dot_dimension_numbers<[1], [0], [0], [1], [0, 0, 1, 1], [], []>} : vector<32x64xbf16>, vector<64x128xbf16>, vector<32x128xf32> -> vector<32x128xf32>
    %c0_5 = arith.constant 0 : index
    %c0_6 = arith.constant 0 : index
    %16 = vector.load %arg3[%c0_5, %c0_6] : memref<1x128xf32, #tpu.memory_space<vmem>>, vector<1x128xf32>
    %17 = vector.broadcast %16 : vector<1x128xf32> to vector<32x128xf32>
    %18 = arith.addf %15, %17 : vector<32x128xf32>
    %cst_7 = arith.constant dense<0.000000e+00> : vector<128xf32>
    %19 = vector.multi_reduction <add>, %18, %cst_7 [0] : vector<32x128xf32> to vector<128xf32>
    %20 = vector.shape_cast %19 : vector<128xf32> to vector<1x128xf32>
    %cst_8 = arith.constant 3.200000e+01 : f32
    %21 = vector.broadcast %cst_8 : f32 to vector<1x128xf32>
    %22 = arith.divf %20, %21 : vector<1x128xf32>
    %23 = vector.broadcast %22 : vector<1x128xf32> to vector<32x128xf32>
    %24 = arith.subf %18, %23 : vector<32x128xf32>
    %25 = arith.mulf %24, %24 : vector<32x128xf32>
    %cst_9 = arith.constant dense<0.000000e+00> : vector<128xf32>
    %26 = vector.multi_reduction <add>, %25, %cst_9 [0] : vector<32x128xf32> to vector<128xf32>
    %27 = vector.shape_cast %26 : vector<128xf32> to vector<1x128xf32>
    %cst_10 = arith.constant 3.200000e+01 : f32
    %28 = vector.broadcast %cst_10 : f32 to vector<1x128xf32>
    %29 = arith.divf %27, %28 : vector<1x128xf32>
    %30 = vector.broadcast %22 : vector<1x128xf32> to vector<32x128xf32>
    %31 = arith.subf %18, %30 : vector<32x128xf32>
    %cst_11 = arith.constant 1.000000e-03 : f32
    %32 = vector.broadcast %cst_11 : f32 to vector<1x128xf32>
    %33 = arith.addf %29, %32 : vector<1x128xf32>
    %34 = math.rsqrt %33 : vector<1x128xf32>
    %35 = vector.broadcast %34 : vector<1x128xf32> to vector<32x128xf32>
    %36 = arith.mulf %31, %35 : vector<32x128xf32>
    %c0_12 = arith.constant 0 : index
    %c0_13 = arith.constant 0 : index
    %37 = vector.load %arg4[%c0_12, %c0_13] : memref<1x128xf32, #tpu.memory_space<vmem>>, vector<1x128xf32>
    %38 = vector.broadcast %37 : vector<1x128xf32> to vector<32x128xf32>
    %39 = arith.mulf %36, %38 : vector<32x128xf32>
    %c0_14 = arith.constant 0 : index
    %c0_15 = arith.constant 0 : index
    %40 = vector.load %arg5[%c0_14, %c0_15] : memref<1x128xf32, #tpu.memory_space<vmem>>, vector<1x128xf32>
    %41 = vector.broadcast %40 : vector<1x128xf32> to vector<32x128xf32>
    %42 = arith.addf %39, %41 : vector<32x128xf32>
    %cst_16 = arith.constant 0.000000e+00 : f32
    %43 = vector.broadcast %cst_16 : f32 to vector<32x128xf32>
    %44 = arith.maximumf %42, %43 : vector<32x128xf32>
    %45 = vector.shape_cast %44 : vector<32x128xf32> to vector<2x16x128xf32>
    %cst_17 = arith.constant 0.000000e+00 : f32
    %46 = vector.broadcast %cst_17 : f32 to vector<2x4x128xf32>
    %47 = tpu.concatenate %46, %45 in 1 : vector<2x4x128xf32>, vector<2x16x128xf32> -> vector<2x20x128xf32>
    %48 = vector.extract_strided_slice %47 {offsets = [0, 0, 0], sizes = [2, 16, 128], strides = [1, 1, 1]} : vector<2x20x128xf32> to vector<2x16x128xf32>
    %49 = vector.extract_strided_slice %47 {offsets = [0, 1, 0], sizes = [2, 16, 128], strides = [1, 1, 1]} : vector<2x20x128xf32> to vector<2x16x128xf32>
    %50 = vector.extract_strided_slice %47 {offsets = [0, 2, 0], sizes = [2, 16, 128], strides = [1, 1, 1]} : vector<2x20x128xf32> to vector<2x16x128xf32>
    %51 = vector.extract_strided_slice %47 {offsets = [0, 3, 0], sizes = [2, 16, 128], strides = [1, 1, 1]} : vector<2x20x128xf32> to vector<2x16x128xf32>
    %52 = vector.extract_strided_slice %47 {offsets = [0, 4, 0], sizes = [2, 16, 128], strides = [1, 1, 1]} : vector<2x20x128xf32> to vector<2x16x128xf32>
    %53 = tpu.concatenate %48, %49, %50, %51, %52 in 2 : vector<2x16x128xf32>, vector<2x16x128xf32>, vector<2x16x128xf32>, vector<2x16x128xf32>, vector<2x16x128xf32> -> vector<2x16x640xf32>
    %54 = vector.shape_cast %53 : vector<2x16x640xf32> to vector<32x640xf32>
    %55 = arith.truncf %54 : vector<32x640xf32> to vector<32x640xbf16>
    %c0_18 = arith.constant 0 : index
    %c0_19 = arith.constant 0 : index
    %56 = vector.load %arg6[%c0_18, %c0_19] : memref<640x256xbf16, #tpu.memory_space<vmem>>, vector<640x256xbf16>
    %cst_20 = arith.constant dense<0.000000e+00> : vector<32x256xf32>
    %57 = tpu.matmul %55, %56, %cst_20 {dimension_numbers = #tpu.dot_dimension_numbers<[1], [0], [0], [1], [0, 0, 1, 1], [], []>} : vector<32x640xbf16>, vector<640x256xbf16>, vector<32x256xf32> -> vector<32x256xf32>
    %c0_21 = arith.constant 0 : index
    %c0_22 = arith.constant 0 : index
    %58 = vector.load %arg7[%c0_21, %c0_22] : memref<1x256xf32, #tpu.memory_space<vmem>>, vector<1x256xf32>
    %59 = vector.broadcast %58 : vector<1x256xf32> to vector<32x256xf32>
    %60 = arith.addf %57, %59 : vector<32x256xf32>
    %cst_23 = arith.constant dense<0.000000e+00> : vector<256xf32>
    %61 = vector.multi_reduction <add>, %60, %cst_23 [0] : vector<32x256xf32> to vector<256xf32>
    %62 = vector.shape_cast %61 : vector<256xf32> to vector<1x256xf32>
    %cst_24 = arith.constant 3.200000e+01 : f32
    %63 = vector.broadcast %cst_24 : f32 to vector<1x256xf32>
    %64 = arith.divf %62, %63 : vector<1x256xf32>
    %65 = vector.broadcast %64 : vector<1x256xf32> to vector<32x256xf32>
    %66 = arith.subf %60, %65 : vector<32x256xf32>
    %67 = arith.mulf %66, %66 : vector<32x256xf32>
    %cst_25 = arith.constant dense<0.000000e+00> : vector<256xf32>
    %68 = vector.multi_reduction <add>, %67, %cst_25 [0] : vector<32x256xf32> to vector<256xf32>
    %69 = vector.shape_cast %68 : vector<256xf32> to vector<1x256xf32>
    %cst_26 = arith.constant 3.200000e+01 : f32
    %70 = vector.broadcast %cst_26 : f32 to vector<1x256xf32>
    %71 = arith.divf %69, %70 : vector<1x256xf32>
    %72 = vector.broadcast %64 : vector<1x256xf32> to vector<32x256xf32>
    %73 = arith.subf %60, %72 : vector<32x256xf32>
    %cst_27 = arith.constant 1.000000e-03 : f32
    %74 = vector.broadcast %cst_27 : f32 to vector<1x256xf32>
    %75 = arith.addf %71, %74 : vector<1x256xf32>
    %76 = math.rsqrt %75 : vector<1x256xf32>
    %77 = vector.broadcast %76 : vector<1x256xf32> to vector<32x256xf32>
    %78 = arith.mulf %73, %77 : vector<32x256xf32>
    %c0_28 = arith.constant 0 : index
    %c0_29 = arith.constant 0 : index
    %79 = vector.load %arg8[%c0_28, %c0_29] : memref<1x256xf32, #tpu.memory_space<vmem>>, vector<1x256xf32>
    %80 = vector.broadcast %79 : vector<1x256xf32> to vector<32x256xf32>
    %81 = arith.mulf %78, %80 : vector<32x256xf32>
    %c0_30 = arith.constant 0 : index
    %c0_31 = arith.constant 0 : index
    %82 = vector.load %arg9[%c0_30, %c0_31] : memref<1x256xf32, #tpu.memory_space<vmem>>, vector<1x256xf32>
    %83 = vector.broadcast %82 : vector<1x256xf32> to vector<32x256xf32>
    %84 = arith.addf %81, %83 : vector<32x256xf32>
    %cst_32 = arith.constant 0.000000e+00 : f32
    %85 = vector.broadcast %cst_32 : f32 to vector<32x256xf32>
    %86 = arith.maximumf %84, %85 : vector<32x256xf32>
    %87 = vector.shape_cast %86 : vector<32x256xf32> to vector<2x16x256xf32>
    %cst_33 = arith.constant 0.000000e+00 : f32
    %88 = vector.broadcast %cst_33 : f32 to vector<2x2x256xf32>
    %89 = tpu.concatenate %88, %87 in 1 : vector<2x2x256xf32>, vector<2x16x256xf32> -> vector<2x18x256xf32>
    %90 = vector.extract_strided_slice %89 {offsets = [0, 0, 0], sizes = [2, 16, 256], strides = [1, 1, 1]} : vector<2x18x256xf32> to vector<2x16x256xf32>
    %91 = vector.extract_strided_slice %89 {offsets = [0, 1, 0], sizes = [2, 16, 256], strides = [1, 1, 1]} : vector<2x18x256xf32> to vector<2x16x256xf32>
    %92 = vector.extract_strided_slice %89 {offsets = [0, 2, 0], sizes = [2, 16, 256], strides = [1, 1, 1]} : vector<2x18x256xf32> to vector<2x16x256xf32>
    %93 = tpu.concatenate %90, %91, %92 in 2 : vector<2x16x256xf32>, vector<2x16x256xf32>, vector<2x16x256xf32> -> vector<2x16x768xf32>
    %94 = vector.shape_cast %93 : vector<2x16x768xf32> to vector<32x768xf32>
    %95 = arith.truncf %94 : vector<32x768xf32> to vector<32x768xbf16>
    %c0_34 = arith.constant 0 : index
    %c0_35 = arith.constant 0 : index
    %96 = vector.load %arg10[%c0_34, %c0_35] : memref<768x128xbf16, #tpu.memory_space<vmem>>, vector<768x128xbf16>
    %cst_36 = arith.constant dense<0.000000e+00> : vector<32x128xf32>
    %97 = tpu.matmul %95, %96, %cst_36 {dimension_numbers = #tpu.dot_dimension_numbers<[1], [0], [0], [1], [0, 0, 1, 1], [], []>} : vector<32x768xbf16>, vector<768x128xbf16>, vector<32x128xf32> -> vector<32x128xf32>
    %c0_37 = arith.constant 0 : index
    %c0_38 = arith.constant 0 : index
    %98 = vector.load %arg11[%c0_37, %c0_38] : memref<1x128xf32, #tpu.memory_space<vmem>>, vector<1x128xf32>
    %99 = vector.broadcast %98 : vector<1x128xf32> to vector<32x128xf32>
    %100 = arith.addf %97, %99 : vector<32x128xf32>
    %cst_39 = arith.constant dense<0.000000e+00> : vector<128xf32>
    %101 = vector.multi_reduction <add>, %100, %cst_39 [0] : vector<32x128xf32> to vector<128xf32>
    %102 = vector.shape_cast %101 : vector<128xf32> to vector<1x128xf32>
    %cst_40 = arith.constant 3.200000e+01 : f32
    %103 = vector.broadcast %cst_40 : f32 to vector<1x128xf32>
    %104 = arith.divf %102, %103 : vector<1x128xf32>
    %105 = vector.broadcast %104 : vector<1x128xf32> to vector<32x128xf32>
    %106 = arith.subf %100, %105 : vector<32x128xf32>
    %107 = arith.mulf %106, %106 : vector<32x128xf32>
    %cst_41 = arith.constant dense<0.000000e+00> : vector<128xf32>
    %108 = vector.multi_reduction <add>, %107, %cst_41 [0] : vector<32x128xf32> to vector<128xf32>
    %109 = vector.shape_cast %108 : vector<128xf32> to vector<1x128xf32>
    %cst_42 = arith.constant 3.200000e+01 : f32
    %110 = vector.broadcast %cst_42 : f32 to vector<1x128xf32>
    %111 = arith.divf %109, %110 : vector<1x128xf32>
    %112 = vector.broadcast %104 : vector<1x128xf32> to vector<32x128xf32>
    %113 = arith.subf %100, %112 : vector<32x128xf32>
    %cst_43 = arith.constant 1.000000e-03 : f32
    %114 = vector.broadcast %cst_43 : f32 to vector<1x128xf32>
    %115 = arith.addf %111, %114 : vector<1x128xf32>
    %116 = math.rsqrt %115 : vector<1x128xf32>
    %117 = vector.broadcast %116 : vector<1x128xf32> to vector<32x128xf32>
    %118 = arith.mulf %113, %117 : vector<32x128xf32>
    %c0_44 = arith.constant 0 : index
    %c0_45 = arith.constant 0 : index
    %119 = vector.load %arg12[%c0_44, %c0_45] : memref<1x128xf32, #tpu.memory_space<vmem>>, vector<1x128xf32>
    %120 = vector.broadcast %119 : vector<1x128xf32> to vector<32x128xf32>
    %121 = arith.mulf %118, %120 : vector<32x128xf32>
    %c0_46 = arith.constant 0 : index
    %c0_47 = arith.constant 0 : index
    %122 = vector.load %arg13[%c0_46, %c0_47] : memref<1x128xf32, #tpu.memory_space<vmem>>, vector<1x128xf32>
    %123 = vector.broadcast %122 : vector<1x128xf32> to vector<32x128xf32>
    %124 = arith.addf %121, %123 : vector<32x128xf32>
    %cst_48 = arith.constant 0.000000e+00 : f32
    %125 = vector.broadcast %cst_48 : f32 to vector<32x128xf32>
    %126 = arith.maximumf %124, %125 : vector<32x128xf32>
    %127 = vector.shape_cast %126 : vector<32x128xf32> to vector<2x16x128xf32>
    %cst_49 = arith.constant dense<0.000000e+00> : vector<2x128xf32>
    %128 = vector.multi_reduction <add>, %127, %cst_49 [1] : vector<2x16x128xf32> to vector<2x128xf32>
    %cst_50 = arith.constant 1.600000e+01 : f32
    %129 = vector.broadcast %cst_50 : f32 to vector<2x128xf32>
    %130 = arith.divf %128, %129 : vector<2x128xf32>
    %c0_51 = arith.constant 0 : index
    %c0_52 = arith.constant 0 : index
    %131 = vector.load %arg1[%c0_51, %c0_52] : memref<2x128xf32, #tpu.memory_space<vmem>>, vector<2x128xf32>
    %c0_53 = arith.constant 0 : index
    %c0_54 = arith.constant 0 : index
    %132 = vector.load %arg14[%c0_53, %c0_54] : memref<128x128xf32, #tpu.memory_space<vmem>>, vector<128x128xf32>
    %cst_55 = arith.constant dense<0.000000e+00> : vector<2x128xf32>
    %133 = tpu.matmul %131, %132, %cst_55 {dimension_numbers = #tpu.dot_dimension_numbers<[1], [0], [0], [1], [0, 0, 1, 1], [], []>} : vector<2x128xf32>, vector<128x128xf32>, vector<2x128xf32> -> vector<2x128xf32>
    %c0_56 = arith.constant 0 : index
    %c0_57 = arith.constant 0 : index
    %134 = vector.load %arg15[%c0_56, %c0_57] : memref<128x128xf32, #tpu.memory_space<vmem>>, vector<128x128xf32>
    %cst_58 = arith.constant dense<0.000000e+00> : vector<2x128xf32>
    %135 = tpu.matmul %130, %134, %cst_58 {dimension_numbers = #tpu.dot_dimension_numbers<[1], [0], [0], [1], [0, 0, 1, 1], [], []>} : vector<2x128xf32>, vector<128x128xf32>, vector<2x128xf32> -> vector<2x128xf32>
    %136 = arith.addf %133, %135 : vector<2x128xf32>
    %c0_59 = arith.constant 0 : index
    %c0_60 = arith.constant 0 : index
    %137 = vector.load %arg16[%c0_59, %c0_60] : memref<1x128xf32, #tpu.memory_space<vmem>>, vector<1x128xf32>
    %138 = vector.broadcast %137 : vector<1x128xf32> to vector<2x128xf32>
    %139 = arith.addf %136, %138 : vector<2x128xf32>
    %c0_61 = arith.constant 0 : index
    %c0_62 = arith.constant 0 : index
    %140 = vector.load %arg17[%c0_61, %c0_62] : memref<2x128xf32, #tpu.memory_space<vmem>>, vector<2x128xf32>
    tpu.vector_store %arg17[%c0_61, %c0_62], %139 {strides = array<i32>} : memref<2x128xf32, #tpu.memory_space<vmem>>, vector<2x128xf32>,
    return
  }
}

module attributes {stable_mosaic.version = 11 : i64} {
  func.func @lstm_last_kernel(%arg0: memref<16x8x8xf32, #tpu.memory_space<vmem>>, %arg1: memref<8x512xbf16, #tpu.memory_space<vmem>>, %arg2: memref<128x512xbf16, #tpu.memory_space<vmem>>, %arg3: memref<1x512xf32, #tpu.memory_space<vmem>>, %arg4: memref<8x128xf32, #tpu.memory_space<vmem>>, %arg5: memref<128x512xf32, #tpu.memory_space<vmem>>, %arg6: memref<8x128xf32, #tpu.memory_space<vmem>>, %arg7: memref<8x128xf32, #tpu.memory_space<vmem>>) attributes {dimension_semantics = [], scalar_prefetch = 0 : i64, scratch_operands = 3 : i64, tpu.core_type = #tpu.core_type<tc>} {
    %c0 = arith.constant 0 : index
    %c0_0 = arith.constant 0 : index
    %c0_1 = arith.constant 0 : index
    %0 = vector.load %arg0[%c0, %c0_0, %c0_1] : memref<16x8x8xf32, #tpu.memory_space<vmem>>, vector<16x8x8xf32>
    %1 = vector.shape_cast %0 : vector<16x8x8xf32> to vector<128x8xf32>
    %2 = arith.truncf %1 : vector<128x8xf32> to vector<128x8xbf16>
    %c0_2 = arith.constant 0 : index
    %c0_3 = arith.constant 0 : index
    %3 = vector.load %arg1[%c0_2, %c0_3] : memref<8x512xbf16, #tpu.memory_space<vmem>>, vector<8x512xbf16>
    %cst = arith.constant dense<0.000000e+00> : vector<128x512xf32>
    %4 = tpu.matmul %2, %3, %cst {dimension_numbers = #tpu.dot_dimension_numbers<[1], [0], [0], [1], [0, 0, 1, 1], [], []>} : vector<128x8xbf16>, vector<8x512xbf16>, vector<128x512xf32> -> vector<128x512xf32>
    %c0_4 = arith.constant 0 : index
    %c0_5 = arith.constant 0 : index
    %5 = vector.load %arg3[%c0_4, %c0_5] : memref<1x512xf32, #tpu.memory_space<vmem>>, vector<1x512xf32>
    %6 = vector.broadcast %5 : vector<1x512xf32> to vector<128x512xf32>
    %7 = arith.addf %4, %6 : vector<128x512xf32>
    %c0_6 = arith.constant 0 : index
    %c0_7 = arith.constant 0 : index
    %8 = vector.load %arg5[%c0_6, %c0_7] : memref<128x512xf32, #tpu.memory_space<vmem>>, vector<128x512xf32>
    tpu.vector_store %arg5[%c0_6, %c0_7], %7 {strides = array<i32>} : memref<128x512xf32, #tpu.memory_space<vmem>>, vector<128x512xf32>,
    %cst_8 = arith.constant 0.000000e+00 : f32
    %9 = vector.broadcast %cst_8 : f32 to vector<8x128xf32>
    %c0_9 = arith.constant 0 : index
    %c0_10 = arith.constant 0 : index
    %10 = vector.load %arg6[%c0_9, %c0_10] : memref<8x128xf32, #tpu.memory_space<vmem>>, vector<8x128xf32>
    tpu.vector_store %arg6[%c0_9, %c0_10], %9 {strides = array<i32>} : memref<8x128xf32, #tpu.memory_space<vmem>>, vector<8x128xf32>,
    %cst_11 = arith.constant 0.000000e+00 : f32
    %11 = vector.broadcast %cst_11 : f32 to vector<8x128xf32>
    %c0_12 = arith.constant 0 : index
    %c0_13 = arith.constant 0 : index
    %12 = vector.load %arg7[%c0_12, %c0_13] : memref<8x128xf32, #tpu.memory_space<vmem>>, vector<8x128xf32>
    tpu.vector_store %arg7[%c0_12, %c0_13], %11 {strides = array<i32>} : memref<8x128xf32, #tpu.memory_space<vmem>>, vector<8x128xf32>,
    %c0_i32 = arith.constant 0 : i32
    %c8_i32 = arith.constant 8 : i32
    %13 = arith.muli %c0_i32, %c8_i32 : i32
    %14 = tpu.assume_multiple %13, 8 : i32
    %15 = arith.index_cast %14 : i32 to index
    %c0_14 = arith.constant 0 : index
    %16 = vector.load %arg5[%15, %c0_14] : memref<128x512xf32, #tpu.memory_space<vmem>>, vector<8x512xf32>
    %c0_15 = arith.constant 0 : index
    %c0_16 = arith.constant 0 : index
    %17 = vector.load %arg6[%c0_15, %c0_16] : memref<8x128xf32, #tpu.memory_space<vmem>>, vector<8x128xf32>
    %18 = arith.truncf %17 : vector<8x128xf32> to vector<8x128xbf16>
    %c0_17 = arith.constant 0 : index
    %c0_18 = arith.constant 0 : index
    %19 = vector.load %arg2[%c0_17, %c0_18] : memref<128x512xbf16, #tpu.memory_space<vmem>>, vector<128x512xbf16>
    %cst_19 = arith.constant dense<0.000000e+00> : vector<8x512xf32>
    %20 = tpu.matmul %18, %19, %cst_19 {dimension_numbers = #tpu.dot_dimension_numbers<[1], [0], [0], [1], [0, 0, 1, 1], [], []>} : vector<8x128xbf16>, vector<128x512xbf16>, vector<8x512xf32> -> vector<8x512xf32>
    %21 = arith.addf %16, %20 : vector<8x512xf32>
    %22 = vector.extract_strided_slice %21 {offsets = [0, 0], sizes = [8, 128], strides = [1, 1]} : vector<8x512xf32> to vector<8x128xf32>
    %23 = arith.negf %22 : vector<8x128xf32>
    %24 = math.exp %23 : vector<8x128xf32>
    %cst_20 = arith.constant 1.000000e+00 : f32
    %25 = vector.broadcast %cst_20 : f32 to vector<8x128xf32>
    %26 = arith.addf %25, %24 : vector<8x128xf32>
    %27 = arith.divf %25, %26 : vector<8x128xf32>
    %28 = vector.extract_strided_slice %21 {offsets = [0, 128], sizes = [8, 128], strides = [1, 1]} : vector<8x512xf32> to vector<8x128xf32>
    %29 = arith.negf %28 : vector<8x128xf32>
    %30 = math.exp %29 : vector<8x128xf32>
    %cst_21 = arith.constant 1.000000e+00 : f32
    %31 = vector.broadcast %cst_21 : f32 to vector<8x128xf32>
    %32 = arith.addf %31, %30 : vector<8x128xf32>
    %33 = arith.divf %31, %32 : vector<8x128xf32>
    %34 = vector.extract_strided_slice %21 {offsets = [0, 256], sizes = [8, 128], strides = [1, 1]} : vector<8x512xf32> to vector<8x128xf32>
    %35 = math.tanh %34 : vector<8x128xf32>
    %36 = vector.extract_strided_slice %21 {offsets = [0, 384], sizes = [8, 128], strides = [1, 1]} : vector<8x512xf32> to vector<8x128xf32>
    %37 = arith.negf %36 : vector<8x128xf32>
    %38 = math.exp %37 : vector<8x128xf32>
    %cst_22 = arith.constant 1.000000e+00 : f32
    %39 = vector.broadcast %cst_22 : f32 to vector<8x128xf32>
    %40 = arith.addf %39, %38 : vector<8x128xf32>
    %41 = arith.divf %39, %40 : vector<8x128xf32>
    %c0_23 = arith.constant 0 : index
    %c0_24 = arith.constant 0 : index
    %42 = vector.load %arg7[%c0_23, %c0_24] : memref<8x128xf32, #tpu.memory_space<vmem>>, vector<8x128xf32>
    %43 = arith.mulf %33, %42 : vector<8x128xf32>
    %44 = arith.mulf %27, %35 : vector<8x128xf32>
    %45 = arith.addf %43, %44 : vector<8x128xf32>
    %46 = math.tanh %45 : vector<8x128xf32>
    %47 = arith.mulf %41, %46 : vector<8x128xf32>
    %c0_25 = arith.constant 0 : index
    %c0_26 = arith.constant 0 : index
    %48 = vector.load %arg6[%c0_25, %c0_26] : memref<8x128xf32, #tpu.memory_space<vmem>>, vector<8x128xf32>
    tpu.vector_store %arg6[%c0_25, %c0_26], %47 {strides = array<i32>} : memref<8x128xf32, #tpu.memory_space<vmem>>, vector<8x128xf32>,
    %c0_27 = arith.constant 0 : index
    %c0_28 = arith.constant 0 : index
    %49 = vector.load %arg7[%c0_27, %c0_28] : memref<8x128xf32, #tpu.memory_space<vmem>>, vector<8x128xf32>
    tpu.vector_store %arg7[%c0_27, %c0_28], %45 {strides = array<i32>} : memref<8x128xf32, #tpu.memory_space<vmem>>, vector<8x128xf32>,
    %c1_i32 = arith.constant 1 : i32
    %c8_i32_29 = arith.constant 8 : i32
    %50 = arith.muli %c1_i32, %c8_i32_29 : i32
    %51 = tpu.assume_multiple %50, 8 : i32
    %52 = arith.index_cast %51 : i32 to index
    %c0_30 = arith.constant 0 : index
    %53 = vector.load %arg5[%52, %c0_30] : memref<128x512xf32, #tpu.memory_space<vmem>>, vector<8x512xf32>
    %c0_31 = arith.constant 0 : index
    %c0_32 = arith.constant 0 : index
    %54 = vector.load %arg6[%c0_31, %c0_32] : memref<8x128xf32, #tpu.memory_space<vmem>>, vector<8x128xf32>
    %55 = arith.truncf %54 : vector<8x128xf32> to vector<8x128xbf16>
    %c0_33 = arith.constant 0 : index
    %c0_34 = arith.constant 0 : index
    %56 = vector.load %arg2[%c0_33, %c0_34] : memref<128x512xbf16, #tpu.memory_space<vmem>>, vector<128x512xbf16>
    %cst_35 = arith.constant dense<0.000000e+00> : vector<8x512xf32>
    %57 = tpu.matmul %55, %56, %cst_35 {dimension_numbers = #tpu.dot_dimension_numbers<[1], [0], [0], [1], [0, 0, 1, 1], [], []>} : vector<8x128xbf16>, vector<128x512xbf16>, vector<8x512xf32> -> vector<8x512xf32>
    %58 = arith.addf %53, %57 : vector<8x512xf32>
    %59 = vector.extract_strided_slice %58 {offsets = [0, 0], sizes = [8, 128], strides = [1, 1]} : vector<8x512xf32> to vector<8x128xf32>
    %60 = arith.negf %59 : vector<8x128xf32>
    %61 = math.exp %60 : vector<8x128xf32>
    %cst_36 = arith.constant 1.000000e+00 : f32
    %62 = vector.broadcast %cst_36 : f32 to vector<8x128xf32>
    %63 = arith.addf %62, %61 : vector<8x128xf32>
    %64 = arith.divf %62, %63 : vector<8x128xf32>
    %65 = vector.extract_strided_slice %58 {offsets = [0, 128], sizes = [8, 128], strides = [1, 1]} : vector<8x512xf32> to vector<8x128xf32>
    %66 = arith.negf %65 : vector<8x128xf32>
    %67 = math.exp %66 : vector<8x128xf32>
    %cst_37 = arith.constant 1.000000e+00 : f32
    %68 = vector.broadcast %cst_37 : f32 to vector<8x128xf32>
    %69 = arith.addf %68, %67 : vector<8x128xf32>
    %70 = arith.divf %68, %69 : vector<8x128xf32>
    %71 = vector.extract_strided_slice %58 {offsets = [0, 256], sizes = [8, 128], strides = [1, 1]} : vector<8x512xf32> to vector<8x128xf32>
    %72 = math.tanh %71 : vector<8x128xf32>
    %73 = vector.extract_strided_slice %58 {offsets = [0, 384], sizes = [8, 128], strides = [1, 1]} : vector<8x512xf32> to vector<8x128xf32>
    %74 = arith.negf %73 : vector<8x128xf32>
    %75 = math.exp %74 : vector<8x128xf32>
    %cst_38 = arith.constant 1.000000e+00 : f32
    %76 = vector.broadcast %cst_38 : f32 to vector<8x128xf32>
    %77 = arith.addf %76, %75 : vector<8x128xf32>
    %78 = arith.divf %76, %77 : vector<8x128xf32>
    %c0_39 = arith.constant 0 : index
    %c0_40 = arith.constant 0 : index
    %79 = vector.load %arg7[%c0_39, %c0_40] : memref<8x128xf32, #tpu.memory_space<vmem>>, vector<8x128xf32>
    %80 = arith.mulf %70, %79 : vector<8x128xf32>
    %81 = arith.mulf %64, %72 : vector<8x128xf32>
    %82 = arith.addf %80, %81 : vector<8x128xf32>
    %83 = math.tanh %82 : vector<8x128xf32>
    %84 = arith.mulf %78, %83 : vector<8x128xf32>
    %c0_41 = arith.constant 0 : index
    %c0_42 = arith.constant 0 : index
    %85 = vector.load %arg6[%c0_41, %c0_42] : memref<8x128xf32, #tpu.memory_space<vmem>>, vector<8x128xf32>
    tpu.vector_store %arg6[%c0_41, %c0_42], %84 {strides = array<i32>} : memref<8x128xf32, #tpu.memory_space<vmem>>, vector<8x128xf32>,
    %c0_43 = arith.constant 0 : index
    %c0_44 = arith.constant 0 : index
    %86 = vector.load %arg7[%c0_43, %c0_44] : memref<8x128xf32, #tpu.memory_space<vmem>>, vector<8x128xf32>
    tpu.vector_store %arg7[%c0_43, %c0_44], %82 {strides = array<i32>} : memref<8x128xf32, #tpu.memory_space<vmem>>, vector<8x128xf32>,
    %c2_i32 = arith.constant 2 : i32
    %c8_i32_45 = arith.constant 8 : i32
    %87 = arith.muli %c2_i32, %c8_i32_45 : i32
    %88 = tpu.assume_multiple %87, 8 : i32
    %89 = arith.index_cast %88 : i32 to index
    %c0_46 = arith.constant 0 : index
    %90 = vector.load %arg5[%89, %c0_46] : memref<128x512xf32, #tpu.memory_space<vmem>>, vector<8x512xf32>
    %c0_47 = arith.constant 0 : index
    %c0_48 = arith.constant 0 : index
    %91 = vector.load %arg6[%c0_47, %c0_48] : memref<8x128xf32, #tpu.memory_space<vmem>>, vector<8x128xf32>
    %92 = arith.truncf %91 : vector<8x128xf32> to vector<8x128xbf16>
    %c0_49 = arith.constant 0 : index
    %c0_50 = arith.constant 0 : index
    %93 = vector.load %arg2[%c0_49, %c0_50] : memref<128x512xbf16, #tpu.memory_space<vmem>>, vector<128x512xbf16>
    %cst_51 = arith.constant dense<0.000000e+00> : vector<8x512xf32>
    %94 = tpu.matmul %92, %93, %cst_51 {dimension_numbers = #tpu.dot_dimension_numbers<[1], [0], [0], [1], [0, 0, 1, 1], [], []>} : vector<8x128xbf16>, vector<128x512xbf16>, vector<8x512xf32> -> vector<8x512xf32>
    %95 = arith.addf %90, %94 : vector<8x512xf32>
    %96 = vector.extract_strided_slice %95 {offsets = [0, 0], sizes = [8, 128], strides = [1, 1]} : vector<8x512xf32> to vector<8x128xf32>
    %97 = arith.negf %96 : vector<8x128xf32>
    %98 = math.exp %97 : vector<8x128xf32>
    %cst_52 = arith.constant 1.000000e+00 : f32
    %99 = vector.broadcast %cst_52 : f32 to vector<8x128xf32>
    %100 = arith.addf %99, %98 : vector<8x128xf32>
    %101 = arith.divf %99, %100 : vector<8x128xf32>
    %102 = vector.extract_strided_slice %95 {offsets = [0, 128], sizes = [8, 128], strides = [1, 1]} : vector<8x512xf32> to vector<8x128xf32>
    %103 = arith.negf %102 : vector<8x128xf32>
    %104 = math.exp %103 : vector<8x128xf32>
    %cst_53 = arith.constant 1.000000e+00 : f32
    %105 = vector.broadcast %cst_53 : f32 to vector<8x128xf32>
    %106 = arith.addf %105, %104 : vector<8x128xf32>
    %107 = arith.divf %105, %106 : vector<8x128xf32>
    %108 = vector.extract_strided_slice %95 {offsets = [0, 256], sizes = [8, 128], strides = [1, 1]} : vector<8x512xf32> to vector<8x128xf32>
    %109 = math.tanh %108 : vector<8x128xf32>
    %110 = vector.extract_strided_slice %95 {offsets = [0, 384], sizes = [8, 128], strides = [1, 1]} : vector<8x512xf32> to vector<8x128xf32>
    %111 = arith.negf %110 : vector<8x128xf32>
    %112 = math.exp %111 : vector<8x128xf32>
    %cst_54 = arith.constant 1.000000e+00 : f32
    %113 = vector.broadcast %cst_54 : f32 to vector<8x128xf32>
    %114 = arith.addf %113, %112 : vector<8x128xf32>
    %115 = arith.divf %113, %114 : vector<8x128xf32>
    %c0_55 = arith.constant 0 : index
    %c0_56 = arith.constant 0 : index
    %116 = vector.load %arg7[%c0_55, %c0_56] : memref<8x128xf32, #tpu.memory_space<vmem>>, vector<8x128xf32>
    %117 = arith.mulf %107, %116 : vector<8x128xf32>
    %118 = arith.mulf %101, %109 : vector<8x128xf32>
    %119 = arith.addf %117, %118 : vector<8x128xf32>
    %120 = math.tanh %119 : vector<8x128xf32>
    %121 = arith.mulf %115, %120 : vector<8x128xf32>
    %c0_57 = arith.constant 0 : index
    %c0_58 = arith.constant 0 : index
    %122 = vector.load %arg6[%c0_57, %c0_58] : memref<8x128xf32, #tpu.memory_space<vmem>>, vector<8x128xf32>
    tpu.vector_store %arg6[%c0_57, %c0_58], %121 {strides = array<i32>} : memref<8x128xf32, #tpu.memory_space<vmem>>, vector<8x128xf32>,
    %c0_59 = arith.constant 0 : index
    %c0_60 = arith.constant 0 : index
    %123 = vector.load %arg7[%c0_59, %c0_60] : memref<8x128xf32, #tpu.memory_space<vmem>>, vector<8x128xf32>
    tpu.vector_store %arg7[%c0_59, %c0_60], %119 {strides = array<i32>} : memref<8x128xf32, #tpu.memory_space<vmem>>, vector<8x128xf32>,
    %c3_i32 = arith.constant 3 : i32
    %c8_i32_61 = arith.constant 8 : i32
    %124 = arith.muli %c3_i32, %c8_i32_61 : i32
    %125 = tpu.assume_multiple %124, 8 : i32
    %126 = arith.index_cast %125 : i32 to index
    %c0_62 = arith.constant 0 : index
    %127 = vector.load %arg5[%126, %c0_62] : memref<128x512xf32, #tpu.memory_space<vmem>>, vector<8x512xf32>
    %c0_63 = arith.constant 0 : index
    %c0_64 = arith.constant 0 : index
    %128 = vector.load %arg6[%c0_63, %c0_64] : memref<8x128xf32, #tpu.memory_space<vmem>>, vector<8x128xf32>
    %129 = arith.truncf %128 : vector<8x128xf32> to vector<8x128xbf16>
    %c0_65 = arith.constant 0 : index
    %c0_66 = arith.constant 0 : index
    %130 = vector.load %arg2[%c0_65, %c0_66] : memref<128x512xbf16, #tpu.memory_space<vmem>>, vector<128x512xbf16>
    %cst_67 = arith.constant dense<0.000000e+00> : vector<8x512xf32>
    %131 = tpu.matmul %129, %130, %cst_67 {dimension_numbers = #tpu.dot_dimension_numbers<[1], [0], [0], [1], [0, 0, 1, 1], [], []>} : vector<8x128xbf16>, vector<128x512xbf16>, vector<8x512xf32> -> vector<8x512xf32>
    %132 = arith.addf %127, %131 : vector<8x512xf32>
    %133 = vector.extract_strided_slice %132 {offsets = [0, 0], sizes = [8, 128], strides = [1, 1]} : vector<8x512xf32> to vector<8x128xf32>
    %134 = arith.negf %133 : vector<8x128xf32>
    %135 = math.exp %134 : vector<8x128xf32>
    %cst_68 = arith.constant 1.000000e+00 : f32
    %136 = vector.broadcast %cst_68 : f32 to vector<8x128xf32>
    %137 = arith.addf %136, %135 : vector<8x128xf32>
    %138 = arith.divf %136, %137 : vector<8x128xf32>
    %139 = vector.extract_strided_slice %132 {offsets = [0, 128], sizes = [8, 128], strides = [1, 1]} : vector<8x512xf32> to vector<8x128xf32>
    %140 = arith.negf %139 : vector<8x128xf32>
    %141 = math.exp %140 : vector<8x128xf32>
    %cst_69 = arith.constant 1.000000e+00 : f32
    %142 = vector.broadcast %cst_69 : f32 to vector<8x128xf32>
    %143 = arith.addf %142, %141 : vector<8x128xf32>
    %144 = arith.divf %142, %143 : vector<8x128xf32>
    %145 = vector.extract_strided_slice %132 {offsets = [0, 256], sizes = [8, 128], strides = [1, 1]} : vector<8x512xf32> to vector<8x128xf32>
    %146 = math.tanh %145 : vector<8x128xf32>
    %147 = vector.extract_strided_slice %132 {offsets = [0, 384], sizes = [8, 128], strides = [1, 1]} : vector<8x512xf32> to vector<8x128xf32>
    %148 = arith.negf %147 : vector<8x128xf32>
    %149 = math.exp %148 : vector<8x128xf32>
    %cst_70 = arith.constant 1.000000e+00 : f32
    %150 = vector.broadcast %cst_70 : f32 to vector<8x128xf32>
    %151 = arith.addf %150, %149 : vector<8x128xf32>
    %152 = arith.divf %150, %151 : vector<8x128xf32>
    %c0_71 = arith.constant 0 : index
    %c0_72 = arith.constant 0 : index
    %153 = vector.load %arg7[%c0_71, %c0_72] : memref<8x128xf32, #tpu.memory_space<vmem>>, vector<8x128xf32>
    %154 = arith.mulf %144, %153 : vector<8x128xf32>
    %155 = arith.mulf %138, %146 : vector<8x128xf32>
    %156 = arith.addf %154, %155 : vector<8x128xf32>
    %157 = math.tanh %156 : vector<8x128xf32>
    %158 = arith.mulf %152, %157 : vector<8x128xf32>
    %c0_73 = arith.constant 0 : index
    %c0_74 = arith.constant 0 : index
    %159 = vector.load %arg6[%c0_73, %c0_74] : memref<8x128xf32, #tpu.memory_space<vmem>>, vector<8x128xf32>
    tpu.vector_store %arg6[%c0_73, %c0_74], %158 {strides = array<i32>} : memref<8x128xf32, #tpu.memory_space<vmem>>, vector<8x128xf32>,
    %c0_75 = arith.constant 0 : index
    %c0_76 = arith.constant 0 : index
    %160 = vector.load %arg7[%c0_75, %c0_76] : memref<8x128xf32, #tpu.memory_space<vmem>>, vector<8x128xf32>
    tpu.vector_store %arg7[%c0_75, %c0_76], %156 {strides = array<i32>} : memref<8x128xf32, #tpu.memory_space<vmem>>, vector<8x128xf32>,
    %c4_i32 = arith.constant 4 : i32
    %c8_i32_77 = arith.constant 8 : i32
    %161 = arith.muli %c4_i32, %c8_i32_77 : i32
    %162 = tpu.assume_multiple %161, 8 : i32
    %163 = arith.index_cast %162 : i32 to index
    %c0_78 = arith.constant 0 : index
    %164 = vector.load %arg5[%163, %c0_78] : memref<128x512xf32, #tpu.memory_space<vmem>>, vector<8x512xf32>
    %c0_79 = arith.constant 0 : index
    %c0_80 = arith.constant 0 : index
    %165 = vector.load %arg6[%c0_79, %c0_80] : memref<8x128xf32, #tpu.memory_space<vmem>>, vector<8x128xf32>
    %166 = arith.truncf %165 : vector<8x128xf32> to vector<8x128xbf16>
    %c0_81 = arith.constant 0 : index
    %c0_82 = arith.constant 0 : index
    %167 = vector.load %arg2[%c0_81, %c0_82] : memref<128x512xbf16, #tpu.memory_space<vmem>>, vector<128x512xbf16>
    %cst_83 = arith.constant dense<0.000000e+00> : vector<8x512xf32>
    %168 = tpu.matmul %166, %167, %cst_83 {dimension_numbers = #tpu.dot_dimension_numbers<[1], [0], [0], [1], [0, 0, 1, 1], [], []>} : vector<8x128xbf16>, vector<128x512xbf16>, vector<8x512xf32> -> vector<8x512xf32>
    %169 = arith.addf %164, %168 : vector<8x512xf32>
    %170 = vector.extract_strided_slice %169 {offsets = [0, 0], sizes = [8, 128], strides = [1, 1]} : vector<8x512xf32> to vector<8x128xf32>
    %171 = arith.negf %170 : vector<8x128xf32>
    %172 = math.exp %171 : vector<8x128xf32>
    %cst_84 = arith.constant 1.000000e+00 : f32
    %173 = vector.broadcast %cst_84 : f32 to vector<8x128xf32>
    %174 = arith.addf %173, %172 : vector<8x128xf32>
    %175 = arith.divf %173, %174 : vector<8x128xf32>
    %176 = vector.extract_strided_slice %169 {offsets = [0, 128], sizes = [8, 128], strides = [1, 1]} : vector<8x512xf32> to vector<8x128xf32>
    %177 = arith.negf %176 : vector<8x128xf32>
    %178 = math.exp %177 : vector<8x128xf32>
    %cst_85 = arith.constant 1.000000e+00 : f32
    %179 = vector.broadcast %cst_85 : f32 to vector<8x128xf32>
    %180 = arith.addf %179, %178 : vector<8x128xf32>
    %181 = arith.divf %179, %180 : vector<8x128xf32>
    %182 = vector.extract_strided_slice %169 {offsets = [0, 256], sizes = [8, 128], strides = [1, 1]} : vector<8x512xf32> to vector<8x128xf32>
    %183 = math.tanh %182 : vector<8x128xf32>
    %184 = vector.extract_strided_slice %169 {offsets = [0, 384], sizes = [8, 128], strides = [1, 1]} : vector<8x512xf32> to vector<8x128xf32>
    %185 = arith.negf %184 : vector<8x128xf32>
    %186 = math.exp %185 : vector<8x128xf32>
    %cst_86 = arith.constant 1.000000e+00 : f32
    %187 = vector.broadcast %cst_86 : f32 to vector<8x128xf32>
    %188 = arith.addf %187, %186 : vector<8x128xf32>
    %189 = arith.divf %187, %188 : vector<8x128xf32>
    %c0_87 = arith.constant 0 : index
    %c0_88 = arith.constant 0 : index
    %190 = vector.load %arg7[%c0_87, %c0_88] : memref<8x128xf32, #tpu.memory_space<vmem>>, vector<8x128xf32>
    %191 = arith.mulf %181, %190 : vector<8x128xf32>
    %192 = arith.mulf %175, %183 : vector<8x128xf32>
    %193 = arith.addf %191, %192 : vector<8x128xf32>
    %194 = math.tanh %193 : vector<8x128xf32>
    %195 = arith.mulf %189, %194 : vector<8x128xf32>
    %c0_89 = arith.constant 0 : index
    %c0_90 = arith.constant 0 : index
    %196 = vector.load %arg6[%c0_89, %c0_90] : memref<8x128xf32, #tpu.memory_space<vmem>>, vector<8x128xf32>
    tpu.vector_store %arg6[%c0_89, %c0_90], %195 {strides = array<i32>} : memref<8x128xf32, #tpu.memory_space<vmem>>, vector<8x128xf32>,
    %c0_91 = arith.constant 0 : index
    %c0_92 = arith.constant 0 : index
    %197 = vector.load %arg7[%c0_91, %c0_92] : memref<8x128xf32, #tpu.memory_space<vmem>>, vector<8x128xf32>
    tpu.vector_store %arg7[%c0_91, %c0_92], %193 {strides = array<i32>} : memref<8x128xf32, #tpu.memory_space<vmem>>, vector<8x128xf32>,
    %c5_i32 = arith.constant 5 : i32
    %c8_i32_93 = arith.constant 8 : i32
    %198 = arith.muli %c5_i32, %c8_i32_93 : i32
    %199 = tpu.assume_multiple %198, 8 : i32
    %200 = arith.index_cast %199 : i32 to index
    %c0_94 = arith.constant 0 : index
    %201 = vector.load %arg5[%200, %c0_94] : memref<128x512xf32, #tpu.memory_space<vmem>>, vector<8x512xf32>
    %c0_95 = arith.constant 0 : index
    %c0_96 = arith.constant 0 : index
    %202 = vector.load %arg6[%c0_95, %c0_96] : memref<8x128xf32, #tpu.memory_space<vmem>>, vector<8x128xf32>
    %203 = arith.truncf %202 : vector<8x128xf32> to vector<8x128xbf16>
    %c0_97 = arith.constant 0 : index
    %c0_98 = arith.constant 0 : index
    %204 = vector.load %arg2[%c0_97, %c0_98] : memref<128x512xbf16, #tpu.memory_space<vmem>>, vector<128x512xbf16>
    %cst_99 = arith.constant dense<0.000000e+00> : vector<8x512xf32>
    %205 = tpu.matmul %203, %204, %cst_99 {dimension_numbers = #tpu.dot_dimension_numbers<[1], [0], [0], [1], [0, 0, 1, 1], [], []>} : vector<8x128xbf16>, vector<128x512xbf16>, vector<8x512xf32> -> vector<8x512xf32>
    %206 = arith.addf %201, %205 : vector<8x512xf32>
    %207 = vector.extract_strided_slice %206 {offsets = [0, 0], sizes = [8, 128], strides = [1, 1]} : vector<8x512xf32> to vector<8x128xf32>
    %208 = arith.negf %207 : vector<8x128xf32>
    %209 = math.exp %208 : vector<8x128xf32>
    %cst_100 = arith.constant 1.000000e+00 : f32
    %210 = vector.broadcast %cst_100 : f32 to vector<8x128xf32>
    %211 = arith.addf %210, %209 : vector<8x128xf32>
    %212 = arith.divf %210, %211 : vector<8x128xf32>
    %213 = vector.extract_strided_slice %206 {offsets = [0, 128], sizes = [8, 128], strides = [1, 1]} : vector<8x512xf32> to vector<8x128xf32>
    %214 = arith.negf %213 : vector<8x128xf32>
    %215 = math.exp %214 : vector<8x128xf32>
    %cst_101 = arith.constant 1.000000e+00 : f32
    %216 = vector.broadcast %cst_101 : f32 to vector<8x128xf32>
    %217 = arith.addf %216, %215 : vector<8x128xf32>
    %218 = arith.divf %216, %217 : vector<8x128xf32>
    %219 = vector.extract_strided_slice %206 {offsets = [0, 256], sizes = [8, 128], strides = [1, 1]} : vector<8x512xf32> to vector<8x128xf32>
    %220 = math.tanh %219 : vector<8x128xf32>
    %221 = vector.extract_strided_slice %206 {offsets = [0, 384], sizes = [8, 128], strides = [1, 1]} : vector<8x512xf32> to vector<8x128xf32>
    %222 = arith.negf %221 : vector<8x128xf32>
    %223 = math.exp %222 : vector<8x128xf32>
    %cst_102 = arith.constant 1.000000e+00 : f32
    %224 = vector.broadcast %cst_102 : f32 to vector<8x128xf32>
    %225 = arith.addf %224, %223 : vector<8x128xf32>
    %226 = arith.divf %224, %225 : vector<8x128xf32>
    %c0_103 = arith.constant 0 : index
    %c0_104 = arith.constant 0 : index
    %227 = vector.load %arg7[%c0_103, %c0_104] : memref<8x128xf32, #tpu.memory_space<vmem>>, vector<8x128xf32>
    %228 = arith.mulf %218, %227 : vector<8x128xf32>
    %229 = arith.mulf %212, %220 : vector<8x128xf32>
    %230 = arith.addf %228, %229 : vector<8x128xf32>
    %231 = math.tanh %230 : vector<8x128xf32>
    %232 = arith.mulf %226, %231 : vector<8x128xf32>
    %c0_105 = arith.constant 0 : index
    %c0_106 = arith.constant 0 : index
    %233 = vector.load %arg6[%c0_105, %c0_106] : memref<8x128xf32, #tpu.memory_space<vmem>>, vector<8x128xf32>
    tpu.vector_store %arg6[%c0_105, %c0_106], %232 {strides = array<i32>} : memref<8x128xf32, #tpu.memory_space<vmem>>, vector<8x128xf32>,
    %c0_107 = arith.constant 0 : index
    %c0_108 = arith.constant 0 : index
    %234 = vector.load %arg7[%c0_107, %c0_108] : memref<8x128xf32, #tpu.memory_space<vmem>>, vector<8x128xf32>
    tpu.vector_store %arg7[%c0_107, %c0_108], %230 {strides = array<i32>} : memref<8x128xf32, #tpu.memory_space<vmem>>, vector<8x128xf32>,
    %c6_i32 = arith.constant 6 : i32
    %c8_i32_109 = arith.constant 8 : i32
    %235 = arith.muli %c6_i32, %c8_i32_109 : i32
    %236 = tpu.assume_multiple %235, 8 : i32
    %237 = arith.index_cast %236 : i32 to index
    %c0_110 = arith.constant 0 : index
    %238 = vector.load %arg5[%237, %c0_110] : memref<128x512xf32, #tpu.memory_space<vmem>>, vector<8x512xf32>
    %c0_111 = arith.constant 0 : index
    %c0_112 = arith.constant 0 : index
    %239 = vector.load %arg6[%c0_111, %c0_112] : memref<8x128xf32, #tpu.memory_space<vmem>>, vector<8x128xf32>
    %240 = arith.truncf %239 : vector<8x128xf32> to vector<8x128xbf16>
    %c0_113 = arith.constant 0 : index
    %c0_114 = arith.constant 0 : index
    %241 = vector.load %arg2[%c0_113, %c0_114] : memref<128x512xbf16, #tpu.memory_space<vmem>>, vector<128x512xbf16>
    %cst_115 = arith.constant dense<0.000000e+00> : vector<8x512xf32>
    %242 = tpu.matmul %240, %241, %cst_115 {dimension_numbers = #tpu.dot_dimension_numbers<[1], [0], [0], [1], [0, 0, 1, 1], [], []>} : vector<8x128xbf16>, vector<128x512xbf16>, vector<8x512xf32> -> vector<8x512xf32>
    %243 = arith.addf %238, %242 : vector<8x512xf32>
    %244 = vector.extract_strided_slice %243 {offsets = [0, 0], sizes = [8, 128], strides = [1, 1]} : vector<8x512xf32> to vector<8x128xf32>
    %245 = arith.negf %244 : vector<8x128xf32>
    %246 = math.exp %245 : vector<8x128xf32>
    %cst_116 = arith.constant 1.000000e+00 : f32
    %247 = vector.broadcast %cst_116 : f32 to vector<8x128xf32>
    %248 = arith.addf %247, %246 : vector<8x128xf32>
    %249 = arith.divf %247, %248 : vector<8x128xf32>
    %250 = vector.extract_strided_slice %243 {offsets = [0, 128], sizes = [8, 128], strides = [1, 1]} : vector<8x512xf32> to vector<8x128xf32>
    %251 = arith.negf %250 : vector<8x128xf32>
    %252 = math.exp %251 : vector<8x128xf32>
    %cst_117 = arith.constant 1.000000e+00 : f32
    %253 = vector.broadcast %cst_117 : f32 to vector<8x128xf32>
    %254 = arith.addf %253, %252 : vector<8x128xf32>
    %255 = arith.divf %253, %254 : vector<8x128xf32>
    %256 = vector.extract_strided_slice %243 {offsets = [0, 256], sizes = [8, 128], strides = [1, 1]} : vector<8x512xf32> to vector<8x128xf32>
    %257 = math.tanh %256 : vector<8x128xf32>
    %258 = vector.extract_strided_slice %243 {offsets = [0, 384], sizes = [8, 128], strides = [1, 1]} : vector<8x512xf32> to vector<8x128xf32>
    %259 = arith.negf %258 : vector<8x128xf32>
    %260 = math.exp %259 : vector<8x128xf32>
    %cst_118 = arith.constant 1.000000e+00 : f32
    %261 = vector.broadcast %cst_118 : f32 to vector<8x128xf32>
    %262 = arith.addf %261, %260 : vector<8x128xf32>
    %263 = arith.divf %261, %262 : vector<8x128xf32>
    %c0_119 = arith.constant 0 : index
    %c0_120 = arith.constant 0 : index
    %264 = vector.load %arg7[%c0_119, %c0_120] : memref<8x128xf32, #tpu.memory_space<vmem>>, vector<8x128xf32>
    %265 = arith.mulf %255, %264 : vector<8x128xf32>
    %266 = arith.mulf %249, %257 : vector<8x128xf32>
    %267 = arith.addf %265, %266 : vector<8x128xf32>
    %268 = math.tanh %267 : vector<8x128xf32>
    %269 = arith.mulf %263, %268 : vector<8x128xf32>
    %c0_121 = arith.constant 0 : index
    %c0_122 = arith.constant 0 : index
    %270 = vector.load %arg6[%c0_121, %c0_122] : memref<8x128xf32, #tpu.memory_space<vmem>>, vector<8x128xf32>
    tpu.vector_store %arg6[%c0_121, %c0_122], %269 {strides = array<i32>} : memref<8x128xf32, #tpu.memory_space<vmem>>, vector<8x128xf32>,
    %c0_123 = arith.constant 0 : index
    %c0_124 = arith.constant 0 : index
    %271 = vector.load %arg7[%c0_123, %c0_124] : memref<8x128xf32, #tpu.memory_space<vmem>>, vector<8x128xf32>
    tpu.vector_store %arg7[%c0_123, %c0_124], %267 {strides = array<i32>} : memref<8x128xf32, #tpu.memory_space<vmem>>, vector<8x128xf32>,
    %c7_i32 = arith.constant 7 : i32
    %c8_i32_125 = arith.constant 8 : i32
    %272 = arith.muli %c7_i32, %c8_i32_125 : i32
    %273 = tpu.assume_multiple %272, 8 : i32
    %274 = arith.index_cast %273 : i32 to index
    %c0_126 = arith.constant 0 : index
    %275 = vector.load %arg5[%274, %c0_126] : memref<128x512xf32, #tpu.memory_space<vmem>>, vector<8x512xf32>
    %c0_127 = arith.constant 0 : index
    %c0_128 = arith.constant 0 : index
    %276 = vector.load %arg6[%c0_127, %c0_128] : memref<8x128xf32, #tpu.memory_space<vmem>>, vector<8x128xf32>
    %277 = arith.truncf %276 : vector<8x128xf32> to vector<8x128xbf16>
    %c0_129 = arith.constant 0 : index
    %c0_130 = arith.constant 0 : index
    %278 = vector.load %arg2[%c0_129, %c0_130] : memref<128x512xbf16, #tpu.memory_space<vmem>>, vector<128x512xbf16>
    %cst_131 = arith.constant dense<0.000000e+00> : vector<8x512xf32>
    %279 = tpu.matmul %277, %278, %cst_131 {dimension_numbers = #tpu.dot_dimension_numbers<[1], [0], [0], [1], [0, 0, 1, 1], [], []>} : vector<8x128xbf16>, vector<128x512xbf16>, vector<8x512xf32> -> vector<8x512xf32>
    %280 = arith.addf %275, %279 : vector<8x512xf32>
    %281 = vector.extract_strided_slice %280 {offsets = [0, 0], sizes = [8, 128], strides = [1, 1]} : vector<8x512xf32> to vector<8x128xf32>
    %282 = arith.negf %281 : vector<8x128xf32>
    %283 = math.exp %282 : vector<8x128xf32>
    %cst_132 = arith.constant 1.000000e+00 : f32
    %284 = vector.broadcast %cst_132 : f32 to vector<8x128xf32>
    %285 = arith.addf %284, %283 : vector<8x128xf32>
    %286 = arith.divf %284, %285 : vector<8x128xf32>
    %287 = vector.extract_strided_slice %280 {offsets = [0, 128], sizes = [8, 128], strides = [1, 1]} : vector<8x512xf32> to vector<8x128xf32>
    %288 = arith.negf %287 : vector<8x128xf32>
    %289 = math.exp %288 : vector<8x128xf32>
    %cst_133 = arith.constant 1.000000e+00 : f32
    %290 = vector.broadcast %cst_133 : f32 to vector<8x128xf32>
    %291 = arith.addf %290, %289 : vector<8x128xf32>
    %292 = arith.divf %290, %291 : vector<8x128xf32>
    %293 = vector.extract_strided_slice %280 {offsets = [0, 256], sizes = [8, 128], strides = [1, 1]} : vector<8x512xf32> to vector<8x128xf32>
    %294 = math.tanh %293 : vector<8x128xf32>
    %295 = vector.extract_strided_slice %280 {offsets = [0, 384], sizes = [8, 128], strides = [1, 1]} : vector<8x512xf32> to vector<8x128xf32>
    %296 = arith.negf %295 : vector<8x128xf32>
    %297 = math.exp %296 : vector<8x128xf32>
    %cst_134 = arith.constant 1.000000e+00 : f32
    %298 = vector.broadcast %cst_134 : f32 to vector<8x128xf32>
    %299 = arith.addf %298, %297 : vector<8x128xf32>
    %300 = arith.divf %298, %299 : vector<8x128xf32>
    %c0_135 = arith.constant 0 : index
    %c0_136 = arith.constant 0 : index
    %301 = vector.load %arg7[%c0_135, %c0_136] : memref<8x128xf32, #tpu.memory_space<vmem>>, vector<8x128xf32>
    %302 = arith.mulf %292, %301 : vector<8x128xf32>
    %303 = arith.mulf %286, %294 : vector<8x128xf32>
    %304 = arith.addf %302, %303 : vector<8x128xf32>
    %305 = math.tanh %304 : vector<8x128xf32>
    %306 = arith.mulf %300, %305 : vector<8x128xf32>
    %c0_137 = arith.constant 0 : index
    %c0_138 = arith.constant 0 : index
    %307 = vector.load %arg6[%c0_137, %c0_138] : memref<8x128xf32, #tpu.memory_space<vmem>>, vector<8x128xf32>
    tpu.vector_store %arg6[%c0_137, %c0_138], %306 {strides = array<i32>} : memref<8x128xf32, #tpu.memory_space<vmem>>, vector<8x128xf32>,
    %c0_139 = arith.constant 0 : index
    %c0_140 = arith.constant 0 : index
    %308 = vector.load %arg7[%c0_139, %c0_140] : memref<8x128xf32, #tpu.memory_space<vmem>>, vector<8x128xf32>
    tpu.vector_store %arg7[%c0_139, %c0_140], %304 {strides = array<i32>} : memref<8x128xf32, #tpu.memory_space<vmem>>, vector<8x128xf32>,
    %c8_i32_141 = arith.constant 8 : i32
    %c8_i32_142 = arith.constant 8 : i32
    %309 = arith.muli %c8_i32_141, %c8_i32_142 : i32
    %310 = tpu.assume_multiple %309, 8 : i32
    %311 = arith.index_cast %310 : i32 to index
    %c0_143 = arith.constant 0 : index
    %312 = vector.load %arg5[%311, %c0_143] : memref<128x512xf32, #tpu.memory_space<vmem>>, vector<8x512xf32>
    %c0_144 = arith.constant 0 : index
    %c0_145 = arith.constant 0 : index
    %313 = vector.load %arg6[%c0_144, %c0_145] : memref<8x128xf32, #tpu.memory_space<vmem>>, vector<8x128xf32>
    %314 = arith.truncf %313 : vector<8x128xf32> to vector<8x128xbf16>
    %c0_146 = arith.constant 0 : index
    %c0_147 = arith.constant 0 : index
    %315 = vector.load %arg2[%c0_146, %c0_147] : memref<128x512xbf16, #tpu.memory_space<vmem>>, vector<128x512xbf16>
    %cst_148 = arith.constant dense<0.000000e+00> : vector<8x512xf32>
    %316 = tpu.matmul %314, %315, %cst_148 {dimension_numbers = #tpu.dot_dimension_numbers<[1], [0], [0], [1], [0, 0, 1, 1], [], []>} : vector<8x128xbf16>, vector<128x512xbf16>, vector<8x512xf32> -> vector<8x512xf32>
    %317 = arith.addf %312, %316 : vector<8x512xf32>
    %318 = vector.extract_strided_slice %317 {offsets = [0, 0], sizes = [8, 128], strides = [1, 1]} : vector<8x512xf32> to vector<8x128xf32>
    %319 = arith.negf %318 : vector<8x128xf32>
    %320 = math.exp %319 : vector<8x128xf32>
    %cst_149 = arith.constant 1.000000e+00 : f32
    %321 = vector.broadcast %cst_149 : f32 to vector<8x128xf32>
    %322 = arith.addf %321, %320 : vector<8x128xf32>
    %323 = arith.divf %321, %322 : vector<8x128xf32>
    %324 = vector.extract_strided_slice %317 {offsets = [0, 128], sizes = [8, 128], strides = [1, 1]} : vector<8x512xf32> to vector<8x128xf32>
    %325 = arith.negf %324 : vector<8x128xf32>
    %326 = math.exp %325 : vector<8x128xf32>
    %cst_150 = arith.constant 1.000000e+00 : f32
    %327 = vector.broadcast %cst_150 : f32 to vector<8x128xf32>
    %328 = arith.addf %327, %326 : vector<8x128xf32>
    %329 = arith.divf %327, %328 : vector<8x128xf32>
    %330 = vector.extract_strided_slice %317 {offsets = [0, 256], sizes = [8, 128], strides = [1, 1]} : vector<8x512xf32> to vector<8x128xf32>
    %331 = math.tanh %330 : vector<8x128xf32>
    %332 = vector.extract_strided_slice %317 {offsets = [0, 384], sizes = [8, 128], strides = [1, 1]} : vector<8x512xf32> to vector<8x128xf32>
    %333 = arith.negf %332 : vector<8x128xf32>
    %334 = math.exp %333 : vector<8x128xf32>
    %cst_151 = arith.constant 1.000000e+00 : f32
    %335 = vector.broadcast %cst_151 : f32 to vector<8x128xf32>
    %336 = arith.addf %335, %334 : vector<8x128xf32>
    %337 = arith.divf %335, %336 : vector<8x128xf32>
    %c0_152 = arith.constant 0 : index
    %c0_153 = arith.constant 0 : index
    %338 = vector.load %arg7[%c0_152, %c0_153] : memref<8x128xf32, #tpu.memory_space<vmem>>, vector<8x128xf32>
    %339 = arith.mulf %329, %338 : vector<8x128xf32>
    %340 = arith.mulf %323, %331 : vector<8x128xf32>
    %341 = arith.addf %339, %340 : vector<8x128xf32>
    %342 = math.tanh %341 : vector<8x128xf32>
    %343 = arith.mulf %337, %342 : vector<8x128xf32>
    %c0_154 = arith.constant 0 : index
    %c0_155 = arith.constant 0 : index
    %344 = vector.load %arg6[%c0_154, %c0_155] : memref<8x128xf32, #tpu.memory_space<vmem>>, vector<8x128xf32>
    tpu.vector_store %arg6[%c0_154, %c0_155], %343 {strides = array<i32>} : memref<8x128xf32, #tpu.memory_space<vmem>>, vector<8x128xf32>,
    %c0_156 = arith.constant 0 : index
    %c0_157 = arith.constant 0 : index
    %345 = vector.load %arg7[%c0_156, %c0_157] : memref<8x128xf32, #tpu.memory_space<vmem>>, vector<8x128xf32>
    tpu.vector_store %arg7[%c0_156, %c0_157], %341 {strides = array<i32>} : memref<8x128xf32, #tpu.memory_space<vmem>>, vector<8x128xf32>,
    %c9_i32 = arith.constant 9 : i32
    %c8_i32_158 = arith.constant 8 : i32
    %346 = arith.muli %c9_i32, %c8_i32_158 : i32
    %347 = tpu.assume_multiple %346, 8 : i32
    %348 = arith.index_cast %347 : i32 to index
    %c0_159 = arith.constant 0 : index
    %349 = vector.load %arg5[%348, %c0_159] : memref<128x512xf32, #tpu.memory_space<vmem>>, vector<8x512xf32>
    %c0_160 = arith.constant 0 : index
    %c0_161 = arith.constant 0 : index
    %350 = vector.load %arg6[%c0_160, %c0_161] : memref<8x128xf32, #tpu.memory_space<vmem>>, vector<8x128xf32>
    %351 = arith.truncf %350 : vector<8x128xf32> to vector<8x128xbf16>
    %c0_162 = arith.constant 0 : index
    %c0_163 = arith.constant 0 : index
    %352 = vector.load %arg2[%c0_162, %c0_163] : memref<128x512xbf16, #tpu.memory_space<vmem>>, vector<128x512xbf16>
    %cst_164 = arith.constant dense<0.000000e+00> : vector<8x512xf32>
    %353 = tpu.matmul %351, %352, %cst_164 {dimension_numbers = #tpu.dot_dimension_numbers<[1], [0], [0], [1], [0, 0, 1, 1], [], []>} : vector<8x128xbf16>, vector<128x512xbf16>, vector<8x512xf32> -> vector<8x512xf32>
    %354 = arith.addf %349, %353 : vector<8x512xf32>
    %355 = vector.extract_strided_slice %354 {offsets = [0, 0], sizes = [8, 128], strides = [1, 1]} : vector<8x512xf32> to vector<8x128xf32>
    %356 = arith.negf %355 : vector<8x128xf32>
    %357 = math.exp %356 : vector<8x128xf32>
    %cst_165 = arith.constant 1.000000e+00 : f32
    %358 = vector.broadcast %cst_165 : f32 to vector<8x128xf32>
    %359 = arith.addf %358, %357 : vector<8x128xf32>
    %360 = arith.divf %358, %359 : vector<8x128xf32>
    %361 = vector.extract_strided_slice %354 {offsets = [0, 128], sizes = [8, 128], strides = [1, 1]} : vector<8x512xf32> to vector<8x128xf32>
    %362 = arith.negf %361 : vector<8x128xf32>
    %363 = math.exp %362 : vector<8x128xf32>
    %cst_166 = arith.constant 1.000000e+00 : f32
    %364 = vector.broadcast %cst_166 : f32 to vector<8x128xf32>
    %365 = arith.addf %364, %363 : vector<8x128xf32>
    %366 = arith.divf %364, %365 : vector<8x128xf32>
    %367 = vector.extract_strided_slice %354 {offsets = [0, 256], sizes = [8, 128], strides = [1, 1]} : vector<8x512xf32> to vector<8x128xf32>
    %368 = math.tanh %367 : vector<8x128xf32>
    %369 = vector.extract_strided_slice %354 {offsets = [0, 384], sizes = [8, 128], strides = [1, 1]} : vector<8x512xf32> to vector<8x128xf32>
    %370 = arith.negf %369 : vector<8x128xf32>
    %371 = math.exp %370 : vector<8x128xf32>
    %cst_167 = arith.constant 1.000000e+00 : f32
    %372 = vector.broadcast %cst_167 : f32 to vector<8x128xf32>
    %373 = arith.addf %372, %371 : vector<8x128xf32>
    %374 = arith.divf %372, %373 : vector<8x128xf32>
    %c0_168 = arith.constant 0 : index
    %c0_169 = arith.constant 0 : index
    %375 = vector.load %arg7[%c0_168, %c0_169] : memref<8x128xf32, #tpu.memory_space<vmem>>, vector<8x128xf32>
    %376 = arith.mulf %366, %375 : vector<8x128xf32>
    %377 = arith.mulf %360, %368 : vector<8x128xf32>
    %378 = arith.addf %376, %377 : vector<8x128xf32>
    %379 = math.tanh %378 : vector<8x128xf32>
    %380 = arith.mulf %374, %379 : vector<8x128xf32>
    %c0_170 = arith.constant 0 : index
    %c0_171 = arith.constant 0 : index
    %381 = vector.load %arg6[%c0_170, %c0_171] : memref<8x128xf32, #tpu.memory_space<vmem>>, vector<8x128xf32>
    tpu.vector_store %arg6[%c0_170, %c0_171], %380 {strides = array<i32>} : memref<8x128xf32, #tpu.memory_space<vmem>>, vector<8x128xf32>,
    %c0_172 = arith.constant 0 : index
    %c0_173 = arith.constant 0 : index
    %382 = vector.load %arg7[%c0_172, %c0_173] : memref<8x128xf32, #tpu.memory_space<vmem>>, vector<8x128xf32>
    tpu.vector_store %arg7[%c0_172, %c0_173], %378 {strides = array<i32>} : memref<8x128xf32, #tpu.memory_space<vmem>>, vector<8x128xf32>,
    %c10_i32 = arith.constant 10 : i32
    %c8_i32_174 = arith.constant 8 : i32
    %383 = arith.muli %c10_i32, %c8_i32_174 : i32
    %384 = tpu.assume_multiple %383, 8 : i32
    %385 = arith.index_cast %384 : i32 to index
    %c0_175 = arith.constant 0 : index
    %386 = vector.load %arg5[%385, %c0_175] : memref<128x512xf32, #tpu.memory_space<vmem>>, vector<8x512xf32>
    %c0_176 = arith.constant 0 : index
    %c0_177 = arith.constant 0 : index
    %387 = vector.load %arg6[%c0_176, %c0_177] : memref<8x128xf32, #tpu.memory_space<vmem>>, vector<8x128xf32>
    %388 = arith.truncf %387 : vector<8x128xf32> to vector<8x128xbf16>
    %c0_178 = arith.constant 0 : index
    %c0_179 = arith.constant 0 : index
    %389 = vector.load %arg2[%c0_178, %c0_179] : memref<128x512xbf16, #tpu.memory_space<vmem>>, vector<128x512xbf16>
    %cst_180 = arith.constant dense<0.000000e+00> : vector<8x512xf32>
    %390 = tpu.matmul %388, %389, %cst_180 {dimension_numbers = #tpu.dot_dimension_numbers<[1], [0], [0], [1], [0, 0, 1, 1], [], []>} : vector<8x128xbf16>, vector<128x512xbf16>, vector<8x512xf32> -> vector<8x512xf32>
    %391 = arith.addf %386, %390 : vector<8x512xf32>
    %392 = vector.extract_strided_slice %391 {offsets = [0, 0], sizes = [8, 128], strides = [1, 1]} : vector<8x512xf32> to vector<8x128xf32>
    %393 = arith.negf %392 : vector<8x128xf32>
    %394 = math.exp %393 : vector<8x128xf32>
    %cst_181 = arith.constant 1.000000e+00 : f32
    %395 = vector.broadcast %cst_181 : f32 to vector<8x128xf32>
    %396 = arith.addf %395, %394 : vector<8x128xf32>
    %397 = arith.divf %395, %396 : vector<8x128xf32>
    %398 = vector.extract_strided_slice %391 {offsets = [0, 128], sizes = [8, 128], strides = [1, 1]} : vector<8x512xf32> to vector<8x128xf32>
    %399 = arith.negf %398 : vector<8x128xf32>
    %400 = math.exp %399 : vector<8x128xf32>
    %cst_182 = arith.constant 1.000000e+00 : f32
    %401 = vector.broadcast %cst_182 : f32 to vector<8x128xf32>
    %402 = arith.addf %401, %400 : vector<8x128xf32>
    %403 = arith.divf %401, %402 : vector<8x128xf32>
    %404 = vector.extract_strided_slice %391 {offsets = [0, 256], sizes = [8, 128], strides = [1, 1]} : vector<8x512xf32> to vector<8x128xf32>
    %405 = math.tanh %404 : vector<8x128xf32>
    %406 = vector.extract_strided_slice %391 {offsets = [0, 384], sizes = [8, 128], strides = [1, 1]} : vector<8x512xf32> to vector<8x128xf32>
    %407 = arith.negf %406 : vector<8x128xf32>
    %408 = math.exp %407 : vector<8x128xf32>
    %cst_183 = arith.constant 1.000000e+00 : f32
    %409 = vector.broadcast %cst_183 : f32 to vector<8x128xf32>
    %410 = arith.addf %409, %408 : vector<8x128xf32>
    %411 = arith.divf %409, %410 : vector<8x128xf32>
    %c0_184 = arith.constant 0 : index
    %c0_185 = arith.constant 0 : index
    %412 = vector.load %arg7[%c0_184, %c0_185] : memref<8x128xf32, #tpu.memory_space<vmem>>, vector<8x128xf32>
    %413 = arith.mulf %403, %412 : vector<8x128xf32>
    %414 = arith.mulf %397, %405 : vector<8x128xf32>
    %415 = arith.addf %413, %414 : vector<8x128xf32>
    %416 = math.tanh %415 : vector<8x128xf32>
    %417 = arith.mulf %411, %416 : vector<8x128xf32>
    %c0_186 = arith.constant 0 : index
    %c0_187 = arith.constant 0 : index
    %418 = vector.load %arg6[%c0_186, %c0_187] : memref<8x128xf32, #tpu.memory_space<vmem>>, vector<8x128xf32>
    tpu.vector_store %arg6[%c0_186, %c0_187], %417 {strides = array<i32>} : memref<8x128xf32, #tpu.memory_space<vmem>>, vector<8x128xf32>,
    %c0_188 = arith.constant 0 : index
    %c0_189 = arith.constant 0 : index
    %419 = vector.load %arg7[%c0_188, %c0_189] : memref<8x128xf32, #tpu.memory_space<vmem>>, vector<8x128xf32>
    tpu.vector_store %arg7[%c0_188, %c0_189], %415 {strides = array<i32>} : memref<8x128xf32, #tpu.memory_space<vmem>>, vector<8x128xf32>,
    %c11_i32 = arith.constant 11 : i32
    %c8_i32_190 = arith.constant 8 : i32
    %420 = arith.muli %c11_i32, %c8_i32_190 : i32
    %421 = tpu.assume_multiple %420, 8 : i32
    %422 = arith.index_cast %421 : i32 to index
    %c0_191 = arith.constant 0 : index
    %423 = vector.load %arg5[%422, %c0_191] : memref<128x512xf32, #tpu.memory_space<vmem>>, vector<8x512xf32>
    %c0_192 = arith.constant 0 : index
    %c0_193 = arith.constant 0 : index
    %424 = vector.load %arg6[%c0_192, %c0_193] : memref<8x128xf32, #tpu.memory_space<vmem>>, vector<8x128xf32>
    %425 = arith.truncf %424 : vector<8x128xf32> to vector<8x128xbf16>
    %c0_194 = arith.constant 0 : index
    %c0_195 = arith.constant 0 : index
    %426 = vector.load %arg2[%c0_194, %c0_195] : memref<128x512xbf16, #tpu.memory_space<vmem>>, vector<128x512xbf16>
    %cst_196 = arith.constant dense<0.000000e+00> : vector<8x512xf32>
    %427 = tpu.matmul %425, %426, %cst_196 {dimension_numbers = #tpu.dot_dimension_numbers<[1], [0], [0], [1], [0, 0, 1, 1], [], []>} : vector<8x128xbf16>, vector<128x512xbf16>, vector<8x512xf32> -> vector<8x512xf32>
    %428 = arith.addf %423, %427 : vector<8x512xf32>
    %429 = vector.extract_strided_slice %428 {offsets = [0, 0], sizes = [8, 128], strides = [1, 1]} : vector<8x512xf32> to vector<8x128xf32>
    %430 = arith.negf %429 : vector<8x128xf32>
    %431 = math.exp %430 : vector<8x128xf32>
    %cst_197 = arith.constant 1.000000e+00 : f32
    %432 = vector.broadcast %cst_197 : f32 to vector<8x128xf32>
    %433 = arith.addf %432, %431 : vector<8x128xf32>
    %434 = arith.divf %432, %433 : vector<8x128xf32>
    %435 = vector.extract_strided_slice %428 {offsets = [0, 128], sizes = [8, 128], strides = [1, 1]} : vector<8x512xf32> to vector<8x128xf32>
    %436 = arith.negf %435 : vector<8x128xf32>
    %437 = math.exp %436 : vector<8x128xf32>
    %cst_198 = arith.constant 1.000000e+00 : f32
    %438 = vector.broadcast %cst_198 : f32 to vector<8x128xf32>
    %439 = arith.addf %438, %437 : vector<8x128xf32>
    %440 = arith.divf %438, %439 : vector<8x128xf32>
    %441 = vector.extract_strided_slice %428 {offsets = [0, 256], sizes = [8, 128], strides = [1, 1]} : vector<8x512xf32> to vector<8x128xf32>
    %442 = math.tanh %441 : vector<8x128xf32>
    %443 = vector.extract_strided_slice %428 {offsets = [0, 384], sizes = [8, 128], strides = [1, 1]} : vector<8x512xf32> to vector<8x128xf32>
    %444 = arith.negf %443 : vector<8x128xf32>
    %445 = math.exp %444 : vector<8x128xf32>
    %cst_199 = arith.constant 1.000000e+00 : f32
    %446 = vector.broadcast %cst_199 : f32 to vector<8x128xf32>
    %447 = arith.addf %446, %445 : vector<8x128xf32>
    %448 = arith.divf %446, %447 : vector<8x128xf32>
    %c0_200 = arith.constant 0 : index
    %c0_201 = arith.constant 0 : index
    %449 = vector.load %arg7[%c0_200, %c0_201] : memref<8x128xf32, #tpu.memory_space<vmem>>, vector<8x128xf32>
    %450 = arith.mulf %440, %449 : vector<8x128xf32>
    %451 = arith.mulf %434, %442 : vector<8x128xf32>
    %452 = arith.addf %450, %451 : vector<8x128xf32>
    %453 = math.tanh %452 : vector<8x128xf32>
    %454 = arith.mulf %448, %453 : vector<8x128xf32>
    %c0_202 = arith.constant 0 : index
    %c0_203 = arith.constant 0 : index
    %455 = vector.load %arg6[%c0_202, %c0_203] : memref<8x128xf32, #tpu.memory_space<vmem>>, vector<8x128xf32>
    tpu.vector_store %arg6[%c0_202, %c0_203], %454 {strides = array<i32>} : memref<8x128xf32, #tpu.memory_space<vmem>>, vector<8x128xf32>,
    %c0_204 = arith.constant 0 : index
    %c0_205 = arith.constant 0 : index
    %456 = vector.load %arg7[%c0_204, %c0_205] : memref<8x128xf32, #tpu.memory_space<vmem>>, vector<8x128xf32>
    tpu.vector_store %arg7[%c0_204, %c0_205], %452 {strides = array<i32>} : memref<8x128xf32, #tpu.memory_space<vmem>>, vector<8x128xf32>,
    %c12_i32 = arith.constant 12 : i32
    %c8_i32_206 = arith.constant 8 : i32
    %457 = arith.muli %c12_i32, %c8_i32_206 : i32
    %458 = tpu.assume_multiple %457, 8 : i32
    %459 = arith.index_cast %458 : i32 to index
    %c0_207 = arith.constant 0 : index
    %460 = vector.load %arg5[%459, %c0_207] : memref<128x512xf32, #tpu.memory_space<vmem>>, vector<8x512xf32>
    %c0_208 = arith.constant 0 : index
    %c0_209 = arith.constant 0 : index
    %461 = vector.load %arg6[%c0_208, %c0_209] : memref<8x128xf32, #tpu.memory_space<vmem>>, vector<8x128xf32>
    %462 = arith.truncf %461 : vector<8x128xf32> to vector<8x128xbf16>
    %c0_210 = arith.constant 0 : index
    %c0_211 = arith.constant 0 : index
    %463 = vector.load %arg2[%c0_210, %c0_211] : memref<128x512xbf16, #tpu.memory_space<vmem>>, vector<128x512xbf16>
    %cst_212 = arith.constant dense<0.000000e+00> : vector<8x512xf32>
    %464 = tpu.matmul %462, %463, %cst_212 {dimension_numbers = #tpu.dot_dimension_numbers<[1], [0], [0], [1], [0, 0, 1, 1], [], []>} : vector<8x128xbf16>, vector<128x512xbf16>, vector<8x512xf32> -> vector<8x512xf32>
    %465 = arith.addf %460, %464 : vector<8x512xf32>
    %466 = vector.extract_strided_slice %465 {offsets = [0, 0], sizes = [8, 128], strides = [1, 1]} : vector<8x512xf32> to vector<8x128xf32>
    %467 = arith.negf %466 : vector<8x128xf32>
    %468 = math.exp %467 : vector<8x128xf32>
    %cst_213 = arith.constant 1.000000e+00 : f32
    %469 = vector.broadcast %cst_213 : f32 to vector<8x128xf32>
    %470 = arith.addf %469, %468 : vector<8x128xf32>
    %471 = arith.divf %469, %470 : vector<8x128xf32>
    %472 = vector.extract_strided_slice %465 {offsets = [0, 128], sizes = [8, 128], strides = [1, 1]} : vector<8x512xf32> to vector<8x128xf32>
    %473 = arith.negf %472 : vector<8x128xf32>
    %474 = math.exp %473 : vector<8x128xf32>
    %cst_214 = arith.constant 1.000000e+00 : f32
    %475 = vector.broadcast %cst_214 : f32 to vector<8x128xf32>
    %476 = arith.addf %475, %474 : vector<8x128xf32>
    %477 = arith.divf %475, %476 : vector<8x128xf32>
    %478 = vector.extract_strided_slice %465 {offsets = [0, 256], sizes = [8, 128], strides = [1, 1]} : vector<8x512xf32> to vector<8x128xf32>
    %479 = math.tanh %478 : vector<8x128xf32>
    %480 = vector.extract_strided_slice %465 {offsets = [0, 384], sizes = [8, 128], strides = [1, 1]} : vector<8x512xf32> to vector<8x128xf32>
    %481 = arith.negf %480 : vector<8x128xf32>
    %482 = math.exp %481 : vector<8x128xf32>
    %cst_215 = arith.constant 1.000000e+00 : f32
    %483 = vector.broadcast %cst_215 : f32 to vector<8x128xf32>
    %484 = arith.addf %483, %482 : vector<8x128xf32>
    %485 = arith.divf %483, %484 : vector<8x128xf32>
    %c0_216 = arith.constant 0 : index
    %c0_217 = arith.constant 0 : index
    %486 = vector.load %arg7[%c0_216, %c0_217] : memref<8x128xf32, #tpu.memory_space<vmem>>, vector<8x128xf32>
    %487 = arith.mulf %477, %486 : vector<8x128xf32>
    %488 = arith.mulf %471, %479 : vector<8x128xf32>
    %489 = arith.addf %487, %488 : vector<8x128xf32>
    %490 = math.tanh %489 : vector<8x128xf32>
    %491 = arith.mulf %485, %490 : vector<8x128xf32>
    %c0_218 = arith.constant 0 : index
    %c0_219 = arith.constant 0 : index
    %492 = vector.load %arg6[%c0_218, %c0_219] : memref<8x128xf32, #tpu.memory_space<vmem>>, vector<8x128xf32>
    tpu.vector_store %arg6[%c0_218, %c0_219], %491 {strides = array<i32>} : memref<8x128xf32, #tpu.memory_space<vmem>>, vector<8x128xf32>,
    %c0_220 = arith.constant 0 : index
    %c0_221 = arith.constant 0 : index
    %493 = vector.load %arg7[%c0_220, %c0_221] : memref<8x128xf32, #tpu.memory_space<vmem>>, vector<8x128xf32>
    tpu.vector_store %arg7[%c0_220, %c0_221], %489 {strides = array<i32>} : memref<8x128xf32, #tpu.memory_space<vmem>>, vector<8x128xf32>,
    %c13_i32 = arith.constant 13 : i32
    %c8_i32_222 = arith.constant 8 : i32
    %494 = arith.muli %c13_i32, %c8_i32_222 : i32
    %495 = tpu.assume_multiple %494, 8 : i32
    %496 = arith.index_cast %495 : i32 to index
    %c0_223 = arith.constant 0 : index
    %497 = vector.load %arg5[%496, %c0_223] : memref<128x512xf32, #tpu.memory_space<vmem>>, vector<8x512xf32>
    %c0_224 = arith.constant 0 : index
    %c0_225 = arith.constant 0 : index
    %498 = vector.load %arg6[%c0_224, %c0_225] : memref<8x128xf32, #tpu.memory_space<vmem>>, vector<8x128xf32>
    %499 = arith.truncf %498 : vector<8x128xf32> to vector<8x128xbf16>
    %c0_226 = arith.constant 0 : index
    %c0_227 = arith.constant 0 : index
    %500 = vector.load %arg2[%c0_226, %c0_227] : memref<128x512xbf16, #tpu.memory_space<vmem>>, vector<128x512xbf16>
    %cst_228 = arith.constant dense<0.000000e+00> : vector<8x512xf32>
    %501 = tpu.matmul %499, %500, %cst_228 {dimension_numbers = #tpu.dot_dimension_numbers<[1], [0], [0], [1], [0, 0, 1, 1], [], []>} : vector<8x128xbf16>, vector<128x512xbf16>, vector<8x512xf32> -> vector<8x512xf32>
    %502 = arith.addf %497, %501 : vector<8x512xf32>
    %503 = vector.extract_strided_slice %502 {offsets = [0, 0], sizes = [8, 128], strides = [1, 1]} : vector<8x512xf32> to vector<8x128xf32>
    %504 = arith.negf %503 : vector<8x128xf32>
    %505 = math.exp %504 : vector<8x128xf32>
    %cst_229 = arith.constant 1.000000e+00 : f32
    %506 = vector.broadcast %cst_229 : f32 to vector<8x128xf32>
    %507 = arith.addf %506, %505 : vector<8x128xf32>
    %508 = arith.divf %506, %507 : vector<8x128xf32>
    %509 = vector.extract_strided_slice %502 {offsets = [0, 128], sizes = [8, 128], strides = [1, 1]} : vector<8x512xf32> to vector<8x128xf32>
    %510 = arith.negf %509 : vector<8x128xf32>
    %511 = math.exp %510 : vector<8x128xf32>
    %cst_230 = arith.constant 1.000000e+00 : f32
    %512 = vector.broadcast %cst_230 : f32 to vector<8x128xf32>
    %513 = arith.addf %512, %511 : vector<8x128xf32>
    %514 = arith.divf %512, %513 : vector<8x128xf32>
    %515 = vector.extract_strided_slice %502 {offsets = [0, 256], sizes = [8, 128], strides = [1, 1]} : vector<8x512xf32> to vector<8x128xf32>
    %516 = math.tanh %515 : vector<8x128xf32>
    %517 = vector.extract_strided_slice %502 {offsets = [0, 384], sizes = [8, 128], strides = [1, 1]} : vector<8x512xf32> to vector<8x128xf32>
    %518 = arith.negf %517 : vector<8x128xf32>
    %519 = math.exp %518 : vector<8x128xf32>
    %cst_231 = arith.constant 1.000000e+00 : f32
    %520 = vector.broadcast %cst_231 : f32 to vector<8x128xf32>
    %521 = arith.addf %520, %519 : vector<8x128xf32>
    %522 = arith.divf %520, %521 : vector<8x128xf32>
    %c0_232 = arith.constant 0 : index
    %c0_233 = arith.constant 0 : index
    %523 = vector.load %arg7[%c0_232, %c0_233] : memref<8x128xf32, #tpu.memory_space<vmem>>, vector<8x128xf32>
    %524 = arith.mulf %514, %523 : vector<8x128xf32>
    %525 = arith.mulf %508, %516 : vector<8x128xf32>
    %526 = arith.addf %524, %525 : vector<8x128xf32>
    %527 = math.tanh %526 : vector<8x128xf32>
    %528 = arith.mulf %522, %527 : vector<8x128xf32>
    %c0_234 = arith.constant 0 : index
    %c0_235 = arith.constant 0 : index
    %529 = vector.load %arg6[%c0_234, %c0_235] : memref<8x128xf32, #tpu.memory_space<vmem>>, vector<8x128xf32>
    tpu.vector_store %arg6[%c0_234, %c0_235], %528 {strides = array<i32>} : memref<8x128xf32, #tpu.memory_space<vmem>>, vector<8x128xf32>,
    %c0_236 = arith.constant 0 : index
    %c0_237 = arith.constant 0 : index
    %530 = vector.load %arg7[%c0_236, %c0_237] : memref<8x128xf32, #tpu.memory_space<vmem>>, vector<8x128xf32>
    tpu.vector_store %arg7[%c0_236, %c0_237], %526 {strides = array<i32>} : memref<8x128xf32, #tpu.memory_space<vmem>>, vector<8x128xf32>,
    %c14_i32 = arith.constant 14 : i32
    %c8_i32_238 = arith.constant 8 : i32
    %531 = arith.muli %c14_i32, %c8_i32_238 : i32
    %532 = tpu.assume_multiple %531, 8 : i32
    %533 = arith.index_cast %532 : i32 to index
    %c0_239 = arith.constant 0 : index
    %534 = vector.load %arg5[%533, %c0_239] : memref<128x512xf32, #tpu.memory_space<vmem>>, vector<8x512xf32>
    %c0_240 = arith.constant 0 : index
    %c0_241 = arith.constant 0 : index
    %535 = vector.load %arg6[%c0_240, %c0_241] : memref<8x128xf32, #tpu.memory_space<vmem>>, vector<8x128xf32>
    %536 = arith.truncf %535 : vector<8x128xf32> to vector<8x128xbf16>
    %c0_242 = arith.constant 0 : index
    %c0_243 = arith.constant 0 : index
    %537 = vector.load %arg2[%c0_242, %c0_243] : memref<128x512xbf16, #tpu.memory_space<vmem>>, vector<128x512xbf16>
    %cst_244 = arith.constant dense<0.000000e+00> : vector<8x512xf32>
    %538 = tpu.matmul %536, %537, %cst_244 {dimension_numbers = #tpu.dot_dimension_numbers<[1], [0], [0], [1], [0, 0, 1, 1], [], []>} : vector<8x128xbf16>, vector<128x512xbf16>, vector<8x512xf32> -> vector<8x512xf32>
    %539 = arith.addf %534, %538 : vector<8x512xf32>
    %540 = vector.extract_strided_slice %539 {offsets = [0, 0], sizes = [8, 128], strides = [1, 1]} : vector<8x512xf32> to vector<8x128xf32>
    %541 = arith.negf %540 : vector<8x128xf32>
    %542 = math.exp %541 : vector<8x128xf32>
    %cst_245 = arith.constant 1.000000e+00 : f32
    %543 = vector.broadcast %cst_245 : f32 to vector<8x128xf32>
    %544 = arith.addf %543, %542 : vector<8x128xf32>
    %545 = arith.divf %543, %544 : vector<8x128xf32>
    %546 = vector.extract_strided_slice %539 {offsets = [0, 128], sizes = [8, 128], strides = [1, 1]} : vector<8x512xf32> to vector<8x128xf32>
    %547 = arith.negf %546 : vector<8x128xf32>
    %548 = math.exp %547 : vector<8x128xf32>
    %cst_246 = arith.constant 1.000000e+00 : f32
    %549 = vector.broadcast %cst_246 : f32 to vector<8x128xf32>
    %550 = arith.addf %549, %548 : vector<8x128xf32>
    %551 = arith.divf %549, %550 : vector<8x128xf32>
    %552 = vector.extract_strided_slice %539 {offsets = [0, 256], sizes = [8, 128], strides = [1, 1]} : vector<8x512xf32> to vector<8x128xf32>
    %553 = math.tanh %552 : vector<8x128xf32>
    %554 = vector.extract_strided_slice %539 {offsets = [0, 384], sizes = [8, 128], strides = [1, 1]} : vector<8x512xf32> to vector<8x128xf32>
    %555 = arith.negf %554 : vector<8x128xf32>
    %556 = math.exp %555 : vector<8x128xf32>
    %cst_247 = arith.constant 1.000000e+00 : f32
    %557 = vector.broadcast %cst_247 : f32 to vector<8x128xf32>
    %558 = arith.addf %557, %556 : vector<8x128xf32>
    %559 = arith.divf %557, %558 : vector<8x128xf32>
    %c0_248 = arith.constant 0 : index
    %c0_249 = arith.constant 0 : index
    %560 = vector.load %arg7[%c0_248, %c0_249] : memref<8x128xf32, #tpu.memory_space<vmem>>, vector<8x128xf32>
    %561 = arith.mulf %551, %560 : vector<8x128xf32>
    %562 = arith.mulf %545, %553 : vector<8x128xf32>
    %563 = arith.addf %561, %562 : vector<8x128xf32>
    %564 = math.tanh %563 : vector<8x128xf32>
    %565 = arith.mulf %559, %564 : vector<8x128xf32>
    %c0_250 = arith.constant 0 : index
    %c0_251 = arith.constant 0 : index
    %566 = vector.load %arg6[%c0_250, %c0_251] : memref<8x128xf32, #tpu.memory_space<vmem>>, vector<8x128xf32>
    tpu.vector_store %arg6[%c0_250, %c0_251], %565 {strides = array<i32>} : memref<8x128xf32, #tpu.memory_space<vmem>>, vector<8x128xf32>,
    %c0_252 = arith.constant 0 : index
    %c0_253 = arith.constant 0 : index
    %567 = vector.load %arg7[%c0_252, %c0_253] : memref<8x128xf32, #tpu.memory_space<vmem>>, vector<8x128xf32>
    tpu.vector_store %arg7[%c0_252, %c0_253], %563 {strides = array<i32>} : memref<8x128xf32, #tpu.memory_space<vmem>>, vector<8x128xf32>,
    %c15_i32 = arith.constant 15 : i32
    %c8_i32_254 = arith.constant 8 : i32
    %568 = arith.muli %c15_i32, %c8_i32_254 : i32
    %569 = tpu.assume_multiple %568, 8 : i32
    %570 = arith.index_cast %569 : i32 to index
    %c0_255 = arith.constant 0 : index
    %571 = vector.load %arg5[%570, %c0_255] : memref<128x512xf32, #tpu.memory_space<vmem>>, vector<8x512xf32>
    %c0_256 = arith.constant 0 : index
    %c0_257 = arith.constant 0 : index
    %572 = vector.load %arg6[%c0_256, %c0_257] : memref<8x128xf32, #tpu.memory_space<vmem>>, vector<8x128xf32>
    %573 = arith.truncf %572 : vector<8x128xf32> to vector<8x128xbf16>
    %c0_258 = arith.constant 0 : index
    %c0_259 = arith.constant 0 : index
    %574 = vector.load %arg2[%c0_258, %c0_259] : memref<128x512xbf16, #tpu.memory_space<vmem>>, vector<128x512xbf16>
    %cst_260 = arith.constant dense<0.000000e+00> : vector<8x512xf32>
    %575 = tpu.matmul %573, %574, %cst_260 {dimension_numbers = #tpu.dot_dimension_numbers<[1], [0], [0], [1], [0, 0, 1, 1], [], []>} : vector<8x128xbf16>, vector<128x512xbf16>, vector<8x512xf32> -> vector<8x512xf32>
    %576 = arith.addf %571, %575 : vector<8x512xf32>
    %577 = vector.extract_strided_slice %576 {offsets = [0, 0], sizes = [8, 128], strides = [1, 1]} : vector<8x512xf32> to vector<8x128xf32>
    %578 = arith.negf %577 : vector<8x128xf32>
    %579 = math.exp %578 : vector<8x128xf32>
    %cst_261 = arith.constant 1.000000e+00 : f32
    %580 = vector.broadcast %cst_261 : f32 to vector<8x128xf32>
    %581 = arith.addf %580, %579 : vector<8x128xf32>
    %582 = arith.divf %580, %581 : vector<8x128xf32>
    %583 = vector.extract_strided_slice %576 {offsets = [0, 128], sizes = [8, 128], strides = [1, 1]} : vector<8x512xf32> to vector<8x128xf32>
    %584 = arith.negf %583 : vector<8x128xf32>
    %585 = math.exp %584 : vector<8x128xf32>
    %cst_262 = arith.constant 1.000000e+00 : f32
    %586 = vector.broadcast %cst_262 : f32 to vector<8x128xf32>
    %587 = arith.addf %586, %585 : vector<8x128xf32>
    %588 = arith.divf %586, %587 : vector<8x128xf32>
    %589 = vector.extract_strided_slice %576 {offsets = [0, 256], sizes = [8, 128], strides = [1, 1]} : vector<8x512xf32> to vector<8x128xf32>
    %590 = math.tanh %589 : vector<8x128xf32>
    %591 = vector.extract_strided_slice %576 {offsets = [0, 384], sizes = [8, 128], strides = [1, 1]} : vector<8x512xf32> to vector<8x128xf32>
    %592 = arith.negf %591 : vector<8x128xf32>
    %593 = math.exp %592 : vector<8x128xf32>
    %cst_263 = arith.constant 1.000000e+00 : f32
    %594 = vector.broadcast %cst_263 : f32 to vector<8x128xf32>
    %595 = arith.addf %594, %593 : vector<8x128xf32>
    %596 = arith.divf %594, %595 : vector<8x128xf32>
    %c0_264 = arith.constant 0 : index
    %c0_265 = arith.constant 0 : index
    %597 = vector.load %arg7[%c0_264, %c0_265] : memref<8x128xf32, #tpu.memory_space<vmem>>, vector<8x128xf32>
    %598 = arith.mulf %588, %597 : vector<8x128xf32>
    %599 = arith.mulf %582, %590 : vector<8x128xf32>
    %600 = arith.addf %598, %599 : vector<8x128xf32>
    %601 = math.tanh %600 : vector<8x128xf32>
    %602 = arith.mulf %596, %601 : vector<8x128xf32>
    %c0_266 = arith.constant 0 : index
    %c0_267 = arith.constant 0 : index
    %603 = vector.load %arg6[%c0_266, %c0_267] : memref<8x128xf32, #tpu.memory_space<vmem>>, vector<8x128xf32>
    tpu.vector_store %arg6[%c0_266, %c0_267], %602 {strides = array<i32>} : memref<8x128xf32, #tpu.memory_space<vmem>>, vector<8x128xf32>,
    %c0_268 = arith.constant 0 : index
    %c0_269 = arith.constant 0 : index
    %604 = vector.load %arg7[%c0_268, %c0_269] : memref<8x128xf32, #tpu.memory_space<vmem>>, vector<8x128xf32>
    tpu.vector_store %arg7[%c0_268, %c0_269], %600 {strides = array<i32>} : memref<8x128xf32, #tpu.memory_space<vmem>>, vector<8x128xf32>,
    %c16_i32 = arith.constant 16 : i32
    %c0_270 = arith.constant 0 : index
    %c0_271 = arith.constant 0 : index
    %605 = vector.load %arg6[%c0_270, %c0_271] : memref<8x128xf32, #tpu.memory_space<vmem>>, vector<8x128xf32>
    %c0_272 = arith.constant 0 : index
    %c0_273 = arith.constant 0 : index
    %606 = vector.load %arg4[%c0_272, %c0_273] : memref<8x128xf32, #tpu.memory_space<vmem>>, vector<8x128xf32>
    tpu.vector_store %arg4[%c0_272, %c0_273], %605 {strides = array<i32>} : memref<8x128xf32, #tpu.memory_space<vmem>>, vector<8x128xf32>,
    return
  }
}

</mosaic_0001>

<bundles_post_ra>
// kernel: lstm_fcn_forward.3
= control target key start
LH: loop header
LB: loop body
LE: loop exit
PB: predicated region body
PF: predicated region fallthrough
CT: control target
= control target key end

     0   :  { %s3938_s0 = inlined_call_operand.vmem [shape: f32[2,16,8], index: 0, kind: input, shape index: {}]   ;;  %s3939_s1 = inlined_call_operand.vmem [shape: f32[2,128], index: 1, kind: input, shape index: {}]   ;;  %s3940_s2 = inlined_call_operand.vmem [shape: bf16[64,128], index: 2, kind: input, shape index: {}]   ;;  %s3941_s3 = inlined_call_operand.vmem [shape: f32[1,128], index: 3, kind: input, shape index: {}]   ;;  %s3942_s4 = inlined_call_operand.vmem [shape: f32[1,128], index: 4, kind: input, shape index: {}]   ;;  %s3943_s5 = inlined_call_operand.vmem [shape: f32[1,128], index: 5, kind: input, shape index: {}]   ;;  %s3944_s6 = inlined_call_operand.vmem [shape: bf16[640,256], index: 6, kind: input, shape index: {}]   ;;  %s3945_s7 = inlined_call_operand.vmem [shape: f32[1,256], index: 7, kind: input, shape index: {}]   ;;  %s3946_s8 = inlined_call_operand.vmem [shape: f32[1,256], index: 8, kind: input, shape index: {}]   ;;  %s3947_s9 = inlined_call_operand.vmem [shape: f32[1,256], index: 9, kind: input, shape index: {}]   ;;  %s3948_s10 = inlined_call_operand.vmem [shape: bf16[768,128], index: 10, kind: input, shape index: {}]   ;;  %s3949_s11 = inlined_call_operand.vmem [shape: f32[1,128], index: 11, kind: input, shape index: {}]   ;;  %s3950_s12 = inlined_call_operand.vmem [shape: f32[1,128], index: 12, kind: input, shape index: {}]   ;;  %s3951_s13 = inlined_call_operand.vmem [shape: f32[1,128], index: 13, kind: input, shape index: {}]   ;;  %s3952_s14 = inlined_call_operand.vmem [shape: f32[128,128], index: 14, kind: input, shape index: {}]   ;;  %s3953_s15 = inlined_call_operand.vmem [shape: f32[128,128], index: 15, kind: input, shape index: {}]   ;;  %s3954_s16 = inlined_call_operand.vmem [shape: f32[1,128], index: 16, kind: input, shape index: {}]   ;;  %s3955_s17 = inlined_call_operand.hbm [shape: f32[2,128], index: 17, kind: output, shape index: {}]  }
   0x1   :  { %3957 = sst [smem:[#allocation5_spill]] %s3938_s0 }
   0x2   :  { %3958 = sst [smem:[#allocation6_spill]] %s3939_s1 }
   0x3   :  { %s3959_s26 = sld [smem:[#allocation5_spill]]  ;;  %vm66_vm0 = vcmask 1046528   ;;  %vm103_vm1 = vcmask 1045504   ;;  %vm126_vm2 = vcmask 1044480   ;;  %vm149_vm3 = vcmask 1043456   ;;  %v2731_v32 = vld [vmem:[%s3940_s2] sm:$0xff]  }
   0x4   :  { %vm172_vm4 = vcmask 1042432   ;;  %s2935_s20 = smov 16   ;;  %s2936_s21 = smov 8   ;;  %2494 = vmatprep.subr.bf16.mxu0 %v2731_v32  ;;  %v2732_v49 = vld [vmem:[%s3940_s2 + $0x8] sm:$0xff]   ;;  %vm195_vm5 = vcmask 1041408   ;;  %vm218_vm6 = vcmask 1040384  }
   0x5   :  { %2495 = vmatpush3.bf16.msra.mxu0 %v2731_v32  ;;  %s2938_s29 = smov 32   ;;  %s2940_s0 = smov 48  }
   0x6   :  { %2496 = vmatprep.subr.bf16.mxu0 %v2732_v49  ;;  %s2941_s30 = smov 56  }
   0x9   :  { %v58_v0 = vld [vmem:[%s3959_s26] sm:$0xff]  ;;  %v59_v1 = vld [vmem:[%s3959_s26 + $0x8] sm:$0xff]  ;;  %v60_v4 = vld [vmem:[%s3959_s26 + $0x10] sm:$0xff]  ;;  %2497 = vmatpush3.bf16.msra.mxu0 %v2732_v49 }
   0xa   :  { %v67_v2 = vrot.slane %v58_v0, 1  ;;  %v3044_v3 = vrot.slane %v59_v1, 1  ;;  %v61_v5 = vld [vmem:[%s3959_s26 + $0x18] sm:$0xff]  ;;  %v70_v6 = vrot.slane %v60_v4, 1  ;;  %s2937_s26 = smov 24  }
   0xb   :  { %v3052_v7 = vrot.slane %v61_v5, 1 }
   0xc   :  { %v3056_v8 = vsel %vm66_vm0, %v67_v2, %v3044_v3  ;;  %v3059_v9 = vsel %vm66_vm0, 0.0, %v67_v2  ;;  %v107_v10 = vrot.slane %v3044_v3, 2  ;;  %v84_v11 = vrot.slane %v3044_v3, 1  ;;  %v2733_v2 = vld [vmem:[%s3940_s2 + $0x10] sm:$0xff]  }
   0xd   :  { %v104_v12 = vrot.slane %v3059_v9, 2  ;;  %v105_v13 = vrot.slane %v3056_v8, 2  ;;  %v81_v14 = vrot.slane %v3059_v9, 1  ;;  %v82_v15 = vrot.slane %v3056_v8, 1  ;;  %2498 = vmatprep.subr.bf16.mxu0 %v2733_v2 }
   0xe   :  { %v3069_v16 = vsel %vm66_vm0, %v70_v6, %v3052_v7  ;;  %v3072_v17 = vsel %vm66_vm0, 0.0, %v70_v6  ;;  %v112_v18 = vrot.slane %v3052_v7, 2  ;;  %v89_v19 = vrot.slane %v3052_v7, 1  ;;  %2499 = vmatpush3.bf16.msra.mxu0 %v2733_v2 }
   0xf   :  { %v106_v20 = vsel %vm103_vm1, %v104_v12, %v105_v13  ;;  %v108_v21 = vsel %vm103_vm1, %v105_v13, %v107_v10  ;;  %v83_v22 = vsel %vm66_vm0, %v81_v14, %v82_v15  ;;  %v85_v23 = vsel %vm66_vm0, %v82_v15, %v84_v11 }
  0x10   :  { %v2671_v24 = vpack.i.bf16 %v108_v21, %v106_v20  ;;  %v2661_v25 = vpack.i.bf16 %v85_v23, %v83_v22  ;;  %v109_v26 = vrot.slane %v3072_v17, 2  ;;  %v110_v27 = vrot.slane %v3069_v16, 2  ;;  %v2734_v22 = vld [vmem:[%s3940_s2 + $0x18] sm:$0xff]   ;;  %s2939_s2 = smov 40  }
  0x11   :  { %v86_v28 = vrot.slane %v3072_v17, 1  ;;  %v87_v29 = vrot.slane %v3069_v16, 1  ;;  %v132_v30 = vrot.slane %v3072_v17, 3  ;;  %v133_v31 = vrot.slane %v3069_v16, 3  ;;  %2500 = vmatprep.subr.bf16.mxu0 %v2734_v22 }
  0x12   :  { %2672 = vrot.lane.b32.xlu1 %v2671_v24, %s2935_s20  ;;  %2662 = vrot.lane.b32.xlu0 %v2661_v25, %s2936_s21  ;;  %v111_v33 = vsel %vm103_vm1, %v109_v26, %v110_v27  ;;  %v113_v34 = vsel %vm103_vm1, %v110_v27, %v112_v18  ;;  %v135_v35 = vrot.slane %v3052_v7, 3  ;;  %v127_v36 = vrot.slane %v3059_v9, 3 }
  0x13   :  { %v2676_v37 = vpack.i.bf16 %v113_v34, %v111_v33  ;;  %v88_v38 = vsel %vm66_vm0, %v86_v28, %v87_v29  ;;  %v90_v39 = vsel %vm66_vm0, %v87_v29, %v89_v19  ;;  %v134_v40 = vsel %vm126_vm2, %v132_v30, %v133_v31  ;;  %2501 = vmatpush3.bf16.msra.mxu0 %v2734_v22 }
  0x14   :  { %v2666_v41 = vpack.i.bf16 %v90_v39, %v88_v38  ;;  %v136_v42 = vsel %vm126_vm2, %v133_v31, %v135_v35  ;;  %v128_v43 = vrot.slane %v3056_v8, 3  ;;  %v130_v44 = vrot.slane %v3044_v3, 3 }
  0x15   :  { %v2686_v45 = vpack.i.bf16 %v136_v42, %v134_v40  ;;  %v155_v46 = vrot.slane %v3072_v17, 4  ;;  %v156_v47 = vrot.slane %v3069_v16, 4  ;;  %v158_v48 = vrot.slane %v3052_v7, 4 }
  0x16   :  { %2677 = vrot.lane.b32.xlu1 %v2676_v37, %s2935_s20  ;;  %2667 = vrot.lane.b32.xlu0 %v2666_v41, %s2936_s21  ;;  %v129_v50 = vsel %vm126_vm2, %v127_v36, %v128_v43  ;;  %v131_v51 = vsel %vm126_vm2, %v128_v43, %v130_v44  ;;  %v150_v52 = vrot.slane %v3059_v9, 4  ;;  %v151_v53 = vrot.slane %v3056_v8, 4 }
  0x17   :  { %v2681_v54 = vpack.i.bf16 %v131_v51, %v129_v50  ;;  %v157_v55 = vsel %vm149_vm3, %v155_v46, %v156_v47  ;;  %v159_v56 = vsel %vm149_vm3, %v156_v47, %v158_v48  ;;  %v153_v57 = vrot.slane %v3044_v3, 4 }
  0x18   :  { %v2696_v58 = vpack.i.bf16 %v159_v56, %v157_v55  ;;  %v152_v59 = vsel %vm149_vm3, %v150_v52, %v151_v53  ;;  %v178_v60 = vrot.slane %v3072_v17, 5  ;;  %v179_v61 = vrot.slane %v3069_v16, 5 }
  0x19   :  { %v154_v62 = vsel %vm149_vm3, %v151_v53, %v153_v57  ;;  %v181_v63 = vrot.slane %v3052_v7, 5  ;;  %v173_v0 = vrot.slane %v3059_v9, 5  ;;  %v174_v1 = vrot.slane %v3056_v8, 5 }
  0x1a   :  { %2687 = vrot.lane.b32.xlu1 %v2686_v45, %s2937_s26  ;;  %2682 = vrot.lane.b32.xlu0 %v2681_v54, %s2937_s26  ;;  %v2691_v4 = vpack.i.bf16 %v154_v62, %v152_v59  ;;  %v180_v5 = vsel %vm172_vm4, %v178_v60, %v179_v61  ;;  %v176_v6 = vrot.slane %v3044_v3, 5  ;;  %v201_v12 = vrot.slane %v3072_v17, 6 }
  0x1b   :  { %v182_v10 = vsel %vm172_vm4, %v179_v61, %v181_v63  ;;  %v175_v11 = vsel %vm172_vm4, %v173_v0, %v174_v1  ;;  %v202_v13 = vrot.slane %v3069_v16, 6  ;;  %v204_v15 = vrot.slane %v3052_v7, 6 }
  0x1c   :  { %v177_v14 = vsel %vm172_vm4, %v174_v1, %v176_v6  ;;  %v196_v18 = vrot.slane %v3059_v9, 6  ;;  %v2706_v19 = vpack.i.bf16 %v182_v10, %v180_v5  ;;  %v197_v20 = vrot.slane %v3056_v8, 6 }
  0x1d   :  { %v199_v21 = vrot.slane %v3044_v3, 6  ;;  %v2701_v23 = vpack.i.bf16 %v177_v14, %v175_v11  ;;  %v203_v24 = vsel %vm195_vm5, %v201_v12, %v202_v13  ;;  %v205_v25 = vsel %vm195_vm5, %v202_v13, %v204_v15 }
  0x1e   :  { %2697 = vrot.lane.b32.xlu1 %v2696_v58, %s2938_s29  ;;  %2692 = vrot.lane.b32.xlu0 %v2691_v4, %s2938_s29  ;;  %v224_v26 = vrot.slane %v3072_v17, 7  ;;  %v198_v27 = vsel %vm195_vm5, %v196_v18, %v197_v20  ;;  %v225_v29 = vrot.slane %v3069_v16, 7  ;;  %v227_v30 = vrot.slane %v3052_v7, 7 }
  0x1f   :  { %v200_v28 = vsel %vm195_vm5, %v197_v20, %v199_v21  ;;  %v219_v31 = vrot.slane %v3059_v9, 7  ;;  %v220_v32 = vrot.slane %v3056_v8, 7  ;;  %v222_v33 = vrot.slane %v3044_v3, 7 }
  0x20   :  { %v2716_v34 = vpack.i.bf16 %v205_v25, %v203_v24  ;;  %v2711_v35 = vpack.i.bf16 %v200_v28, %v198_v27  ;;  %v226_v36 = vsel %vm218_vm6, %v224_v26, %v225_v29  ;;  %v228_v37 = vsel %vm218_vm6, %v225_v29, %v227_v30 }
  0x21   :  { %v221_v38 = vsel %vm218_vm6, %v219_v31, %v220_v32  ;;  %v223_v39 = vsel %vm218_vm6, %v220_v32, %v222_v33  ;;  %v2726_v7 = vpack.i.bf16 %v228_v37, %v226_v36 }
  0x22   :  { %2707 = vrot.lane.b32.xlu1 %v2706_v19, %s2939_s2  ;;  %2702 = vrot.lane.b32.xlu0 %v2701_v23, %s2939_s2  ;;  %v2721_v40 = vpack.i.bf16 %v223_v39, %v221_v38 }
  0x26   :  { %2717 = vrot.lane.b32.xlu1 %v2716_v34, %s2940_s0  ;;  %2712 = vrot.lane.b32.xlu0 %v2711_v35, %s2940_s0 }
  0x2a   :  { %2727 = vrot.lane.b32.xlu1 %v2726_v7, %s2941_s30  ;;  %2722 = vrot.lane.b32.xlu0 %v2721_v40, %s2941_s30 }
  0x2b   :  { %22 = vsyncpa [#allocation3], 0  ;;  %vm241_vm7 = vcmask 64512   ;;  %vm246_vm8 = vcmask 130048   ;;  %vm251_vm9 = vcmask 195584   ;;  %vm256_vm10 = vcmask 261120  }
  0x2c   :  { %vm261_vm11 = vcmask 326656   ;;  %vm266_vm12 = vcmask 392192   ;;  %vm271_vm13 = vcmask 457728   ;;  %vm317_vm14 = vcmask 523264   ;;  %vm2294_vm15 = vmneg %vm149_vm3  ;;  %s3964_s25 = sld [smem:[#allocation6_spill]]  ;;  %s2947_s28 = smov [#allocation2]  }
  0x2d   :  { %vm2942_vm4 = vmmov 1   ;;  %s2197_s29 = sshll.u32 %s2947_s28, 4  ;;  %s2198_s29 = int_to_ptr.vmem [resolvable:$true] %s2197_s29 }
  0x2e   :  { %vm3316_vm6 = vmpackc.low %vm2942_vm4, %vm2294_vm15  ;;  %p2916_p1 = scmp.lt.s32.totalorder %s2198_s29, %s2198_s29 }
  0x84   :  { %v2673_v41 = vpop.permute.xlu1 %2672  ;;  %v2663_v3 = vpop.permute.xlu0 %2662 }
  0x85   :  { %v2665_v46 = vunpack.i.h.bf16 %v2663_v3  ;;  %v2664_v47 = vunpack.i.l.bf16 %v2663_v3  ;;  %v2675_v52 = vunpack.i.h.bf16 %v2673_v41  ;;  %v2674_v53 = vunpack.i.l.bf16 %v2673_v41 }
  0x87   :  { %v243_v56 = vsel %vm241_vm7, %v3056_v8, %v2665_v46  ;;  %v242_v57 = vsel %vm241_vm7, %v3059_v9, %v2664_v47 }
  0x88   :  { %v2678_v42 = vpop.permute.xlu1 %2677  ;;  %v2668_v43 = vpop.permute.xlu0 %2667  ;;  %v247_v9 = vsel %vm246_vm8, %v242_v57, %v2674_v53  ;;  %v2743_v53 = vld [vmem:[%s3944_s6 + $0x20] ss:$8 sps:$4 sm:$0xff]  }
  0x89   :  { %v2670_v48 = vunpack.i.h.bf16 %v2668_v43  ;;  %v2669_v49 = vunpack.i.l.bf16 %v2668_v43  ;;  %v2680_v54 = vunpack.i.h.bf16 %v2678_v42  ;;  %v2679_v55 = vunpack.i.l.bf16 %v2678_v42  ;;  %v2749_v57 = vld [vmem:[%s3944_s6 + $0x40] ss:$8 sps:$4 sm:$0xff]  }
  0x8b   :  { %v245_v58 = vsel %vm241_vm7, %v3069_v16, %v2670_v48  ;;  %v244_v59 = vsel %vm241_vm7, %v3072_v17, %v2669_v49  ;;  %v248_v16 = vsel %vm246_vm8, %v243_v56, %v2675_v52  ;;  %v2735_v48 = vld [vmem:[%s3944_s6 + $0x4] ss:$8 sps:$4 sm:$0xff]   ;;  %v2737_v49 = vld [vmem:[%s3944_s6] ss:$8 sps:$4 sm:$0xff]  }
  0x8c   :  { %v2688_v44 = vpop.permute.xlu1 %2687  ;;  %v2683_v45 = vpop.permute.xlu0 %2682  ;;  %v249_v2 = vsel %vm246_vm8, %v244_v59, %v2679_v55  ;;  %v250_v8 = vsel %vm246_vm8, %v245_v58, %v2680_v54  ;;  %1010 = vmatprep.subr.bf16.mxu1 %v2735_v48  ;;  %v2741_v52 = vld [vmem:[%s3944_s6 + $0x24] ss:$8 sps:$4 sm:$0xff]   ;;  %v2744_v54 = vld [vmem:[%s3944_s6 + $0x34] ss:$8 sps:$4 sm:$0xff]   ;;  %v2746_v55 = vld [vmem:[%s3944_s6 + $0x30] ss:$8 sps:$4 sm:$0xff]  }
  0x8d   :  { %v2690_v62 = vunpack.i.h.bf16 %v2688_v44  ;;  %v2689_v63 = vunpack.i.l.bf16 %v2688_v44  ;;  %v2685_v0 = vunpack.i.h.bf16 %v2683_v45  ;;  %v2684_v1 = vunpack.i.l.bf16 %v2683_v45  ;;  %1011 = vmatpush1.bf16.msra.mxu1 %v2737_v49  ;;  %v2747_v56 = vld [vmem:[%s3944_s6 + $0x44] ss:$8 sps:$4 sm:$0xff]   ;;  %v2750_v58 = vld [vmem:[%s3944_s6 + $0x54] ss:$8 sps:$4 sm:$0xff]   ;;  %v2752_v59 = vld [vmem:[%s3944_s6 + $0x50] ss:$8 sps:$4 sm:$0xff]  }
  0x8f   :  { %v254_v18 = vsel %vm251_vm9, %v249_v2, %v2689_v63  ;;  %v255_v19 = vsel %vm251_vm9, %v250_v8, %v2690_v62  ;;  %v252_v20 = vsel %vm251_vm9, %v247_v9, %v2684_v1  ;;  %v253_v21 = vsel %vm251_vm9, %v248_v16, %v2685_v0  ;;  %v2756_v62 = vld [vmem:[%s3944_s6 + $0x74] ss:$8 sps:$4 sm:$0xff]   ;;  %v2758_v63 = vld [vmem:[%s3944_s6 + $0x70] ss:$8 sps:$4 sm:$0xff]   ;;  %v2759_v0 = vld [vmem:[%s3944_s6 + $0x84] ss:$8 sps:$4 sm:$0xff]  }
  0x90   :  { %v2698_v50 = vpop.permute.xlu1 %2697  ;;  %v2693_v51 = vpop.permute.xlu0 %2692  ;;  %v2761_v1 = vld [vmem:[%s3944_s6 + $0x80] ss:$8 sps:$4 sm:$0xff]   ;;  %v2762_v2 = vld [vmem:[%s3944_s6 + $0x94] ss:$8 sps:$4 sm:$0xff]   ;;  %v2764_v8 = vld [vmem:[%s3944_s6 + $0x90] ss:$8 sps:$4 sm:$0xff]  }
  0x91   :  { %v2700_v4 = vunpack.i.h.bf16 %v2698_v50  ;;  %v2699_v17 = vunpack.i.l.bf16 %v2698_v50  ;;  %v2695_v5 = vunpack.i.h.bf16 %v2693_v51  ;;  %v2694_v6 = vunpack.i.l.bf16 %v2693_v51  ;;  %v2738_v50 = vld [vmem:[%s3944_s6 + $0x14] ss:$8 sps:$4 sm:$0xff]   ;;  %v2740_v51 = vld [vmem:[%s3944_s6 + $0x10] ss:$8 sps:$4 sm:$0xff]   ;;  %v2765_v9 = vld [vmem:[%s3944_s6 + $0xa4] ss:$8 sps:$4 sm:$0xff]  }
  0x92   :  { %1012 = vmatprep.subr.bf16.mxu1 %v2738_v50  ;;  %v2767_v16 = vld [vmem:[%s3944_s6 + $0xa0] ss:$8 sps:$4 sm:$0xff]  }
  0x93   :  { %v259_v26 = vsel %vm256_vm10, %v254_v18, %v2699_v17  ;;  %v260_v27 = vsel %vm256_vm10, %v255_v19, %v2700_v4  ;;  %v257_v28 = vsel %vm256_vm10, %v252_v20, %v2694_v6  ;;  %v258_v29 = vsel %vm256_vm10, %v253_v21, %v2695_v5  ;;  %1013 = vmatpush1.bf16.msra.mxu1 %v2740_v51  ;;  %v2768_v4 = vld [vmem:[%s3944_s6 + $0xb4] ss:$8 sps:$4 sm:$0xff]   ;;  %v2770_v17 = vld [vmem:[%s3944_s6 + $0xb0] ss:$8 sps:$4 sm:$0xff]   ;;  %v2771_v5 = vld [vmem:[%s3944_s6 + $0xc4] ss:$8 sps:$4 sm:$0xff]  }
  0x94   :  { %v2708_v60 = vpop.permute.xlu1 %2707  ;;  %v2703_v61 = vpop.permute.xlu0 %2702  ;;  %1014 = vmatprep.subr.bf16.mxu1 %v2741_v52  ;;  %v2773_v6 = vld [vmem:[%s3944_s6 + $0xc0] ss:$8 sps:$4 sm:$0xff]   ;;  %v2785_v18 = vld [vmem:[%s3944_s6 + $0x104] ss:$8 sps:$4 sm:$0xff]  }
  0x95   :  { %v2710_v10 = vunpack.i.h.bf16 %v2708_v60  ;;  %v2709_v11 = vunpack.i.l.bf16 %v2708_v60  ;;  %v2705_v12 = vunpack.i.h.bf16 %v2703_v61  ;;  %v2704_v13 = vunpack.i.l.bf16 %v2703_v61  ;;  %v2753_v60 = vld [vmem:[%s3944_s6 + $0x64] ss:$8 sps:$4 sm:$0xff]   ;;  %v2755_v61 = vld [vmem:[%s3944_s6 + $0x60] ss:$8 sps:$4 sm:$0xff]  }
  0x96   :  { %v2205_v20 = vld [vmem:[%s3941_s3] ss:$0 sm:$0xff] }
  0x97   :  { %v264_v30 = vsel %vm261_vm11, %v259_v26, %v2709_v11  ;;  %v265_v31 = vsel %vm261_vm11, %v260_v27, %v2710_v10  ;;  %v262_v32 = vsel %vm261_vm11, %v257_v28, %v2704_v13  ;;  %v263_v33 = vsel %vm261_vm11, %v258_v29, %v2705_v12  ;;  %1015 = vmatpush1.bf16.msra.mxu1 %v2743_v53  ;;  %v2774_v10 = vld [vmem:[%s3944_s6 + $0xd4] ss:$8 sps:$4 sm:$0xff]   ;;  %v2776_v11 = vld [vmem:[%s3944_s6 + $0xd0] ss:$8 sps:$4 sm:$0xff]   ;;  %v2777_v12 = vld [vmem:[%s3944_s6 + $0xe4] ss:$8 sps:$4 sm:$0xff]  }
  0x98   :  { %v2718_v14 = vpop.permute.xlu1 %2717  ;;  %v2713_v15 = vpop.permute.xlu0 %2712  ;;  %1016 = vmatprep.subr.bf16.mxu1 %v2744_v54  ;;  %v2779_v13 = vld [vmem:[%s3944_s6 + $0xe0] ss:$8 sps:$4 sm:$0xff]  }
  0x99   :  { %v2720_v22 = vunpack.i.h.bf16 %v2718_v14  ;;  %v2719_v23 = vunpack.i.l.bf16 %v2718_v14  ;;  %v2715_v24 = vunpack.i.h.bf16 %v2713_v15  ;;  %v2714_v25 = vunpack.i.l.bf16 %v2713_v15  ;;  %v2780_v14 = vld [vmem:[%s3944_s6 + $0xf4] ss:$8 sps:$4 sm:$0xff]   ;;  %v2782_v15 = vld [vmem:[%s3944_s6 + $0xf0] ss:$8 sps:$4 sm:$0xff]  }
  0x9b   :  { %v269_v7 = vsel %vm266_vm12, %v264_v30, %v2719_v23  ;;  %v270_v40 = vsel %vm266_vm12, %v265_v31, %v2720_v22  ;;  %v267_v41 = vsel %vm266_vm12, %v262_v32, %v2714_v25  ;;  %v268_v3 = vsel %vm266_vm12, %v263_v33, %v2715_v24  ;;  %1017 = vmatpush1.bf16.msra.mxu1 %v2746_v55 }
  0x9c   :  { %v2728_v34 = vpop.permute.xlu1 %2727  ;;  %v2723_v35 = vpop.permute.xlu0 %2722  ;;  %1018 = vmatprep.subr.bf16.mxu1 %v2747_v56  ;;  %v2212_v56 = vld [vmem:[%s3942_s4] ss:$0 sm:$0xff] }
  0x9d   :  { %v2730_v36 = vunpack.i.h.bf16 %v2728_v34  ;;  %v2729_v37 = vunpack.i.l.bf16 %v2728_v34  ;;  %v2725_v38 = vunpack.i.h.bf16 %v2723_v35  ;;  %v2724_v39 = vunpack.i.l.bf16 %v2723_v35 }
  0x9f   :  { %v274_v42 = vsel %vm271_vm13, %v269_v7, %v2729_v37  ;;  %v275_v43 = vsel %vm271_vm13, %v270_v40, %v2730_v36  ;;  %v272_v44 = vsel %vm271_vm13, %v267_v41, %v2724_v39  ;;  %v273_v45 = vsel %vm271_vm13, %v268_v3, %v2725_v38  ;;  %1019 = vmatpush1.bf16.msra.mxu1 %v2749_v57 }
  0xa0   :  { %v277_v46 = vpack.c.bf16 %v275_v43, %v274_v42  ;;  %v276_v47 = vpack.c.bf16 %v273_v45, %v272_v44  ;;  %1020 = vmatprep.subr.bf16.mxu1 %v2750_v58 }
  0xa2   :  { %2502 = vmatprep.mubr.msk.bf16.mxu0 %vm317_vm14, %v276_v47 }
  0xa3   :  { %2503 = vmatmul.mubr.msk.bf16.vlgmr.msra.gmra.mrb[0].mxu0 %vm317_vm14, %v277_v46  ;;  %1021 = vmatpush1.bf16.msra.mxu1 %v2752_v59 }
  0xa4   :  { %1022 = vmatprep.subr.bf16.mxu1 %v2753_v60 }
  0xa7   :  { %1023 = vmatpush1.bf16.msra.mxu1 %v2755_v61  ;;  %v2213_v61 = vld [vmem:[%s3943_s5] ss:$0 sm:$0xff] }
  0xa8   :  { %1024 = vmatprep.subr.bf16.mxu1 %v2756_v62 }
  0xab   :  { %1025 = vmatpush1.bf16.msra.mxu1 %v2758_v63 }
  0xac   :  { %1026 = vmatprep.subr.bf16.mxu1 %v2759_v0 }
  0xaf   :  { %1027 = vmatpush1.bf16.msra.mxu1 %v2761_v1 }
  0xb0   :  { %1028 = vmatprep.subr.bf16.mxu1 %v2762_v2 }
  0xb3   :  { %1029 = vmatpush1.bf16.msra.mxu1 %v2764_v8 }
  0xb4   :  { %1030 = vmatprep.subr.bf16.mxu1 %v2765_v9 }
  0xb7   :  { %1031 = vmatpush1.bf16.msra.mxu1 %v2767_v16 }
  0xb8   :  { %1032 = vmatprep.subr.bf16.mxu1 %v2768_v4 }
  0xbb   :  { %1033 = vmatpush1.bf16.msra.mxu1 %v2770_v17 }
  0xbc   :  { %1034 = vmatprep.subr.bf16.mxu1 %v2771_v5 }
  0xbf   :  { %1035 = vmatpush1.bf16.msra.mxu1 %v2773_v6 }
  0xc0   :  { %1036 = vmatprep.subr.bf16.mxu1 %v2774_v10 }
  0xc3   :  { %1037 = vmatpush1.bf16.msra.mxu1 %v2776_v11 }
  0xc4   :  { %1038 = vmatprep.subr.bf16.mxu1 %v2777_v12 }
  0xc7   :  { %1039 = vmatpush1.bf16.msra.mxu1 %v2779_v13 }
  0xc8   :  { %1040 = vmatprep.subr.bf16.mxu1 %v2780_v14 }
  0xcb   :  { %1041 = vmatpush1.bf16.msra.mxu1 %v2782_v15 }
  0xcc   :  { %1063 = vmatprep.subr.bf16.mxu1 %v2785_v18 }
 0x176   :  { %v2504_v19 = vpop.f32.mrb[0].mxu0 }
 0x177   :  { %v358_v21 = vpop.f32.mrb[1].mxu0  ;;  %v367_v26 = vadd.f32 %v2504_v19, %v2205_v20 }
 0x178   :  { %v2505_v22 = vpop.f32.mrb[2].mxu0  ;;  %v359_v24 = vadd.f32 %v2205_v20, %v358_v21 }
 0x179   :  { %v361_v23 = vpop.f32.mrb[3].mxu0  ;;  %v370_v28 = vadd.f32 %v2505_v22, %v2205_v20 }
 0x17a   :  { %v362_v25 = vadd.f32 %v2205_v20, %v361_v23 }
 0x17c   :  { %v373_v27 = vadd.f32 %v362_v25, %v359_v24 }
 0x17e   :  { %v374_v29 = vadd.f32 %v373_v27, %v367_v26 }
 0x180   :  { %v375_v30 = vadd.f32 %v374_v29, %v370_v28 }
 0x182   :  { %v376_v31 = vrot.slane %v375_v30, 4 }
 0x184   :  { %v377_v32 = vadd.f32 %v376_v31, %v375_v30 }
 0x186   :  { %v378_v33 = vrot.slane %v377_v32, 2 }
 0x188   :  { %v379_v34 = vadd.f32 %v378_v33, %v377_v32  ;;  %v2783_v33 = vld [vmem:[%s3944_s6 + $0x100] ss:$8 sps:$4 sm:$0xff]  }
 0x18a   :  { %v380_v35 = vrot.slane %v379_v34, 1 }
 0x18c   :  { %v381_v36 = vadd.f32 %v380_v35, %v379_v34  ;;  %v2827_v34 = vld [vmem:[%s3944_s6 + $0x1e4] ss:$8 sps:$4 sm:$0xff]  }
 0x18e   :  { %v383_v37 = vmul.f32 0.03125, %v381_v36 }
 0x190   :  { %v384_v38 = vsub.f32 %v359_v24, %v383_v37  ;;  %v385_v39 = vsub.f32 %v362_v25, %v383_v37  ;;  %v386_v7 = vsub.f32 %v367_v26, %v383_v37  ;;  %v387_v40 = vsub.f32 %v370_v28, %v383_v37 }
 0x192   :  { %v388_v41 = vmul.f32 %v384_v38, %v384_v38  ;;  %v389_v3 = vmul.f32 %v385_v39, %v385_v39  ;;  %v390_v42 = vmul.f32 %v386_v7, %v386_v7  ;;  %v391_v44 = vmul.f32 %v387_v40, %v387_v40 }
 0x194   :  { %v392_v43 = vadd.f32 %v389_v3, %v388_v41 }
 0x196   :  { %v393_v45 = vadd.f32 %v392_v43, %v390_v42 }
 0x198   :  { %v394_v46 = vadd.f32 %v393_v45, %v391_v44 }
 0x19a   :  { %v395_v47 = vrot.slane %v394_v46, 4 }
 0x19c   :  { %v396_v48 = vadd.f32 %v395_v47, %v394_v46 }
 0x19e   :  { %v397_v49 = vrot.slane %v396_v48, 2 }
 0x1a0   :  { %v398_v50 = vadd.f32 %v397_v49, %v396_v48  ;;  %v2786_v49 = vld [vmem:[%s3944_s6 + $0x110] ss:$8 sps:$4 sm:$0xff]  }
 0x1a2   :  { %v399_v51 = vrot.slane %v398_v50, 1 }
 0x1a4   :  { %v400_v52 = vadd.f32 %v399_v51, %v398_v50 }
 0x1a6   :  { %v401_v53 = vmul.f32 0.03125, %v400_v52 }
 0x1a8   :  { %v402_v54 = vadd.f32 0.001, %v401_v53 }
 0x1aa   :  { %2903 = vrsqrt.f32 %v402_v54  ;;  %v2791_v54 = vld [vmem:[%s3944_s6 + $0x124] ss:$8 sps:$4 sm:$0xff]  }
 0x1b4   :  { %v2904_v55 = vpop.eup %2903 }
 0x1b5   :  { %v404_v57 = vmul.f32 %v2904_v55, %v384_v38  ;;  %v405_v58 = vmul.f32 %v2904_v55, %v385_v39  ;;  %v406_v59 = vmul.f32 %v2904_v55, %v386_v7  ;;  %v407_v60 = vmul.f32 %v2904_v55, %v387_v40  ;;  %v2788_v39 = vld [vmem:[%s3944_s6 + $0x114] ss:$8 sps:$4 sm:$0xff]  }
 0x1b7   :  { %v415_v62 = vmul.f32 %v2212_v56, %v404_v57  ;;  %v416_v63 = vmul.f32 %v2212_v56, %v405_v58  ;;  %v417_v0 = vmul.f32 %v2212_v56, %v406_v59  ;;  %v418_v1 = vmul.f32 %v2212_v56, %v407_v60 }
 0x1b9   :  { %v427_v2 = vadd.f32 %v2213_v61, %v416_v63  ;;  %v428_v8 = vadd.f32 %v2213_v61, %v417_v0  ;;  %v429_v9 = vadd.f32 %v2213_v61, %v418_v1  ;;  %v426_v16 = vadd.f32 %v2213_v61, %v415_v62 }
 0x1bb   :  { %v431_v4 = vmax.f32 %v427_v2, 0.0  ;;  %v432_v17 = vmax.f32 %v428_v8, 0.0  ;;  %v433_v5 = vmax.f32 %v429_v9, 0.0  ;;  %v430_v6 = vmax.f32 %v426_v16, 0.0  ;;  %v2789_v8 = vld [vmem:[%s3944_s6 + $0x120] ss:$8 sps:$4 sm:$0xff]  }
 0x1bd   :  { %v3284_v10 = vrot.slane %v431_v4, 4  ;;  %v3286_v11 = vrot.slane %v432_v17, 4  ;;  %v3288_v12 = vrot.slane %v433_v5, 4  ;;  %v438_v13 = vrot.slane %v430_v6, 4  ;;  %v2794_v17 = vld [vmem:[%s3944_s6 + $0x134] ss:$8 sps:$4 sm:$0xff]  }
 0x1bf   :  { %v3292_v14 = vsel %vm149_vm3, %v438_v13, %v3284_v10  ;;  %v448_v15 = vsel %vm149_vm3, 0.0, %v438_v13  ;;  %v455_v18 = vrot.slane %v3284_v10, 1  ;;  %v3299_v19 = vsel %vm149_vm3, %v3286_v11, %v3288_v12 }
 0x1c0   :  { %v452_v20 = vrot.slane %v448_v15, 1  ;;  %v453_v21 = vrot.slane %v3292_v14, 1  ;;  %v466_v22 = vrot.slane %v448_v15, 2  ;;  %v494_v23 = vrot.slane %v448_v15, 4 }
 0x1c1   :  { %v2296_v24 = vpack.c.bf16 %v3292_v14, %v438_v13  ;;  %v449_v25 = vsel %vm149_vm3, 0.0, %v3286_v11  ;;  %v458_v26 = vrot.slane %v3299_v19, 1  ;;  %v460_v27 = vrot.slane %v3288_v12, 1  ;;  %v2795_v13 = vld [vmem:[%s3944_s6 + $0x140] ss:$8 sps:$4 sm:$0xff]  }
 0x1c2   :  { %v454_v28 = vsel %vm66_vm0, %v452_v20, %v453_v21  ;;  %v456_v29 = vsel %vm66_vm0, %v453_v21, %v455_v18  ;;  %v457_v30 = vrot.slane %v449_v25, 1  ;;  %v2300_v31 = vpack.c.bf16 %v3299_v19, %v3286_v11  ;;  %v2792_v11 = vld [vmem:[%s3944_s6 + $0x130] ss:$8 sps:$4 sm:$0xff]   ;;  %v2803_v18 = vld [vmem:[%s3944_s6 + $0x164] ss:$8 sps:$4 sm:$0xff]  }
 0x1c3   :  { %v509_v32 = vpack.c.bf16 %v456_v29, %v454_v28  ;;  %v461_v35 = vsel %vm66_vm0, %v458_v26, %v460_v27  ;;  %v480_v36 = vrot.slane %v448_v15, 3  ;;  %v481_v37 = vrot.slane %v3292_v14, 3  ;;  %v2798_v15 = vld [vmem:[%s3944_s6 + $0x150] ss:$8 sps:$4 sm:$0xff]   ;;  %v2806_v20 = vld [vmem:[%s3944_s6 + $0x174] ss:$8 sps:$4 sm:$0xff]  }
 0x1c4   :  { %v459_v38 = vsel %vm66_vm0, %v457_v30, %v458_v26  ;;  %v483_v7 = vrot.slane %v3284_v10, 3  ;;  %v467_v40 = vrot.slane %v3292_v14, 2  ;;  %v469_v41 = vrot.slane %v3284_v10, 2  ;;  %v2804_v21 = vld [vmem:[%s3944_s6 + $0x170] ss:$8 sps:$4 sm:$0xff]  }
 0x1c5   :  { %1042 = vmatprep.mubr.bf16.mxu1 %v509_v32  ;;  %v514_v3 = vpack.c.bf16 %v461_v35, %v459_v38  ;;  %v482_v42 = vsel %vm126_vm2, %v480_v36, %v481_v37  ;;  %v485_v43 = vrot.slane %v449_v25, 3  ;;  %v486_v44 = vrot.slane %v3299_v19, 3  ;;  %v2815_v26 = vld [vmem:[%s3944_s6 + $0x1a4] ss:$8 sps:$4 sm:$0xff]   ;;  %v2813_v27 = vld [vmem:[%s3944_s6 + $0x1a0] ss:$8 sps:$4 sm:$0xff]  }
 0x1c6   :  { %2297 = vmatmul.mubr.msk.bf16.vlgmr.msra.gmra.mrb[0].mxu1 %vm3316_vm6, %v2296_v24  ;;  %v484_v45 = vsel %vm126_vm2, %v481_v37, %v483_v7  ;;  %v3335_v46 = vsel %vm103_vm1, %v466_v22, %v467_v40  ;;  %v3338_v47 = vsel %vm103_vm1, %v467_v40, %v469_v41  ;;  %v488_v48 = vrot.slane %v3288_v12, 3  ;;  %v2809_v22 = vld [vmem:[%s3944_s6 + $0x184] ss:$8 sps:$4 sm:$0xff]   ;;  %v2812_v24 = vld [vmem:[%s3944_s6 + $0x194] ss:$8 sps:$4 sm:$0xff]  }
 0x1c7   :  { %1064 = vmatpush1.bf16.msra.mxu1 %v2783_v33  ;;  %1052 = vmatprep.mubr.bf16.mxu1 %v514_v3  ;;  %v511_v50 = vpack.c.bf16 %v484_v45, %v482_v42  ;;  %v510_v51 = vpack.c.bf16 %v3338_v47, %v3335_v46  ;;  %v3347_v52 = vsel %vm126_vm2, %v485_v43, %v486_v44  ;;  %v471_v53 = vrot.slane %v449_v25, 2  ;;  %v2818_v28 = vld [vmem:[%s3944_s6 + $0x1b4] ss:$8 sps:$4 sm:$0xff]   ;;  %v2816_v29 = vld [vmem:[%s3944_s6 + $0x1b0] ss:$8 sps:$4 sm:$0xff]  }
 0x1c8   :  { %1065 = vmatprep.subr.bf16.mxu1 %v2788_v39  ;;  %v3353_v55 = vsel %vm126_vm2, %v486_v44, %v488_v48  ;;  %v472_v56 = vrot.slane %v3299_v19, 2  ;;  %v474_v57 = vrot.slane %v3288_v12, 2  ;;  %v495_v58 = vrot.slane %v3292_v14, 4  ;;  %v2800_v14 = vld [vmem:[%s3944_s6 + $0x154] ss:$8 sps:$4 sm:$0xff]   ;;  %vm2351_vm2 = vmneg %vm195_vm5 }
 0x1c9   :  { %v516_v59 = vpack.c.bf16 %v3353_v55, %v3347_v52  ;;  %v497_v60 = vrot.slane %v3284_v10, 4  ;;  %v499_v61 = vrot.slane %v449_v25, 4  ;;  %v500_v62 = vrot.slane %v3299_v19, 4  ;;  %v2801_v19 = vld [vmem:[%s3944_s6 + $0x160] ss:$8 sps:$4 sm:$0xff]  }
 0x1ca   :  { %v3363_v63 = vsel %vm103_vm1, %v471_v53, %v472_v56  ;;  %v3366_v0 = vsel %vm103_vm1, %v472_v56, %v474_v57  ;;  %v3369_v1 = vsel %vm149_vm3, %v494_v23, %v495_v58  ;;  %v502_v2 = vrot.slane %v3288_v12, 4  ;;  %v2797_v12 = vld [vmem:[%s3944_s6 + $0x144] ss:$8 sps:$4 sm:$0xff]   ;;  %v2807_v23 = vld [vmem:[%s3944_s6 + $0x180] ss:$8 sps:$4 sm:$0xff]   ;;  %v2859_v57 = vld [vmem:[%s3948_s10 + $0x50] sm:$0xff]  }
 0x1cb   :  { %1066 = vmatpush1.bf16.msra.mxu1 %v2786_v49  ;;  %v515_v9 = vpack.c.bf16 %v3366_v0, %v3363_v63  ;;  %v3378_v16 = vsel %vm149_vm3, %v495_v58, %v497_v60  ;;  %v3381_v4 = vsel %vm149_vm3, %v499_v61, %v500_v62  ;;  %v2810_v25 = vld [vmem:[%s3944_s6 + $0x190] ss:$8 sps:$4 sm:$0xff]   ;;  %v2821_v30 = vld [vmem:[%s3944_s6 + $0x1c4] ss:$8 sps:$4 sm:$0xff]   ;;  %v2824_v32 = vld [vmem:[%s3944_s6 + $0x1d4] ss:$8 sps:$4 sm:$0xff]  }
 0x1cc   :  { %1067 = vmatprep.subr.bf16.mxu1 %v2791_v54  ;;  %v512_v5 = vpack.c.bf16 %v3378_v16, %v3369_v1  ;;  %v3389_v6 = vsel %vm149_vm3, %v500_v62, %v502_v2  ;;  %v2822_v33 = vld [vmem:[%s3944_s6 + $0x1d0] ss:$8 sps:$4 sm:$0xff]   ;;  %v2825_v35 = vld [vmem:[%s3944_s6 + $0x1e0] ss:$8 sps:$4 sm:$0xff]   ;;  %v2830_v36 = vld [vmem:[%s3944_s6 + $0x1f4] ss:$8 sps:$4 sm:$0xff]  }
 0x1cd   :  { %v517_v10 = vpack.c.bf16 %v3389_v6, %v3381_v4  ;;  %v2828_v37 = vld [vmem:[%s3944_s6 + $0x1f0] ss:$8 sps:$4 sm:$0xff]   ;;  %v2833_v38 = vld [vmem:[%s3944_s6 + $0x204] ss:$8 sps:$4 sm:$0xff]   ;;  %v2831_v39 = vld [vmem:[%s3944_s6 + $0x200] ss:$8 sps:$4 sm:$0xff]   ;;  %v600_v4 = vlaneseq }
 0x1ce   :  { %2301 = vmatmul.mubr.msk.bf16.gmra.mrb[4].mxu1 %vm3316_vm6, %v2300_v31  ;;  %v2819_v31 = vld [vmem:[%s3944_s6 + $0x1c0] ss:$8 sps:$4 sm:$0xff]   ;;  %v2836_v7 = vld [vmem:[%s3944_s6 + $0x214] ss:$8 sps:$4 sm:$0xff]   ;;  %v2834_v40 = vld [vmem:[%s3944_s6 + $0x210] ss:$8 sps:$4 sm:$0xff]  }
 0x1cf   :  { %1068 = vmatpush1.bf16.msra.mxu1 %v2789_v8  ;;  %1095 = vmatprep.mubr.bf16.mxu1 %v511_v50  ;;  %v2839_v41 = vld [vmem:[%s3944_s6 + $0x224] ss:$8 sps:$4 sm:$0xff]   ;;  %v2837_v3 = vld [vmem:[%s3944_s6 + $0x220] ss:$8 sps:$4 sm:$0xff]   ;;  %v2842_v42 = vld [vmem:[%s3944_s6 + $0x234] ss:$8 sps:$4 sm:$0xff]  }
 0x1d0   :  { %1069 = vmatprep.subr.bf16.mxu1 %v2794_v17  ;;  %v2840_v43 = vld [vmem:[%s3944_s6 + $0x230] ss:$8 sps:$4 sm:$0xff]   ;;  %v2943_v44 = vmov 0   ;;  %v2845_v45 = vld [vmem:[%s3944_s6 + $0x244] ss:$8 sps:$4 sm:$0xff]   ;;  %v601_v17 = vshrl.u32 %v600_v4, 7  ;;  %vm3628_vm3 = vmpackc.low %vm2942_vm4, %vm2351_vm2 }
 0x1d1   :  { %v2843_v46 = vld [vmem:[%s3944_s6 + $0x240] ss:$8 sps:$4 sm:$0xff]   ;;  %v2848_v47 = vld [vmem:[%s3944_s6 + $0x254] ss:$8 sps:$4 sm:$0xff]   ;;  %v2846_v48 = vld [vmem:[%s3944_s6 + $0x250] ss:$8 sps:$4 sm:$0xff]  }
 0x1d2   :  { %v2851_v49 = vld [vmem:[%s3944_s6 + $0x264] ss:$8 sps:$4 sm:$0xff]   ;;  %v2849_v50 = vld [vmem:[%s3944_s6 + $0x260] ss:$8 sps:$4 sm:$0xff]   ;;  %v2852_v52 = vld [vmem:[%s3944_s6 + $0x270] ss:$8 sps:$4 sm:$0xff]  }
 0x1d3   :  { %1070 = vmatpush1.bf16.msra.mxu1 %v2792_v11  ;;  %v2855_v53 = vld [vmem:[%s3948_s10 + $0x40] sm:$0xff]   ;;  %v2857_v55 = vld [vmem:[%s3948_s10 + $0x48] sm:$0xff]   ;;  %v2860_v58 = vld [vmem:[%s3948_s10 + $0x10] sm:$0xff]  }
 0x1d4   :  { %1071 = vmatprep.subr.bf16.mxu1 %v2797_v12  ;;  %v2856_v54 = vld [vmem:[%s3948_s10] sm:$0xff]   ;;  %2376 = vmatprep.subr.bf16.mxu0 %v2855_v53  ;;  %v2858_v56 = vld [vmem:[%s3948_s10 + $0x8] sm:$0xff]   ;;  %v2862_v60 = vld [vmem:[%s3948_s10 + $0x18] sm:$0xff]  }
 0x1d5   :  { %2377 = vmatpush3.bf16.msra.mxu0 %v2856_v54  ;;  %v2863_v61 = vld [vmem:[%s3948_s10 + $0x60] sm:$0xff]   ;;  %v2865_v63 = vld [vmem:[%s3948_s10 + $0x68] sm:$0xff]   ;;  %v2867_v1 = vld [vmem:[%s3948_s10 + $0x70] sm:$0xff]  }
 0x1d6   :  { %2378 = vmatprep.subr.bf16.mxu0 %v2857_v55  ;;  %v2864_v62 = vld [vmem:[%s3948_s10 + $0x20] sm:$0xff]   ;;  %v2866_v0 = vld [vmem:[%s3948_s10 + $0x28] sm:$0xff]   ;;  %v2868_v2 = vld [vmem:[%s3948_s10 + $0x30] sm:$0xff]  }
 0x1d7   :  { %1072 = vmatpush1.bf16.msra.mxu1 %v2795_v13  ;;  %v2869_v8 = vld [vmem:[%s3948_s10 + $0x78] sm:$0xff]   ;;  %v2871_v16 = vld [vmem:[%s3948_s10 + $0xc0] sm:$0xff]  }
 0x1d8   :  { %1073 = vmatprep.subr.bf16.mxu1 %v2800_v14  ;;  %v598_v6 = vld [vmem:[%s3945_s7] sm:$0x3] }
 0x1d9   :  { %2379 = vmatpush3.bf16.msra.mxu0 %v2858_v56 }
 0x1da   :  { %2380 = vmatprep.subr.bf16.mxu0 %v2859_v57 }
 0x1db   :  { %1074 = vmatpush1.bf16.msra.mxu1 %v2798_v15 }
 0x1dc   :  { %1075 = vmatprep.subr.bf16.mxu1 %v2803_v18 }
 0x1dd   :  { %2381 = vmatpush3.bf16.msra.mxu0 %v2860_v58 }
 0x1df   :  { %1076 = vmatpush1.bf16.msra.mxu1 %v2801_v19 }
 0x1e0   :  { %1077 = vmatprep.subr.bf16.mxu1 %v2806_v20 }
 0x1e3   :  { %1078 = vmatpush1.bf16.msra.mxu1 %v2804_v21 }
 0x1e4   :  { %1079 = vmatprep.subr.bf16.mxu1 %v2809_v22 }
 0x1e7   :  { %1080 = vmatpush1.bf16.msra.mxu1 %v2807_v23 }
 0x1e8   :  { %1081 = vmatprep.subr.bf16.mxu1 %v2812_v24 }
 0x1eb   :  { %1082 = vmatpush1.bf16.msra.mxu1 %v2810_v25 }
 0x1ec   :  { %1083 = vmatprep.subr.bf16.mxu1 %v2815_v26 }
 0x1ef   :  { %1084 = vmatpush1.bf16.msra.mxu1 %v2813_v27 }
 0x1f0   :  { %1085 = vmatprep.subr.bf16.mxu1 %v2818_v28 }
 0x1f3   :  { %1086 = vmatpush1.bf16.msra.mxu1 %v2816_v29 }
 0x1f4   :  { %1087 = vmatprep.subr.bf16.mxu1 %v2821_v30 }
 0x1f7   :  { %1088 = vmatpush1.bf16.msra.mxu1 %v2819_v31 }
 0x1f8   :  { %1089 = vmatprep.subr.bf16.mxu1 %v2824_v32 }
 0x1fb   :  { %1090 = vmatpush1.bf16.msra.mxu1 %v2822_v33 }
 0x1fc   :  { %1091 = vmatprep.subr.bf16.mxu1 %v2827_v34 }
 0x1ff   :  { %1092 = vmatpush1.bf16.msra.mxu1 %v2825_v35 }
 0x200   :  { %1093 = vmatprep.subr.bf16.mxu1 %v2830_v36 }
 0x203   :  { %1094 = vmatpush1.bf16.msra.mxu1 %v2828_v37 }
 0x204   :  { %1116 = vmatprep.subr.bf16.mxu1 %v2833_v38 }
 0x206   :  { %1096 = vmatmul.mubr.bf16.vlgmr.msra.gmra.mrb[0].mxu1 %v510_v51  ;;  %v2854_v51 = vld [vmem:[%s3944_s6 + $0x274] ss:$8 sps:$4 sm:$0xff]  }
 0x207   :  { %1105 = vmatprep.mubr.bf16.mxu1 %v516_v59  ;;  %1117 = vmatpush1.bf16.msra.mxu1 %v2831_v39  ;;  %v2861_v59 = vld [vmem:[%s3948_s10 + $0x58] sm:$0xff]  }
 0x208   :  { %1118 = vmatprep.subr.bf16.mxu1 %v2836_v7  ;;  %2382 = vmatprep.subr.bf16.mxu0 %v2861_v59 }
 0x209   :  { %2383 = vmatpush3.bf16.msra.mxu0 %v2862_v60 }
 0x20a   :  { %2384 = vmatprep.subr.bf16.mxu0 %v2863_v61 }
 0x20b   :  { %1119 = vmatpush1.bf16.msra.mxu1 %v2834_v40 }
 0x20c   :  { %1120 = vmatprep.subr.bf16.mxu1 %v2839_v41 }
 0x20d   :  { %2385 = vmatpush3.bf16.msra.mxu0 %v2864_v62 }
 0x20e   :  { %1106 = vmatmul.mubr.bf16.gmra.mrb[4].mxu1 %v515_v9  ;;  %2386 = vmatprep.subr.bf16.mxu0 %v2865_v63  ;;  %v2870_v9 = vld [vmem:[%s3948_s10 + $0x38] sm:$0xff]  }
 0x20f   :  { %1121 = vmatpush1.bf16.msra.mxu1 %v2837_v3  ;;  %1148 = vmatprep.mubr.bf16.mxu1 %v2943_v44 }
 0x210   :  { %1122 = vmatprep.subr.bf16.mxu1 %v2842_v42 }
 0x211   :  { %2387 = vmatpush3.bf16.msra.mxu0 %v2866_v0 }
 0x212   :  { %2388 = vmatprep.subr.bf16.mxu0 %v2867_v1 }
 0x213   :  { %1123 = vmatpush1.bf16.msra.mxu1 %v2840_v43 }
 0x214   :  { %1124 = vmatprep.subr.bf16.mxu1 %v2845_v45 }
 0x215   :  { %2389 = vmatpush3.bf16.msra.mxu0 %v2868_v2 }
 0x216   :  { %2390 = vmatprep.subr.bf16.mxu0 %v2869_v8 }
 0x217   :  { %1125 = vmatpush1.bf16.msra.mxu1 %v2843_v46 }
 0x218   :  { %1126 = vmatprep.subr.bf16.mxu1 %v2848_v47 }
 0x219   :  { %2391 = vmatpush3.bf16.msra.mxu0 %v2870_v9 }
 0x21a   :  { %2404 = vmatprep.subr.bf16.mxu0 %v2871_v16 }
 0x21b   :  { %1127 = vmatpush1.bf16.msra.mxu1 %v2846_v48 }
 0x21c   :  { %1128 = vmatprep.subr.bf16.mxu1 %v2851_v49 }
 0x21f   :  { %1129 = vmatpush1.bf16.msra.mxu1 %v2849_v50 }
 0x220   :  { %1130 = vmatprep.subr.bf16.mxu1 %v2854_v51 }
 0x223   :  { %1131 = vmatpush1.bf16.msra.mxu1 %v2852_v52 }
 0x226   :  { %1149 = vmatmul.mubr.bf16.vlgmr.msra.gmra.mrb[0].mxu1 %v512_v5  ;;  %v3584_v5 = vsub.s32 0, %v601_v17 }
 0x227   :  { %1158 = vmatprep.mubr.bf16.mxu1 %v2943_v44 }
 0x228   :  { %v603_v11 = vrot.slane %v598_v6, %v3584_v5 }
 0x22e   :  { %1159 = vmatmul.mubr.bf16.gmra.mrb[4].mxu1 %v517_v10  ;;  %v3589_v10 = vsub.s32 1, %v601_v17 }
 0x230   :  { %v607_v13 = vrot.slane %v598_v6, %v3589_v10 }
 0x2f9   :  { %v1150_v12 = vpop.f32.mrb[0].mxu1 }
 0x2fa   :  { %v1152_v14 = vpop.f32.mrb[1].mxu1  ;;  %v2624_v18 = vadd.f32 %v1150_v12, %v603_v11 }
 0x2fb   :  { %v1154_v15 = vpop.f32.mrb[2].mxu1  ;;  %v2625_v21 = vadd.f32 %v1152_v14, %v607_v13 }
 0x2fc   :  { %v2626_v19 = vadd.f32 %v1154_v15, %v603_v11  ;;  %v1156_v20 = vpop.f32.mrb[3].mxu1 }
 0x2fd   :  { %v2627_v22 = vadd.f32 %v1156_v20, %v607_v13 }
 0x2fe   :  { %v1169_v23 = vadd.f32 %v2626_v19, %v2624_v18 }
 0x2ff   :  { %v1178_v24 = vadd.f32 %v2627_v22, %v2625_v21 }
 0x301   :  { %v1160_v25 = vpop.f32.mrb[4].mxu1 }
 0x302   :  { %v2628_v26 = vadd.f32 %v1160_v25, %v603_v11  ;;  %v1162_v27 = vpop.f32.mrb[5].mxu1 }
 0x303   :  { %v2629_v28 = vadd.f32 %v1162_v27, %v607_v13  ;;  %v1164_v29 = vpop.f32.mrb[6].mxu1  ;;  %v1237_v27 = vld [vmem:[%s3946_s8] sm:$0x3] }
 0x304   :  { %v1170_v30 = vadd.f32 %v2628_v26, %v1169_v23  ;;  %v2630_v31 = vadd.f32 %v1164_v29, %v603_v11  ;;  %v1166_v32 = vpop.f32.mrb[7].mxu1  ;;  %v1242_v29 = vrot.slane %v1237_v27, %v3584_v5 }
 0x305   :  { %v1179_v33 = vadd.f32 %v2629_v28, %v1178_v24  ;;  %v2631_v34 = vadd.f32 %v1166_v32, %v607_v13  ;;  %v1246_v32 = vrot.slane %v1237_v27, %v3589_v10 }
 0x306   :  { %v1171_v35 = vadd.f32 %v2630_v31, %v1170_v30 }
 0x307   :  { %v1180_v36 = vadd.f32 %v2631_v34, %v1179_v33 }
 0x308   :  { %v1172_v37 = vrot.slane %v1171_v35, 4 }
 0x309   :  { %v1181_v38 = vrot.slane %v1180_v36, 4 }
 0x30a   :  { %v1173_v39 = vadd.f32 %v1172_v37, %v1171_v35 }
 0x30b   :  { %v1182_v7 = vadd.f32 %v1181_v38, %v1180_v36 }
 0x30c   :  { %v1174_v40 = vrot.slane %v1173_v39, 2 }
 0x30d   :  { %v1183_v41 = vrot.slane %v1182_v7, 2 }
 0x30e   :  { %v1175_v3 = vadd.f32 %v1174_v40, %v1173_v39 }
 0x30f   :  { %v1184_v42 = vadd.f32 %v1183_v41, %v1182_v7 }
 0x310   :  { %v1176_v43 = vrot.slane %v1175_v3, 1 }
 0x311   :  { %v1185_v44 = vrot.slane %v1184_v42, 1 }
 0x312   :  { %v1177_v45 = vadd.f32 %v1176_v43, %v1175_v3 }
 0x313   :  { %v1186_v46 = vadd.f32 %v1185_v44, %v1184_v42 }
 0x314   :  { %v1187_v47 = vmul.f32 0.03125, %v1177_v45 }
 0x315   :  { %v1188_v48 = vmul.f32 0.03125, %v1186_v46 }
 0x316   :  { %v1189_v49 = vsub.f32 %v2624_v18, %v1187_v47  ;;  %v1191_v50 = vsub.f32 %v2626_v19, %v1187_v47  ;;  %v1193_v51 = vsub.f32 %v2628_v26, %v1187_v47  ;;  %v1195_v52 = vsub.f32 %v2630_v31, %v1187_v47 }
 0x317   :  { %v1190_v53 = vsub.f32 %v2625_v21, %v1188_v48  ;;  %v1192_v54 = vsub.f32 %v2627_v22, %v1188_v48  ;;  %v1194_v55 = vsub.f32 %v2629_v28, %v1188_v48  ;;  %v1196_v56 = vsub.f32 %v2631_v34, %v1188_v48  ;;  %v1257_v28 = vld [vmem:[%s3947_s9] sm:$0x3] }
 0x318   :  { %v1197_v57 = vmul.f32 %v1189_v49, %v1189_v49  ;;  %v1199_v58 = vmul.f32 %v1191_v50, %v1191_v50  ;;  %v1201_v61 = vmul.f32 %v1193_v51, %v1193_v51  ;;  %v1203_v1 = vmul.f32 %v1195_v52, %v1195_v52 }
 0x319   :  { %v1198_v59 = vmul.f32 %v1190_v53, %v1190_v53  ;;  %v1200_v60 = vmul.f32 %v1192_v54, %v1192_v54  ;;  %v1202_v63 = vmul.f32 %v1194_v55, %v1194_v55  ;;  %v1204_v8 = vmul.f32 %v1196_v56, %v1196_v56 }
 0x31a   :  { %v1205_v62 = vadd.f32 %v1199_v58, %v1197_v57  ;;  %v1262_v31 = vrot.slane %v1257_v28, %v3584_v5  ;;  %v1266_v33 = vrot.slane %v1257_v28, %v3589_v10 }
 0x31b   :  { %v1214_v0 = vadd.f32 %v1200_v60, %v1198_v59 }
 0x31c   :  { %v1206_v2 = vadd.f32 %v1205_v62, %v1201_v61 }
 0x31d   :  { %v1215_v9 = vadd.f32 %v1214_v0, %v1202_v63 }
 0x31e   :  { %v1207_v16 = vadd.f32 %v1206_v2, %v1203_v1 }
 0x31f   :  { %v1216_v4 = vadd.f32 %v1215_v9, %v1204_v8 }
 0x320   :  { %v1208_v17 = vrot.slane %v1207_v16, 4 }
 0x321   :  { %v1217_v6 = vrot.slane %v1216_v4, 4 }
 0x322   :  { %v1209_v11 = vadd.f32 %v1208_v17, %v1207_v16 }
 0x323   :  { %v1218_v12 = vadd.f32 %v1217_v6, %v1216_v4 }
 0x324   :  { %v1210_v13 = vrot.slane %v1209_v11, 2 }
 0x325   :  { %v1219_v14 = vrot.slane %v1218_v12, 2 }
 0x326   :  { %v1211_v15 = vadd.f32 %v1210_v13, %v1209_v11 }
 0x327   :  { %v1220_v18 = vadd.f32 %v1219_v14, %v1218_v12  ;;  %v2880_v14 = vld [vmem:[%s3948_s10 + $0xa0] sm:$0xff]  }
 0x328   :  { %v1212_v19 = vrot.slane %v1211_v15, 1 }
 0x329   :  { %v1221_v20 = vrot.slane %v1220_v18, 1 }
 0x32a   :  { %v1213_v21 = vadd.f32 %v1212_v19, %v1211_v15 }
 0x32b   :  { %v1222_v22 = vadd.f32 %v1221_v20, %v1220_v18 }
 0x32c   :  { %v1223_v23 = vmul.f32 0.03125, %v1213_v21  ;;  %v2872_v21 = vld [vmem:[%s3948_s10 + $0x80] sm:$0xff]  }
 0x32d   :  { %v1224_v24 = vmul.f32 0.03125, %v1222_v22 }
 0x32e   :  { %v1225_v25 = vadd.f32 0.001, %v1223_v23 }
 0x32f   :  { %v1226_v26 = vadd.f32 0.001, %v1224_v24 }
 0x330   :  { %2905 = vrsqrt.f32 %v1225_v25 }
 0x331   :  { %2907 = vrsqrt.f32 %v1226_v26  ;;  %v2873_v26 = vld [vmem:[%s3948_s10 + $0xc8] sm:$0xff]  }
 0x33a   :  { %v2906_v30 = vpop.eup %2905 }
 0x33b   :  { %v2908_v34 = vpop.eup %2907  ;;  %v1229_v35 = vmul.f32 %v2906_v30, %v1189_v49  ;;  %v1231_v36 = vmul.f32 %v2906_v30, %v1191_v50  ;;  %v1233_v37 = vmul.f32 %v2906_v30, %v1193_v51  ;;  %v1235_v38 = vmul.f32 %v2906_v30, %v1195_v52 }
 0x33c   :  { %v1230_v39 = vmul.f32 %v2908_v34, %v1190_v53  ;;  %v1232_v7 = vmul.f32 %v2908_v34, %v1192_v54  ;;  %v1234_v40 = vmul.f32 %v2908_v34, %v1194_v55  ;;  %v1236_v41 = vmul.f32 %v2908_v34, %v1196_v56 }
 0x33d   :  { %v1249_v3 = vmul.f32 %v1242_v29, %v1229_v35  ;;  %v1251_v42 = vmul.f32 %v1242_v29, %v1231_v36  ;;  %v1255_v43 = vmul.f32 %v1242_v29, %v1235_v38  ;;  %v1253_v44 = vmul.f32 %v1242_v29, %v1233_v37  ;;  %v2874_v38 = vld [vmem:[%s3948_s10 + $0x88] sm:$0xff]  }
 0x33e   :  { %v1256_v45 = vmul.f32 %v1246_v32, %v1236_v41  ;;  %v1250_v46 = vmul.f32 %v1246_v32, %v1230_v39  ;;  %v1252_v5 = vmul.f32 %v1246_v32, %v1232_v7  ;;  %v1254_v47 = vmul.f32 %v1246_v32, %v1234_v40 }
 0x33f   :  { %v1275_v48 = vadd.f32 %v1262_v31, %v1255_v43  ;;  %v1269_v57 = vadd.f32 %v1262_v31, %v1249_v3  ;;  %v1271_v10 = vadd.f32 %v1262_v31, %v1251_v42  ;;  %v1273_v58 = vadd.f32 %v1262_v31, %v1253_v44  ;;  %v2875_v3 = vld [vmem:[%s3948_s10 + $0xd0] sm:$0xff]  }
 0x340   :  { %v1276_v49 = vadd.f32 %v1266_v33, %v1256_v45  ;;  %v1270_v50 = vadd.f32 %v1266_v33, %v1250_v46  ;;  %v1272_v51 = vadd.f32 %v1266_v33, %v1252_v5  ;;  %v1274_v52 = vadd.f32 %v1266_v33, %v1254_v47 }
 0x341   :  { %v1283_v53 = vmax.f32 %v1275_v48, 0.0  ;;  %v1277_v54 = vmax.f32 %v1269_v57, 0.0  ;;  %v1279_v55 = vmax.f32 %v1271_v10, 0.0  ;;  %v1281_v56 = vmax.f32 %v1273_v58, 0.0 }
 0x342   :  { %v1284_v59 = vmax.f32 %v1276_v49, 0.0  ;;  %v1278_v60 = vmax.f32 %v1270_v50, 0.0  ;;  %v1280_v61 = vmax.f32 %v1272_v51, 0.0  ;;  %v1282_v62 = vmax.f32 %v1274_v52, 0.0  ;;  %v2876_v50 = vld [vmem:[%s3948_s10 + $0x90] sm:$0xff]  }
 0x343   :  { %v3603_v63 = vrot.slane %v1283_v53, 6  ;;  %v1293_v0 = vrot.slane %v1277_v54, 6  ;;  %v3606_v1 = vrot.slane %v1279_v55, 6  ;;  %v3608_v2 = vrot.slane %v1281_v56, 6  ;;  %v2877_v55 = vld [vmem:[%s3948_s10 + $0xd8] sm:$0xff]  }
 0x344   :  { %v3610_v8 = vrot.slane %v1284_v59, 6  ;;  %v1294_v9 = vrot.slane %v1278_v60, 6  ;;  %v3612_v16 = vrot.slane %v1280_v61, 6  ;;  %v1300_v4 = vrot.slane %v1282_v62, 6 }
 0x345   :  { %v3616_v17 = vsel %vm195_vm5, %v1293_v0, %v3606_v1  ;;  %v3621_v6 = vsel %vm195_vm5, %v3608_v2, %v3603_v63  ;;  %v1313_v11 = vsel %vm195_vm5, 0.0, %v1293_v0  ;;  %v1327_v12 = vrot.slane %v3606_v1, 1 }
 0x346   :  { %v1298_v13 = vsel %vm195_vm5, %v1294_v9, %v3612_v16  ;;  %v1322_v15 = vrot.slane %v3616_v17, 1  ;;  %v1350_v18 = vrot.slane %v3616_v17, 2  ;;  %v2357_v19 = vpack.c.bf16 %v3616_v17, %v1293_v0  ;;  %v2878_v17 = vld [vmem:[%s3948_s10 + $0x98] sm:$0xff]  }
 0x347   :  { %v2353_v20 = vpack.c.bf16 %v1298_v13, %v1294_v9  ;;  %v3640_v22 = vsel %vm195_vm5, %v1300_v4, %v3610_v8  ;;  %v2365_v23 = vpack.c.bf16 %v3621_v6, %v3608_v2  ;;  %v1314_v24 = vsel %vm195_vm5, 0.0, %v1294_v9 }
 0x348   :  { %v2361_v25 = vpack.c.bf16 %v3640_v22, %v1300_v4  ;;  %v1324_v27 = vrot.slane %v1314_v24, 1  ;;  %v1325_v28 = vrot.slane %v1298_v13, 1  ;;  %v1329_v29 = vrot.slane %v3612_v16, 1 }
 0x349   :  { %2354 = vmatprep.mubr.msk.bf16.mxu0 %vm3628_vm3, %v2353_v20  ;;  %v1321_v30 = vrot.slane %v1313_v11, 1  ;;  %v3653_v31 = vsel %vm66_vm0, %v1322_v15, %v1327_v12  ;;  %v1316_v32 = vsel %vm195_vm5, 0.0, %v1300_v4  ;;  %v1335_v33 = vrot.slane %v3640_v22, 1  ;;  %v2884_v20 = vld [vmem:[%s3948_s10 + $0xb0] sm:$0xff]  }
 0x34a   :  { %2358 = vmatmul.mubr.msk.bf16.vlgmr.msra.gmra.mrb[4].mxu0 %vm3628_vm3, %v2357_v19  ;;  %v1326_v34 = vsel %vm66_vm0, %v1324_v27, %v1325_v28  ;;  %v1330_v35 = vsel %vm66_vm0, %v1325_v28, %v1329_v29  ;;  %v1334_v36 = vrot.slane %v1316_v32, 1  ;;  %v1339_v37 = vrot.slane %v3610_v8, 1  ;;  %v2883_v19 = vld [vmem:[%s3948_s10 + $0xf0] sm:$0xff]   ;;  %v2893_v29 = vld [vmem:[%s3948_s10 + $0x158] sm:$0xff]  }
 0x34b   :  { %2405 = vmatpush3.bf16.msra.mxu0 %v2872_v21  ;;  %2362 = vmatprep.mubr.msk.bf16.mxu0 %vm3628_vm3, %v2361_v25  ;;  %v1380_v39 = vpack.c.bf16 %v1330_v35, %v1326_v34  ;;  %v3668_v7 = vsel %vm66_vm0, %v1321_v30, %v1322_v15  ;;  %v1315_v40 = vsel %vm195_vm5, 0.0, %v3608_v2  ;;  %v1332_v41 = vrot.slane %v3621_v6, 1  ;;  %v2881_v15 = vld [vmem:[%s3948_s10 + $0xe8] sm:$0xff]   ;;  %v2885_v21 = vld [vmem:[%s3948_s10 + $0xf8] sm:$0xff]   ;;  %v2891_v27 = vld [vmem:[%s3948_s10 + $0x150] sm:$0xff]  }
 0x34c   :  { %2406 = vmatprep.subr.bf16.mxu0 %v2873_v26  ;;  %v1379_v42 = vpack.c.bf16 %v3653_v31, %v3668_v7  ;;  %v1336_v43 = vsel %vm66_vm0, %v1334_v36, %v1335_v33  ;;  %v1340_v44 = vsel %vm66_vm0, %v1335_v33, %v1339_v37  ;;  %v1331_v45 = vrot.slane %v1315_v40, 1  ;;  %v2889_v25 = vld [vmem:[%s3948_s10 + $0x148] sm:$0xff]   ;;  %v2892_v28 = vld [vmem:[%s3948_s10 + $0x110] sm:$0xff]   ;;  %v2894_v30 = vld [vmem:[%s3948_s10 + $0x118] sm:$0xff]  }
 0x34d   :  { %v1386_v46 = vpack.c.bf16 %v1340_v44, %v1336_v43  ;;  %v1337_v5 = vrot.slane %v3603_v63, 1  ;;  %v1352_v47 = vrot.slane %v1314_v24, 2  ;;  %v1353_v48 = vrot.slane %v1298_v13, 2  ;;  %v2888_v24 = vld [vmem:[%s3948_s10 + $0x100] sm:$0xff]   ;;  %v2890_v26 = vld [vmem:[%s3948_s10 + $0x108] sm:$0xff]   ;;  %v2899_v35 = vld [vmem:[%s3948_s10 + $0x170] sm:$0xff]  }
 0x34e   :  { %v3682_v57 = vsel %vm66_vm0, %v1331_v45, %v1332_v41  ;;  %v1357_v10 = vrot.slane %v3612_v16, 2  ;;  %v1349_v58 = vrot.slane %v1313_v11, 2  ;;  %v1355_v49 = vrot.slane %v3606_v1, 2  ;;  %v2895_v31 = vld [vmem:[%s3948_s10 + $0x160] sm:$0xff]   ;;  %v2897_v33 = vld [vmem:[%s3948_s10 + $0x168] sm:$0xff]   ;;  %v2900_v36 = vld [vmem:[%s3948_s10 + $0x130] sm:$0xff]  }
 0x34f   :  { %2407 = vmatpush3.bf16.msra.mxu0 %v2874_v38  ;;  %v1338_v51 = vsel %vm66_vm0, %v1332_v41, %v1337_v5  ;;  %v1354_v52 = vsel %vm103_vm1, %v1352_v47, %v1353_v48  ;;  %v1362_v53 = vrot.slane %v1316_v32, 2  ;;  %v1363_v54 = vrot.slane %v3640_v22, 2  ;;  %v2886_v22 = vld [vmem:[%s3948_s10 + $0xb8] sm:$0xff]   ;;  %v2896_v32 = vld [vmem:[%s3948_s10 + $0x120] sm:$0xff]   ;;  %v2898_v34 = vld [vmem:[%s3948_s10 + $0x128] sm:$0xff]  }
 0x350   :  { %2408 = vmatprep.subr.bf16.mxu0 %v2875_v3  ;;  %v1385_v56 = vpack.c.bf16 %v1338_v51, %v3682_v57  ;;  %v1358_v59 = vsel %vm103_vm1, %v1353_v48, %v1357_v10  ;;  %v3698_v60 = vsel %vm103_vm1, %v1349_v58, %v1350_v18  ;;  %v3701_v61 = vsel %vm103_vm1, %v1350_v18, %v1355_v49  ;;  %v2882_v18 = vld [vmem:[%s3948_s10 + $0xa8] sm:$0xff]   ;;  %v2901_v37 = vld [vmem:[%s3948_s10 + $0x178] sm:$0xff]   ;;  %v2021_v43 = vld [vmem:[%s3953_s15] sm:$0xff] }
 0x351   :  { %v1382_v62 = vpack.c.bf16 %v1358_v59, %v1354_v52  ;;  %v1381_v0 = vpack.c.bf16 %v3701_v61, %v3698_v60  ;;  %v3706_v1 = vsel %vm103_vm1, %v1362_v53, %v1363_v54  ;;  %v1367_v2 = vrot.slane %v3610_v8, 2  ;;  %v2879_v8 = vld [vmem:[%s3948_s10 + $0xe0] sm:$0xff]   ;;  %v2902_v38 = vld [vmem:[%s3948_s10 + $0x138] sm:$0xff]   ;;  %v2022_v44 = vld [vmem:[%s3953_s15 + $0x8] sm:$0xff] }
 0x352   :  { %2366 = vmatmul.mubr.msk.bf16.gmra.mrb[8].mxu0 %vm3628_vm3, %v2365_v23  ;;  %v1359_v9 = vrot.slane %v1315_v40, 2  ;;  %v1360_v16 = vrot.slane %v3621_v6, 2  ;;  %v1365_v4 = vrot.slane %v3603_v63, 2  ;;  %v2887_v23 = vld [vmem:[%s3948_s10 + $0x140] sm:$0xff]   ;;  %v2944_v47 = vmov 0.0|0.0   ;;  %v2023_v58 = vld [vmem:[%s3953_s15 + $0x10] sm:$0xff] }
 0x353   :  { %2409 = vmatpush3.bf16.msra.mxu0 %v2876_v50  ;;  %1861 = vmatprep.mubr.bf16.mxu0 %v1380_v39  ;;  %v1368_v11 = vsel %vm103_vm1, %v1363_v54, %v1367_v2  ;;  %v2024_v49 = vld [vmem:[%s3953_s15 + $0x18] sm:$0xff]  ;;  %v2025_v52 = vld [vmem:[%s3953_s15 + $0x20] sm:$0xff]  ;;  %v2026_v53 = vld [vmem:[%s3953_s15 + $0x28] sm:$0xff]  ;;  %vm2945_vm0 = vmmov 0   ;;  %v2946_v59 = vmov 0.0  }
 0x354   :  { %2410 = vmatprep.subr.bf16.mxu0 %v2877_v55  ;;  %v1388_v12 = vpack.c.bf16 %v1368_v11, %v3706_v1  ;;  %v1361_v13 = vsel %vm103_vm1, %v1359_v9, %v1360_v16  ;;  %v1366_v6 = vsel %vm103_vm1, %v1360_v16, %v1365_v4  ;;  %v2580_v51 = vpack.c.bf16 %v2024_v49, %v2023_v58  ;;  %v2027_v54 = vld [vmem:[%s3953_s15 + $0x30] sm:$0xff]  ;;  %v2029_v61 = vld [vmem:[%s3953_s15 + $0x40] sm:$0xff]  ;;  %v2032_v2 = vld [vmem:[%s3953_s15 + $0x58] sm:$0xff] }
 0x355   :  { %v1387_v63 = vpack.c.bf16 %v1366_v6, %v1361_v13  ;;  %v2583_v55 = vpack.c.bf16 %v2026_v53, %v2025_v52  ;;  %v2031_v1 = vld [vmem:[%s3953_s15 + $0x50] sm:$0xff]  ;;  %v2033_v16 = vld [vmem:[%s3953_s15 + $0x60] sm:$0xff]  ;;  %v2034_v4 = vld [vmem:[%s3953_s15 + $0x68] sm:$0xff]  ;;  %vm2039_vm1 = vcmask 1041409  }
 0x356   :  { %v2592_v9 = vpack.c.bf16 %v2032_v2, %v2031_v1  ;;  %v2302_v11 = vld [vmem:[%s3949_s11] ss:$0 sm:$0xff] }
 0x357   :  { %2411 = vmatpush3.bf16.msra.mxu0 %v2878_v17  ;;  %v2595_v17 = vpack.c.bf16 %v2034_v4, %v2033_v16 }
 0x358   :  { %2412 = vmatprep.subr.bf16.mxu0 %v2879_v8  ;;  %v2035_v8 = vld [vmem:[%s3953_s15 + $0x70] sm:$0xff] }
 0x35b   :  { %2413 = vmatpush3.bf16.msra.mxu0 %v2880_v14 }
 0x35c   :  { %2414 = vmatprep.subr.bf16.mxu0 %v2881_v15 }
 0x35f   :  { %2415 = vmatpush3.bf16.msra.mxu0 %v2882_v18 }
 0x360   :  { %2416 = vmatprep.subr.bf16.mxu0 %v2883_v19 }
 0x363   :  { %2417 = vmatpush3.bf16.msra.mxu0 %v2884_v20 }
 0x364   :  { %2418 = vmatprep.subr.bf16.mxu0 %v2885_v21 }
 0x367   :  { %2419 = vmatpush3.bf16.msra.mxu0 %v2886_v22 }
 0x368   :  { %2432 = vmatprep.subr.bf16.mxu0 %v2887_v23 }
 0x36a   :  { %1862 = vmatmul.mubr.bf16.vlgmr.msra.gmra.mrb[12].mxu0 %v1379_v42 }
 0x36b   :  { %1869 = vmatprep.mubr.bf16.mxu0 %v1386_v46  ;;  %2433 = vmatpush3.bf16.msra.mxu0 %v2888_v24  ;;  %v2577_v46 = vpack.c.bf16 %v2022_v44, %v2021_v43 }
 0x36c   :  { %2434 = vmatprep.subr.bf16.mxu0 %v2889_v25 }
 0x36f   :  { %2435 = vmatpush3.bf16.msra.mxu0 %v2890_v26 }
 0x370   :  { %2436 = vmatprep.subr.bf16.mxu0 %v2891_v27 }
 0x372   :  { %1870 = vmatmul.mubr.bf16.gmra.mrb[16].mxu0 %v1385_v56  ;;  %v2028_v56 = vld [vmem:[%s3953_s15 + $0x38] sm:$0xff] }
 0x373   :  { %2437 = vmatpush3.bf16.msra.mxu0 %v2892_v28  ;;  %1910 = vmatprep.mubr.bf16.mxu0 %v1382_v62  ;;  %v2586_v60 = vpack.c.bf16 %v2028_v56, %v2027_v54  ;;  %v2030_v62 = vld [vmem:[%s3953_s15 + $0x48] sm:$0xff] }
 0x374   :  { %2438 = vmatprep.subr.bf16.mxu0 %v2893_v29 }
 0x377   :  { %2439 = vmatpush3.bf16.msra.mxu0 %v2894_v30 }
 0x378   :  { %2440 = vmatprep.subr.bf16.mxu0 %v2895_v31 }
 0x37b   :  { %2441 = vmatpush3.bf16.msra.mxu0 %v2896_v32 }
 0x37c   :  { %2442 = vmatprep.subr.bf16.mxu0 %v2897_v33 }
 0x37f   :  { %2443 = vmatpush3.bf16.msra.mxu0 %v2898_v34 }
 0x380   :  { %2444 = vmatprep.subr.bf16.mxu0 %v2899_v35 }
 0x383   :  { %2445 = vmatpush3.bf16.msra.mxu0 %v2900_v36 }
 0x384   :  { %2446 = vmatprep.subr.bf16.mxu0 %v2901_v37 }
 0x387   :  { %2447 = vmatpush3.bf16.msra.mxu0 %v2902_v38 }
 0x388   :  { %2576 = vmatprep.subr.bf16.mxu0 %v2944_v47 }
 0x38a   :  { %1911 = vmatmul.mubr.bf16.vlgmr.msra.gmra.mrb[20].mxu0 %v1381_v0  ;;  %v2589_v0 = vpack.c.bf16 %v2030_v62, %v2029_v61 }
 0x38b   :  { %1918 = vmatprep.mubr.bf16.mxu0 %v1388_v12  ;;  %2578 = vmatpush3.bf16.msra.mxu0 %v2577_v46  ;;  %v2036_v12 = vld [vmem:[%s3953_s15 + $0x78] sm:$0xff] }
 0x38c   :  { %2579 = vmatprep.subr.bf16.mxu0 %v2944_v47  ;;  %v2598_v18 = vpack.c.bf16 %v2036_v12, %v2035_v8 }
 0x38f   :  { %2581 = vmatpush3.bf16.msra.mxu0 %v2580_v51 }
 0x390   :  { %2582 = vmatprep.subr.bf16.mxu0 %v2944_v47 }
 0x392   :  { %1919 = vmatmul.mubr.bf16.gmra.mrb[24].mxu0 %v1387_v63 }
 0x393   :  { %2538 = vmatprep.mubr.msk.f32.mxu0 %vm2945_vm0, %v2946_v59  ;;  %2584 = vmatpush3.bf16.msra.mxu0 %v2583_v55 }
 0x394   :  { %2585 = vmatprep.subr.bf16.mxu0 %v2944_v47 }
 0x397   :  { %2587 = vmatpush3.bf16.msra.mxu0 %v2586_v60 }
 0x398   :  { %2588 = vmatprep.subr.bf16.mxu0 %v2944_v47 }
 0x39b   :  { %2590 = vmatpush3.bf16.msra.mxu0 %v2589_v0 }
 0x39c   :  { %2591 = vmatprep.subr.bf16.mxu0 %v2944_v47 }
 0x39f   :  { %2593 = vmatpush3.bf16.msra.mxu0 %v2592_v9 }
 0x3a0   :  { %2594 = vmatprep.subr.bf16.mxu0 %v2944_v47 }
 0x3a3   :  { %2596 = vmatpush3.bf16.msra.mxu0 %v2595_v17 }
 0x3a4   :  { %2597 = vmatprep.subr.bf16.mxu0 %v2944_v47 }
 0x3a7   :  { %2599 = vmatpush3.bf16.msra.mxu0 %v2598_v18  ;;  %v2367_v18 = vld [vmem:[%s3950_s12] ss:$0 sm:$0xff] }
 0x3a8   :  { %2600 = vmatprep.subr.bf16.mxu0 %v2944_v47 }
 0x41d   :  { %v2392_v39 = vpop.f32.mrb[4].mxu0 }
 0x41e   :  { %v2393_v7 = vpop.f32.mrb[5].mxu0 }
 0x41f   :  { %v2394_v40 = vadd.f32 %v2393_v7, %v2392_v39  ;;  %v2395_v41 = vpop.f32.mrb[6].mxu0 }
 0x420   :  { %v2396_v3 = vpop.f32.mrb[7].mxu0 }
 0x421   :  { %v2397_v42 = vadd.f32 %v2396_v3, %v2395_v41  ;;  %v1815_v63 = vadd.f32 %v2394_v40, %v2302_v11 }
 0x423   :  { %v1818_v20 = vadd.f32 %v2397_v42, %v2302_v11 }
 0x425   :  { %v2398_v45 = vpop.f32.mrb[8].mxu0 }
 0x426   :  { %v2399_v5 = vpop.f32.mrb[9].mxu0 }
 0x427   :  { %v2400_v48 = vadd.f32 %v2399_v5, %v2398_v45  ;;  %v2401_v57 = vpop.f32.mrb[10].mxu0 }
 0x428   :  { %v2402_v10 = vpop.f32.mrb[11].mxu0 }
 0x429   :  { %v2403_v50 = vadd.f32 %v2402_v10, %v2401_v57  ;;  %v1823_v26 = vadd.f32 %v2400_v48, %v2302_v11 }
 0x42b   :  { %v1826_v30 = vadd.f32 %v2403_v50, %v2302_v11 }
 0x43d   :  { %v2420_v13 = vpop.f32.mrb[12].mxu0 }
 0x43e   :  { %v2421_v6 = vpop.f32.mrb[13].mxu0 }
 0x43f   :  { %v2422_v14 = vadd.f32 %v2421_v6, %v2420_v13  ;;  %v2423_v15 = vpop.f32.mrb[14].mxu0 }
 0x440   :  { %v2424_v19 = vpop.f32.mrb[15].mxu0 }
 0x441   :  { %v1864_v21 = vadd.f32 %v2422_v14, %v1815_v63  ;;  %v2425_v22 = vadd.f32 %v2424_v19, %v2423_v15 }
 0x443   :  { %v1867_v23 = vadd.f32 %v2425_v22, %v1818_v20 }
 0x445   :  { %v2426_v24 = vpop.f32.mrb[16].mxu0 }
 0x446   :  { %v2427_v25 = vpop.f32.mrb[17].mxu0 }
 0x447   :  { %v2428_v27 = vadd.f32 %v2427_v25, %v2426_v24  ;;  %v2429_v28 = vpop.f32.mrb[18].mxu0 }
 0x448   :  { %v2430_v29 = vpop.f32.mrb[19].mxu0 }
 0x449   :  { %v1872_v31 = vadd.f32 %v2428_v27, %v1823_v26  ;;  %v2431_v32 = vadd.f32 %v2430_v29, %v2429_v28 }
 0x44b   :  { %v1875_v33 = vadd.f32 %v2431_v32, %v1826_v30 }
 0x45d   :  { %v2448_v34 = vpop.f32.mrb[20].mxu0 }
 0x45e   :  { %v2449_v35 = vpop.f32.mrb[21].mxu0 }
 0x45f   :  { %v2450_v36 = vadd.f32 %v2449_v35, %v2448_v34  ;;  %v2451_v37 = vpop.f32.mrb[22].mxu0 }
 0x460   :  { %v2452_v38 = vpop.f32.mrb[23].mxu0 }
 0x461   :  { %v1913_v39 = vadd.f32 %v2450_v36, %v1864_v21  ;;  %v2453_v7 = vadd.f32 %v2452_v38, %v2451_v37 }
 0x463   :  { %v1916_v40 = vadd.f32 %v2453_v7, %v1867_v23  ;;  %v2368_v23 = vld [vmem:[%s3951_s13] ss:$0 sm:$0xff] }
 0x465   :  { %v1927_v41 = vadd.f32 %v1916_v40, %v1913_v39  ;;  %v2454_v3 = vpop.f32.mrb[24].mxu0 }
 0x466   :  { %v2455_v42 = vpop.f32.mrb[25].mxu0 }
 0x467   :  { %v2456_v43 = vadd.f32 %v2455_v42, %v2454_v3  ;;  %v2457_v44 = vpop.f32.mrb[26].mxu0 }
 0x468   :  { %v2458_v45 = vpop.f32.mrb[27].mxu0 }
 0x469   :  { %v1921_v46 = vadd.f32 %v2456_v43, %v1872_v31  ;;  %v2459_v5 = vadd.f32 %v2458_v45, %v2457_v44 }
 0x46b   :  { %v1928_v48 = vadd.f32 %v1927_v41, %v1921_v46  ;;  %v1924_v57 = vadd.f32 %v2459_v5, %v1875_v33  ;;  %v2006_v5 = vld [vmem:[%s3952_s14 + $0x8] sm:$0xff] }
 0x46d   :  { %v1929_v10 = vadd.f32 %v1928_v48, %v1924_v57 }
 0x46f   :  { %v1930_v58 = vrot.slane %v1929_v10, 4 }
 0x471   :  { %v1931_v49 = vadd.f32 %v1930_v58, %v1929_v10 }
 0x473   :  { %v1932_v50 = vrot.slane %v1931_v49, 2 }
 0x475   :  { %v1933_v51 = vadd.f32 %v1932_v50, %v1931_v49  ;;  %v2007_v50 = vld [vmem:[%s3952_s14 + $0x10] sm:$0xff] }
 0x477   :  { %v1934_v52 = vrot.slane %v1933_v51, 1 }
 0x479   :  { %v1935_v53 = vadd.f32 %v1934_v52, %v1933_v51  ;;  %v2008_v51 = vld [vmem:[%s3952_s14 + $0x18] sm:$0xff] }
 0x47b   :  { %v1936_v54 = vmul.f32 0.03125, %v1935_v53  ;;  %v2604_v53 = vpack.c.bf16 %v2008_v51, %v2007_v50 }
 0x47d   :  { %v1937_v55 = vsub.f32 %v1913_v39, %v1936_v54  ;;  %v1938_v56 = vsub.f32 %v1916_v40, %v1936_v54  ;;  %v1939_v60 = vsub.f32 %v1921_v46, %v1936_v54  ;;  %v1940_v61 = vsub.f32 %v1924_v57, %v1936_v54  ;;  %v2005_v46 = vld [vmem:[%s3952_s14] sm:$0xff] }
 0x47e   :  { %v2601_v49 = vpack.c.bf16 %v2006_v5, %v2005_v46  ;;  %v2009_v54 = vld [vmem:[%s3952_s14 + $0x20] sm:$0xff] }
 0x47f   :  { %v1941_v62 = vmul.f32 %v1937_v55, %v1937_v55  ;;  %v1942_v0 = vmul.f32 %v1938_v56, %v1938_v56  ;;  %v1943_v1 = vmul.f32 %v1939_v60, %v1939_v60  ;;  %v1944_v9 = vmul.f32 %v1940_v61, %v1940_v61 }
 0x481   :  { %v1945_v2 = vadd.f32 %v1942_v0, %v1941_v62  ;;  %v2013_v62 = vld [vmem:[%s3952_s14 + $0x40] sm:$0xff]  ;;  %v2014_v0 = vld [vmem:[%s3952_s14 + $0x48] sm:$0xff] }
 0x483   :  { %v1946_v16 = vadd.f32 %v1945_v2, %v1943_v1  ;;  %v2613_v1 = vpack.c.bf16 %v2014_v0, %v2013_v62  ;;  %v2015_v2 = vld [vmem:[%s3952_s14 + $0x50] sm:$0xff] }
 0x485   :  { %v1947_v4 = vadd.f32 %v1946_v16, %v1944_v9  ;;  %v2016_v9 = vld [vmem:[%s3952_s14 + $0x58] sm:$0xff] }
 0x486   :  { %v2616_v16 = vpack.c.bf16 %v2016_v9, %v2015_v2 }
 0x487   :  { %v1948_v17 = vrot.slane %v1947_v4, 4 }
 0x489   :  { %v1949_v11 = vadd.f32 %v1948_v17, %v1947_v4  ;;  %v2017_v4 = vld [vmem:[%s3952_s14 + $0x60] sm:$0xff]  ;;  %v2018_v17 = vld [vmem:[%s3952_s14 + $0x68] sm:$0xff] }
 0x48b   :  { %v1950_v8 = vrot.slane %v1949_v11, 2 }
 0x48d   :  { %v1951_v12 = vadd.f32 %v1950_v8, %v1949_v11  ;;  %v2619_v11 = vpack.c.bf16 %v2018_v17, %v2017_v4  ;;  %v2019_v8 = vld [vmem:[%s3952_s14 + $0x70] sm:$0xff] }
 0x48f   :  { %v1952_v13 = vrot.slane %v1951_v12, 1 }
 0x491   :  { %v1953_v6 = vadd.f32 %v1952_v13, %v1951_v12  ;;  %v2020_v12 = vld [vmem:[%s3952_s14 + $0x78] sm:$0xff] }
 0x492   :  { %v2622_v13 = vpack.c.bf16 %v2020_v12, %v2019_v8 }
 0x493   :  { %v1954_v63 = vmul.f32 0.03125, %v1953_v6  ;;  %v2004_v6 = vld [vmem:[%s3964_s25] sm:$0x3] }
 0x495   :  { %v1955_v14 = vadd.f32 0.001, %v1954_v63 }
 0x497   :  { %2909 = vrsqrt.f32 %v1955_v14 }
 0x4a1   :  { %v2910_v15 = vpop.eup %2909 }
 0x4a2   :  { %v1957_v19 = vmul.f32 %v2910_v15, %v1937_v55  ;;  %v1958_v20 = vmul.f32 %v2910_v15, %v1938_v56  ;;  %v1959_v21 = vmul.f32 %v2910_v15, %v1939_v60  ;;  %v1960_v22 = vmul.f32 %v2910_v15, %v1940_v61  ;;  %v2010_v55 = vld [vmem:[%s3952_s14 + $0x28] sm:$0xff]  ;;  %v2011_v60 = vld [vmem:[%s3952_s14 + $0x30] sm:$0xff] }
 0x4a3   :  { %v2607_v56 = vpack.c.bf16 %v2010_v55, %v2009_v54 }
 0x4a4   :  { %v1968_v24 = vmul.f32 %v2367_v18, %v1957_v19  ;;  %v1969_v25 = vmul.f32 %v2367_v18, %v1958_v20  ;;  %v1970_v26 = vmul.f32 %v2367_v18, %v1959_v21  ;;  %v1971_v27 = vmul.f32 %v2367_v18, %v1960_v22  ;;  %v2369_v18 = vld [vmem:[%s3954_s16] ss:$0 sm:$0xff] }
 0x4a6   :  { %v1979_v28 = vadd.f32 %v2368_v23, %v1968_v24  ;;  %v1980_v29 = vadd.f32 %v2368_v23, %v1969_v25  ;;  %v1981_v30 = vadd.f32 %v2368_v23, %v1970_v26  ;;  %v1982_v31 = vadd.f32 %v2368_v23, %v1971_v27 }
 0x4a8   :  { %v1985_v32 = vmax.f32 %v1981_v30, 0.0  ;;  %v1986_v33 = vmax.f32 %v1982_v31, 0.0  ;;  %v1983_v34 = vmax.f32 %v1979_v28, 0.0  ;;  %v1984_v35 = vmax.f32 %v1980_v29, 0.0 }
 0x4aa   :  { %v1994_v36 = vadd.f32 %v1986_v33, %v1985_v32  ;;  %v1987_v37 = vadd.f32 %v1984_v35, %v1983_v34 }
 0x4ac   :  { %v1995_v38 = vrot.slane %v1994_v36, 4  ;;  %v1988_v39 = vrot.slane %v1987_v37, 4 }
 0x4ae   :  { %v1989_v7 = vadd.f32 %v1988_v39, %v1987_v37  ;;  %v1996_v40 = vadd.f32 %v1995_v38, %v1994_v36 }
 0x4b0   :  { %v1990_v41 = vrot.slane %v1989_v7, 2  ;;  %v1997_v3 = vrot.slane %v1996_v40, 2 }
 0x4b2   :  { %v1991_v42 = vadd.f32 %v1990_v41, %v1989_v7  ;;  %v1998_v43 = vadd.f32 %v1997_v3, %v1996_v40 }
 0x4b4   :  { %v1992_v44 = vrot.slane %v1991_v42, 1  ;;  %v1999_v45 = vrot.slane %v1998_v43, 1 }
 0x4b6   :  { %v1993_v48 = vadd.f32 %v1992_v44, %v1991_v42  ;;  %v2000_v57 = vadd.f32 %v1999_v45, %v1998_v43 }
 0x4b8   :  { %v2002_v10 = vmul.f32 0.0625, %v1993_v48  ;;  %v2003_v58 = vmul.f32 0.0625, %v2000_v57 }
 0x4ba   :  { %v2040_v52 = vsel %vm2039_vm1, %v2003_v58, %v2002_v10 }
 0x4bb   :  { %2539 = vmatmul.mubr.f32.vlgmr.msra.gmra.mrb[28].mxu0 %v2040_v52 }
 0x4bc   :  { %2602 = vmatpush3.bf16.msra.mxu0 %v2601_v49  ;;  %2573 = vmatprep.mubr.msk.f32.mxu0 %vm2945_vm0, %v2946_v59  ;;  %v2012_v59 = vld [vmem:[%s3952_s14 + $0x38] sm:$0xff]  ;;  %s2911_s14 = scalar_lea.vmem %s2198_s29, 32 }
 0x4bd   :  { %2603 = vmatprep.subr.bf16.mxu0 %v2944_v47  ;;  %v2610_v61 = vpack.c.bf16 %v2012_v59, %v2011_v60  ;;  %p2912_p0 = scmp.ne.s32.totalorder %s2198_s29, %s2911_s14  ;;  %p2917_p2 = scmp.lt.s32.totalorder %s2911_s14, %s2911_s14 }
 0x4bf   :  { %p2918_p3 = por %p2917_p2, %p2916_p1 }
 0x4c0   :  { %2605 = vmatpush3.bf16.msra.mxu0 %v2604_v53 }
 0x4c1   :  { %2606 = vmatprep.subr.bf16.mxu0 %v2944_v47  ;;  %p2919_p4 = pnand %p2918_p3, %p2912_p0 }
 0x4c4   :  { %2608 = vmatpush3.bf16.msra.mxu0 %v2607_v56 }
 0x4c5   :  { %2609 = vmatprep.subr.bf16.mxu0 %v2944_v47 }
 0x4c8   :  { %2611 = vmatpush3.bf16.msra.mxu0 %v2610_v61 }
 0x4c9   :  { %2612 = vmatprep.subr.bf16.mxu0 %v2944_v47 }
 0x4cc   :  { %2614 = vmatpush3.bf16.msra.mxu0 %v2613_v1 }
 0x4cd   :  { %2615 = vmatprep.subr.bf16.mxu0 %v2944_v47 }
 0x4d0   :  { %2617 = vmatpush3.bf16.msra.mxu0 %v2616_v16 }
 0x4d1   :  { %2618 = vmatprep.subr.bf16.mxu0 %v2944_v47 }
 0x4d4   :  { %2620 = vmatpush3.bf16.msra.mxu0 %v2619_v11 }
 0x4d5   :  { %2621 = vmatprep.subr.bf16.mxu0 %v2944_v47 }
 0x4d8   :  { %2623 = vmatpush3.bf16.msra.mxu0 %v2622_v13 }
 0x4db   :  { %2574 = vmatmul.mubr.f32.vlgmr.msra.gmra.mrb[30].mxu0 %v2004_v6 }
 0x58e   :  { %v2108_v63 = vpop.f32.mrb[28].mxu0 }
 0x58f   :  { %v2540_v14 = vpop.f32.mrb[29].mxu0 }
 0x5ae   :  { %v2178_v15 = vpop.f32.mrb[30].mxu0 }
 0x5af   :  { %v2179_v19 = vadd.f32 %v2178_v15, %v2108_v63  ;;  %v2575_v20 = vpop.f32.mrb[31].mxu0 }
 0x5b1   :  { %v2189_v21 = vadd.f32 %v2369_v18, %v2179_v19 }
 0x5b3   :  { %2190 = vst [vmem:[#allocation2] sm:$0x3] %v2189_v21 }
 0x5b4   :  { %2922 = shalt.err (!%p2919_p4)
}
 0x5b5   :  { %s2923_s30 = scalar_lea.hbm %s3955_s17, 32 }
 0x5b6   :  { %p2924_p5 = scmp.ne.s32.totalorder %s3955_s17, %s2923_s30  ;;  %p2927_p6 = scmp.lt.u32.totalorder %s2923_s30, %s3955_s17 }
 0x5b8   :  { %p2929_p7 = pnand %p2927_p6, %p2924_p5 }
 0x5ba   :  { %2932 = shalt.err (!%p2929_p7)
}
 0x5bb   :  { %2200 = dma.vmem_to_hbm [thread:$0]  %s2198_s29, 32, %s3955_s17, [#allocation3]  }
 0x5bc   :  { %2933 = dma.done.wait [#allocation3], 32  }
 0x5bd   :  { %2934 = vsyncadd [#allocation3], 4294967264 }
 0x5be   :  { %2204 = vsyncpa [#allocation3], 1 }

// kernel: lstm_fcn_forward.2
= control target key start
LH: loop header
LB: loop body
LE: loop exit
PB: predicated region body
PF: predicated region fallthrough
CT: control target
= control target key end

     0   :  { %vm101_vm0 = vcmask 1043456   ;;  %v8227_v2 = vmov 0   ;;  %vm76_vm1 = vcmask 64512   ;;  %s8222_s1 = inlined_call_operand.vmem [shape: bf16[8,512], index: 1, kind: input, shape index: {}]   ;;  %s8223_s0 = inlined_call_operand.vmem [shape: f32[16,8,8], index: 0, kind: input, shape index: {}]   ;;  %s8224_s2 = inlined_call_operand.vmem [shape: bf16[128,512], index: 2, kind: input, shape index: {}]   ;;  %s8225_s3 = inlined_call_operand.vmem [shape: f32[1,512], index: 3, kind: input, shape index: {}]   ;;  %s8226_s4 = inlined_call_operand.vmem [shape: f32[8,128], index: 4, kind: output, shape index: {}]  }
   0x1   :  { %v42_v0 = vld [vmem:[%s8222_s1] sm:$0xff]  ;;  %v43_v1 = vld [vmem:[%s8222_s1 + $0x8] sm:$0xff]  ;;  %146 = vmatprep.mubr.bf16.mxu0 %v8227_v2  ;;  %259 = vmatprep.mubr.bf16.mxu1 %v8227_v2  ;;  %v20_v15 = vld [vmem:[%s8223_s0 + $0x10] sm:$0xff] }
   0x2   :  { %v18_v3 = vld [vmem:[%s8223_s0] sm:$0xff]  ;;  %v5452_v4 = vcombine.high %v42_v0, %v42_v0  ;;  %v5454_v5 = vcombine.high %v43_v1, %v43_v1  ;;  %v5451_v6 = vcombine.low %v42_v0, %v42_v0  ;;  %v5453_v7 = vcombine.low %v43_v1, %v43_v1  ;;  %v19_v8 = vld [vmem:[%s8223_s0 + $0x8] sm:$0xff]  ;;  %v21_v17 = vld [vmem:[%s8223_s0 + $0x18] sm:$0xff] }
   0x3   :  { %v6579_v9 = vld [vmem:[%s8224_s2 + $0x4] ss:$16 sps:$4 sm:$0xff]   ;;  %v34_v12 = vpack.c.bf16 %v19_v8, %v18_v3  ;;  %v6584_v13 = vld [vmem:[%s8224_s2] ss:$16 sps:$4 sm:$0xff]   ;;  %v6598_v16 = vld [vmem:[%s8224_s2 + $0xc] ss:$16 sps:$4 sm:$0xff]   ;;  %v35_v22 = vpack.c.bf16 %v21_v17, %v20_v15  ;;  %v46_v3 = vlaneseq }
   0x4   :  { %5455 = vmatprep.subr.msk.bf16.mxu0 %vm101_vm0, %v5452_v4  ;;  %5464 = vmatprep.subr.msk.bf16.mxu1 %vm101_vm0, %v5454_v5  ;;  %v103_v10 = vsel %vm101_vm0, %v5451_v6, 0  ;;  %v109_v11 = vsel %vm101_vm0, %v5453_v7, 0  ;;  %v6590_v14 = vld [vmem:[%s8224_s2 + $0x24] ss:$16 sps:$4 sm:$0xff]   ;;  %v6608_v18 = vld [vmem:[%s8224_s2 + $0x8] ss:$16 sps:$4 sm:$0xff]  }
   0x5   :  { %115 = vmatpush1.bf16.msra.mxu0 %v103_v10  ;;  %228 = vmatpush1.bf16.msra.mxu1 %v109_v11  ;;  %v6615_v19 = vld [vmem:[%s8224_s2 + $0x20] ss:$16 sps:$4 sm:$0xff]   ;;  %v6622_v20 = vld [vmem:[%s8224_s2 + $0x44] ss:$16 sps:$4 sm:$0xff]   ;;  %v6627_v21 = vld [vmem:[%s8224_s2 + $0x2c] ss:$16 sps:$4 sm:$0xff]  }
   0x6   :  { %607 = vmatprep.subr.bf16.mxu0 %v6579_v9  ;;  %648 = vmatprep.subr.bf16.mxu1 %v6598_v16  ;;  %v6635_v23 = vld [vmem:[%s8224_s2 + $0x40] ss:$16 sps:$4 sm:$0xff]   ;;  %v6642_v24 = vld [vmem:[%s8224_s2 + $0x28] ss:$16 sps:$4 sm:$0xff]   ;;  %v6647_v25 = vld [vmem:[%s8224_s2 + $0x64] ss:$16 sps:$4 sm:$0xff]  }
   0x7   :  { %v6652_v26 = vld [vmem:[%s8224_s2 + $0x4c] ss:$16 sps:$4 sm:$0xff]   ;;  %v22_v27 = vld [vmem:[%s8223_s0 + $0x20] sm:$0xff]  ;;  %v6674_v30 = vld [vmem:[%s8224_s2 + $0x48] ss:$16 sps:$4 sm:$0xff]   ;;  %v6536_v1 = vmov 0.0|0.0  }
   0x8   :  { %5456 = vmatmul.mubr.msk.bf16.vlgmr.msra.gmra.mrb[0].mxu0 %vm76_vm1, %v34_v12  ;;  %5465 = vmatmul.mubr.msk.bf16.vlgmr.msra.gmra.mrb[0].mxu1 %vm76_vm1, %v34_v12  ;;  %v23_v28 = vld [vmem:[%s8223_s0 + $0x28] sm:$0xff]  ;;  %v6667_v29 = vld [vmem:[%s8224_s2 + $0x60] ss:$16 sps:$4 sm:$0xff]   ;;  %v6679_v31 = vld [vmem:[%s8224_s2 + $0x84] ss:$16 sps:$4 sm:$0xff]   ;;  %v47_v4 = vshrl.u32 %v46_v3, 7 }
   0x9   :  { %608 = vmatpush1.bf16.msra.mxu0 %v6584_v13  ;;  %156 = vmatprep.mubr.bf16.mxu0 %v8227_v2  ;;  %v6686_v32 = vld [vmem:[%s8224_s2 + $0x6c] ss:$16 sps:$4 sm:$0xff]   ;;  %v36_v33 = vpack.c.bf16 %v23_v28, %v22_v27  ;;  %v6691_v34 = vld [vmem:[%s8224_s2 + $0x80] ss:$16 sps:$4 sm:$0xff]   ;;  %v6698_v35 = vld [vmem:[%s8224_s2 + $0x68] ss:$16 sps:$4 sm:$0xff]  }
   0xa   :  { %269 = vmatprep.mubr.bf16.mxu1 %v8227_v2  ;;  %609 = vmatprep.subr.bf16.mxu0 %v6590_v14  ;;  %v6705_v36 = vld [vmem:[%s8224_s2 + $0xa4] ss:$16 sps:$4 sm:$0xff]   ;;  %v6710_v37 = vld [vmem:[%s8224_s2 + $0x8c] ss:$16 sps:$4 sm:$0xff]   ;;  %v6725_v40 = vld [vmem:[%s8224_s2 + $0xa0] ss:$16 sps:$4 sm:$0xff]  }
   0xb   :  { %649 = vmatpush1.bf16.msra.mxu1 %v6608_v18  ;;  %v24_v38 = vld [vmem:[%s8223_s0 + $0x30] sm:$0xff]  ;;  %v25_v39 = vld [vmem:[%s8223_s0 + $0x38] sm:$0xff]  ;;  %v26_v49 = vld [vmem:[%s8223_s0 + $0x40] sm:$0xff]  ;;  %v56_v5 = vsub.s32 2, %v47_v4  ;;  %v60_v6 = vsub.s32 3, %v47_v4  ;;  %v48_v7 = vsub.s32 0, %v47_v4 }
   0xc   :  { %650 = vmatprep.subr.bf16.mxu1 %v6627_v21  ;;  %v6732_v41 = vld [vmem:[%s8224_s2 + $0x88] ss:$16 sps:$4 sm:$0xff]   ;;  %v6737_v42 = vld [vmem:[%s8224_s2 + $0xc4] ss:$16 sps:$4 sm:$0xff]   ;;  %v6744_v43 = vld [vmem:[%s8224_s2 + $0xac] ss:$16 sps:$4 sm:$0xff]   ;;  %v37_v44 = vpack.c.bf16 %v25_v39, %v24_v38 }
   0xd   :  { %610 = vmatpush1.bf16.msra.mxu0 %v6615_v19  ;;  %v6749_v45 = vld [vmem:[%s8224_s2 + $0xc0] ss:$16 sps:$4 sm:$0xff]   ;;  %v6754_v46 = vld [vmem:[%s8224_s2 + $0xa8] ss:$16 sps:$4 sm:$0xff]   ;;  %v6759_v47 = vld [vmem:[%s8224_s2 + $0xe4] ss:$16 sps:$4 sm:$0xff]  }
   0xe   :  { %611 = vmatprep.subr.bf16.mxu0 %v6622_v20  ;;  %v6764_v48 = vld [vmem:[%s8224_s2 + $0xcc] ss:$16 sps:$4 sm:$0xff]   ;;  %v6781_v51 = vld [vmem:[%s8224_s2 + $0xe0] ss:$16 sps:$4 sm:$0xff]   ;;  %v6786_v52 = vld [vmem:[%s8224_s2 + $0xc8] ss:$16 sps:$4 sm:$0xff]  }
   0xf   :  { %651 = vmatpush1.bf16.msra.mxu1 %v6642_v24  ;;  %v27_v50 = vld [vmem:[%s8223_s0 + $0x48] sm:$0xff]  ;;  %v28_v56 = vld [vmem:[%s8223_s0 + $0x50] sm:$0xff]  ;;  %v29_v57 = vld [vmem:[%s8223_s0 + $0x58] sm:$0xff]  ;;  %v52_v10 = vsub.s32 1, %v47_v4 }
  0x10   :  { %5457 = vmatmul.mubr.msk.bf16.gmra.mrb[4].mxu0 %vm76_vm1, %v35_v22  ;;  %5466 = vmatmul.mubr.msk.bf16.gmra.mrb[4].mxu1 %vm76_vm1, %v35_v22  ;;  %v6793_v53 = vld [vmem:[%s8224_s2 + $0xec] ss:$16 sps:$4 sm:$0xff]   ;;  %v38_v54 = vpack.c.bf16 %v27_v50, %v26_v49  ;;  %v6802_v55 = vld [vmem:[%s8224_s2 + $0xe8] ss:$16 sps:$4 sm:$0xff]   ;;  %v39_v58 = vpack.c.bf16 %v29_v57, %v28_v56  ;;  %v30_v59 = vld [vmem:[%s8223_s0 + $0x60] sm:$0xff] }
  0x11   :  { %166 = vmatprep.mubr.bf16.mxu0 %v8227_v2  ;;  %279 = vmatprep.mubr.bf16.mxu1 %v8227_v2  ;;  %v31_v60 = vld [vmem:[%s8223_s0 + $0x68] sm:$0xff]  ;;  %v32_v62 = vld [vmem:[%s8223_s0 + $0x70] sm:$0xff]  ;;  %v33_v63 = vld [vmem:[%s8223_s0 + $0x78] sm:$0xff] }
  0x12   :  { %612 = vmatpush1.bf16.msra.mxu0 %v6635_v23  ;;  %652 = vmatprep.subr.bf16.mxu1 %v6652_v26  ;;  %v40_v61 = vpack.c.bf16 %v31_v60, %v30_v59  ;;  %v41_v0 = vpack.c.bf16 %v33_v63, %v32_v62  ;;  %v44_v8 = vld [vmem:[%s8225_s3] sm:$0xf] }
  0x13   :  { %613 = vmatprep.subr.bf16.mxu0 %v6647_v25  ;;  %653 = vmatpush1.bf16.msra.mxu1 %v6674_v30  ;;  %v6881_v11 = vrot.slane %v44_v8, %v56_v5  ;;  %v6887_v17 = vrot.slane %v44_v8, %v60_v6  ;;  %v6895_v27 = vrot.slane %v44_v8, %v52_v10 }
  0x14   :  { %654 = vmatprep.subr.bf16.mxu1 %v6686_v32 }
  0x16   :  { %614 = vmatpush1.bf16.msra.mxu0 %v6667_v29 }
  0x17   :  { %615 = vmatprep.subr.bf16.mxu0 %v6679_v31  ;;  %655 = vmatpush1.bf16.msra.mxu1 %v6698_v35 }
  0x18   :  { %5458 = vmatmul.mubr.msk.bf16.gmra.mrb[8].mxu0 %vm76_vm1, %v36_v33  ;;  %5467 = vmatmul.mubr.msk.bf16.gmra.mrb[8].mxu1 %vm76_vm1, %v36_v33 }
  0x19   :  { %176 = vmatprep.mubr.bf16.mxu0 %v8227_v2  ;;  %289 = vmatprep.mubr.bf16.mxu1 %v8227_v2 }
  0x1a   :  { %616 = vmatpush1.bf16.msra.mxu0 %v6691_v34  ;;  %656 = vmatprep.subr.bf16.mxu1 %v6710_v37 }
  0x1b   :  { %617 = vmatprep.subr.bf16.mxu0 %v6705_v36  ;;  %657 = vmatpush1.bf16.msra.mxu1 %v6732_v41 }
  0x1c   :  { %658 = vmatprep.subr.bf16.mxu1 %v6744_v43 }
  0x1e   :  { %618 = vmatpush1.bf16.msra.mxu0 %v6725_v40 }
  0x1f   :  { %619 = vmatprep.subr.bf16.mxu0 %v6737_v42  ;;  %659 = vmatpush1.bf16.msra.mxu1 %v6754_v46 }
  0x20   :  { %5459 = vmatmul.mubr.msk.bf16.gmra.mrb[12].mxu0 %vm76_vm1, %v37_v44  ;;  %5468 = vmatmul.mubr.msk.bf16.gmra.mrb[12].mxu1 %vm76_vm1, %v37_v44 }
  0x21   :  { %186 = vmatprep.mubr.bf16.mxu0 %v8227_v2  ;;  %299 = vmatprep.mubr.bf16.mxu1 %v8227_v2 }
  0x22   :  { %620 = vmatpush1.bf16.msra.mxu0 %v6749_v45  ;;  %660 = vmatprep.subr.bf16.mxu1 %v6764_v48 }
  0x23   :  { %621 = vmatprep.subr.bf16.mxu0 %v6759_v47  ;;  %661 = vmatpush1.bf16.msra.mxu1 %v6786_v52 }
  0x24   :  { %662 = vmatprep.subr.bf16.mxu1 %v6793_v53 }
  0x26   :  { %622 = vmatpush1.bf16.msra.mxu0 %v6781_v51 }
  0x27   :  { %921 = vmatprep.subr.bf16.mxu0 %v6579_v9  ;;  %663 = vmatpush1.bf16.msra.mxu1 %v6802_v55 }
  0x28   :  { %5460 = vmatmul.mubr.msk.bf16.gmra.mrb[16].mxu0 %vm76_vm1, %v38_v54  ;;  %5469 = vmatmul.mubr.msk.bf16.gmra.mrb[16].mxu1 %vm76_vm1, %v38_v54 }
  0x29   :  { %196 = vmatprep.mubr.bf16.mxu0 %v8227_v2  ;;  %309 = vmatprep.mubr.bf16.mxu1 %v8227_v2 }
  0x2a   :  { %962 = vmatprep.subr.bf16.mxu1 %v6598_v16 }
  0x30   :  { %5461 = vmatmul.mubr.msk.bf16.gmra.mrb[20].mxu0 %vm76_vm1, %v39_v58  ;;  %5470 = vmatmul.mubr.msk.bf16.gmra.mrb[20].mxu1 %vm76_vm1, %v39_v58 }
  0x31   :  { %206 = vmatprep.mubr.bf16.mxu0 %v8227_v2  ;;  %319 = vmatprep.mubr.bf16.mxu1 %v8227_v2 }
  0x38   :  { %5462 = vmatmul.mubr.msk.bf16.gmra.mrb[24].mxu0 %vm76_vm1, %v40_v61  ;;  %5471 = vmatmul.mubr.msk.bf16.gmra.mrb[24].mxu1 %vm76_vm1, %v40_v61 }
  0x39   :  { %216 = vmatprep.mubr.bf16.mxu0 %v8227_v2  ;;  %329 = vmatprep.mubr.bf16.mxu1 %v8227_v2 }
  0x40   :  { %5463 = vmatmul.mubr.msk.bf16.gmra.mrb[28].mxu0 %vm76_vm1, %v41_v0  ;;  %5472 = vmatmul.mubr.msk.bf16.gmra.mrb[28].mxu1 %vm76_vm1, %v41_v0 }
  0x41   :  { %639 = vmatprep.mubr.bf16.mxu0 %v8227_v2  ;;  %680 = vmatprep.mubr.bf16.mxu1 %v8227_v2 }
  0x48   :  { %640 = vmatmul.mubr.bf16.vlgmr.msra.gmra.mrb[32].mxu0 %v6536_v1  ;;  %681 = vmatmul.mubr.bf16.vlgmr.msra.gmra.mrb[32].mxu1 %v6536_v1 }
  0x49   :  { %922 = vmatpush1.bf16.msra.mxu0 %v6584_v13  ;;  %963 = vmatpush1.bf16.msra.mxu1 %v6608_v18 }
  0x4a   :  { %923 = vmatprep.subr.bf16.mxu0 %v6590_v14  ;;  %964 = vmatprep.subr.bf16.mxu1 %v6627_v21 }
  0x4b   :  { %953 = vmatprep.mubr.bf16.mxu0 %v8227_v2  ;;  %994 = vmatprep.mubr.bf16.mxu1 %v8227_v2 }
  0x4d   :  { %924 = vmatpush1.bf16.msra.mxu0 %v6615_v19  ;;  %965 = vmatpush1.bf16.msra.mxu1 %v6642_v24 }
  0x4e   :  { %925 = vmatprep.subr.bf16.mxu0 %v6622_v20  ;;  %966 = vmatprep.subr.bf16.mxu1 %v6652_v26 }
  0x51   :  { %926 = vmatpush1.bf16.msra.mxu0 %v6635_v23  ;;  %967 = vmatpush1.bf16.msra.mxu1 %v6674_v30 }
  0x52   :  { %927 = vmatprep.subr.bf16.mxu0 %v6647_v25  ;;  %968 = vmatprep.subr.bf16.mxu1 %v6686_v32 }
  0x55   :  { %928 = vmatpush1.bf16.msra.mxu0 %v6667_v29  ;;  %969 = vmatpush1.bf16.msra.mxu1 %v6698_v35 }
  0x56   :  { %929 = vmatprep.subr.bf16.mxu0 %v6679_v31  ;;  %970 = vmatprep.subr.bf16.mxu1 %v6710_v37 }
  0x59   :  { %930 = vmatpush1.bf16.msra.mxu0 %v6691_v34  ;;  %971 = vmatpush1.bf16.msra.mxu1 %v6732_v41 }
  0x5a   :  { %931 = vmatprep.subr.bf16.mxu0 %v6705_v36  ;;  %972 = vmatprep.subr.bf16.mxu1 %v6744_v43 }
  0x5d   :  { %932 = vmatpush1.bf16.msra.mxu0 %v6725_v40  ;;  %973 = vmatpush1.bf16.msra.mxu1 %v6754_v46 }
  0x5e   :  { %933 = vmatprep.subr.bf16.mxu0 %v6737_v42  ;;  %974 = vmatprep.subr.bf16.mxu1 %v6764_v48 }
  0x61   :  { %934 = vmatpush1.bf16.msra.mxu0 %v6749_v45  ;;  %975 = vmatpush1.bf16.msra.mxu1 %v6786_v52 }
  0x62   :  { %935 = vmatprep.subr.bf16.mxu0 %v6759_v47  ;;  %976 = vmatprep.subr.bf16.mxu1 %v6793_v53 }
  0x65   :  { %936 = vmatpush1.bf16.msra.mxu0 %v6781_v51  ;;  %977 = vmatpush1.bf16.msra.mxu1 %v6802_v55 }
  0x66   :  { %1235 = vmatprep.subr.bf16.mxu0 %v6579_v9  ;;  %1276 = vmatprep.subr.bf16.mxu1 %v6598_v16  ;;  %v6889_v9 = vrot.slane %v44_v8, %v48_v7 }
  0xdb   :  { %v6883_v12 = vpop.f32.mrb[0].mxu0  ;;  %v6885_v15 = vpop.f32.mrb[0].mxu1 }
  0xdc   :  { %v6891_v16 = vpop.f32.mrb[1].mxu0  ;;  %v6893_v22 = vpop.f32.mrb[1].mxu1 }
  0xdd   :  { %v152_v28 = vpop.f32.mrb[2].mxu0  ;;  %v265_v33 = vpop.f32.mrb[2].mxu1 }
  0xde   :  { %v6898_v38 = vadd.f32 %v152_v28, %v6889_v9  ;;  %v154_v39 = vpop.f32.mrb[3].mxu0  ;;  %v6901_v44 = vadd.f32 %v265_v33, %v6881_v11  ;;  %v267_v49 = vpop.f32.mrb[3].mxu1 }
  0xdf   :  { %v6904_v50 = vadd.f32 %v154_v39, %v6895_v27  ;;  %v6907_v54 = vadd.f32 %v267_v49, %v6887_v17 }
  0xe3   :  { %v158_v56 = vpop.f32.mrb[4].mxu0  ;;  %v271_v57 = vpop.f32.mrb[4].mxu1 }
  0xe4   :  { %v6910_v58 = vadd.f32 %v158_v56, %v6889_v9  ;;  %v160_v59 = vpop.f32.mrb[5].mxu0  ;;  %v6913_v60 = vadd.f32 %v271_v57, %v6881_v11  ;;  %v273_v61 = vpop.f32.mrb[5].mxu1 }
  0xe5   :  { %v6916_v62 = vadd.f32 %v160_v59, %v6895_v27  ;;  %v162_v63 = vpop.f32.mrb[6].mxu0  ;;  %v6919_v0 = vadd.f32 %v273_v61, %v6887_v17  ;;  %v275_v1 = vpop.f32.mrb[6].mxu1 }
  0xe6   :  { %v6922_v3 = vadd.f32 %v162_v63, %v6889_v9  ;;  %v164_v4 = vpop.f32.mrb[7].mxu0  ;;  %v6925_v5 = vadd.f32 %v275_v1, %v6881_v11  ;;  %v277_v6 = vpop.f32.mrb[7].mxu1 }
  0xe7   :  { %v6928_v7 = vadd.f32 %v164_v4, %v6895_v27  ;;  %v6931_v8 = vadd.f32 %v277_v6, %v6887_v17 }
  0xe9   :  { %8229 = vst [vmem:[#allocation5_spill] sm:$0xff] %v6931_v8 }
  0xeb   :  { %v168_v10 = vpop.f32.mrb[8].mxu0  ;;  %v281_v28 = vpop.f32.mrb[8].mxu1 }
  0xec   :  { %v6934_v33 = vadd.f32 %v168_v10, %v6889_v9  ;;  %v170_v39 = vpop.f32.mrb[9].mxu0  ;;  %v6937_v49 = vadd.f32 %v281_v28, %v6881_v11  ;;  %v283_v56 = vpop.f32.mrb[9].mxu1 }
  0xed   :  { %v6940_v57 = vadd.f32 %v170_v39, %v6895_v27  ;;  %v172_v59 = vpop.f32.mrb[10].mxu0  ;;  %v6943_v61 = vadd.f32 %v283_v56, %v6887_v17  ;;  %v285_v63 = vpop.f32.mrb[10].mxu1 }
  0xee   :  { %8230 = vst [vmem:[#allocation6_spill] sm:$0xff] %v6934_v33  ;;  %8231 = vst [vmem:[#allocation7_spill] sm:$0xff] %v6937_v49  ;;  %v6946_v1 = vadd.f32 %v172_v59, %v6889_v9  ;;  %v174_v4 = vpop.f32.mrb[11].mxu0  ;;  %v6949_v6 = vadd.f32 %v285_v63, %v6881_v11  ;;  %v287_v10 = vpop.f32.mrb[11].mxu1 }
  0xef   :  { %8232 = vst [vmem:[#allocation8_spill] sm:$0xff] %v6940_v57  ;;  %8233 = vst [vmem:[#allocation9_spill] sm:$0xff] %v6943_v61  ;;  %v6952_v28 = vadd.f32 %v174_v4, %v6895_v27  ;;  %v6955_v2 = vadd.f32 %v287_v10, %v6887_v17 }
  0xf0   :  { %8234 = vst [vmem:[#allocation10_spill] sm:$0xff] %v6946_v1  ;;  %8235 = vst [vmem:[#allocation11_spill] sm:$0xff] %v6949_v6 }
  0xf1   :  { %8236 = vst [vmem:[#allocation12_spill] sm:$0xff] %v6952_v28  ;;  %8237 = vst [vmem:[#allocation13_spill] sm:$0xff] %v6955_v2 }
  0xf3   :  { %v178_v39 = vpop.f32.mrb[12].mxu0  ;;  %v291_v57 = vpop.f32.mrb[12].mxu1 }
  0xf4   :  { %v6958_v56 = vadd.f32 %v178_v39, %v6889_v9  ;;  %v180_v61 = vpop.f32.mrb[13].mxu0  ;;  %v6961_v59 = vadd.f32 %v291_v57, %v6881_v11  ;;  %v293_v1 = vpop.f32.mrb[13].mxu1 }
  0xf5   :  { %v6964_v63 = vadd.f32 %v180_v61, %v6895_v27  ;;  %v182_v6 = vpop.f32.mrb[14].mxu0  ;;  %v6967_v4 = vadd.f32 %v293_v1, %v6887_v17  ;;  %v295_v28 = vpop.f32.mrb[14].mxu1 }
  0xf6   :  { %8238 = vst [vmem:[#allocation14_spill] sm:$0xff] %v6958_v56  ;;  %8239 = vst [vmem:[#allocation15_spill] sm:$0xff] %v6961_v59  ;;  %v6970_v10 = vadd.f32 %v182_v6, %v6889_v9  ;;  %v184_v2 = vpop.f32.mrb[15].mxu0  ;;  %v6973_v39 = vadd.f32 %v295_v28, %v6881_v11  ;;  %v297_v56 = vpop.f32.mrb[15].mxu1 }
  0xf7   :  { %8240 = vst [vmem:[#allocation16_spill] sm:$0xff] %v6964_v63  ;;  %8241 = vst [vmem:[#allocation17_spill] sm:$0xff] %v6967_v4  ;;  %v6976_v57 = vadd.f32 %v184_v2, %v6895_v27  ;;  %v6979_v59 = vadd.f32 %v297_v56, %v6887_v17 }
  0xf8   :  { %8242 = vst [vmem:[#allocation18_spill] sm:$0xff] %v6970_v10  ;;  %8243 = vst [vmem:[#allocation19_spill] sm:$0xff] %v6973_v39 }
  0xf9   :  { %8244 = vst [vmem:[#allocation20_spill] sm:$0xff] %v6976_v57  ;;  %8245 = vst [vmem:[#allocation21_spill] sm:$0xff] %v6979_v59 }
  0xfb   :  { %v188_v61 = vpop.f32.mrb[16].mxu0  ;;  %v301_v63 = vpop.f32.mrb[16].mxu1 }
  0xfc   :  { %v6982_v1 = vadd.f32 %v188_v61, %v6889_v9  ;;  %v190_v4 = vpop.f32.mrb[17].mxu0  ;;  %v6985_v6 = vadd.f32 %v301_v63, %v6881_v11  ;;  %v303_v10 = vpop.f32.mrb[17].mxu1 }
  0xfd   :  { %v6988_v28 = vadd.f32 %v190_v4, %v6895_v27  ;;  %v192_v39 = vpop.f32.mrb[18].mxu0  ;;  %v6991_v2 = vadd.f32 %v303_v10, %v6887_v17  ;;  %v305_v57 = vpop.f32.mrb[18].mxu1 }
  0xfe   :  { %8246 = vst [vmem:[#allocation22_spill] sm:$0xff] %v6982_v1  ;;  %8247 = vst [vmem:[#allocation23_spill] sm:$0xff] %v6985_v6  ;;  %v6994_v56 = vadd.f32 %v192_v39, %v6889_v9  ;;  %v194_v59 = vpop.f32.mrb[19].mxu0  ;;  %v6997_v61 = vadd.f32 %v305_v57, %v6881_v11  ;;  %v307_v1 = vpop.f32.mrb[19].mxu1 }
  0xff   :  { %8248 = vst [vmem:[#allocation24_spill] sm:$0xff] %v6988_v28  ;;  %8249 = vst [vmem:[#allocation25_spill] sm:$0xff] %v6991_v2  ;;  %v7000_v63 = vadd.f32 %v194_v59, %v6895_v27  ;;  %v7003_v6 = vadd.f32 %v307_v1, %v6887_v17 }
 0x100   :  { %8250 = vst [vmem:[#allocation26_spill] sm:$0xff] %v6994_v56  ;;  %8251 = vst [vmem:[#allocation27_spill] sm:$0xff] %v6997_v61 }
 0x101   :  { %8252 = vst [vmem:[#allocation28_spill] sm:$0xff] %v7000_v63  ;;  %8253 = vst [vmem:[#allocation29_spill] sm:$0xff] %v7003_v6 }
 0x103   :  { %v198_v4 = vpop.f32.mrb[20].mxu0  ;;  %v311_v28 = vpop.f32.mrb[20].mxu1 }
 0x104   :  { %v7006_v10 = vadd.f32 %v198_v4, %v6889_v9  ;;  %v200_v2 = vpop.f32.mrb[21].mxu0  ;;  %v7009_v39 = vadd.f32 %v311_v28, %v6881_v11  ;;  %v313_v56 = vpop.f32.mrb[21].mxu1 }
 0x105   :  { %v7012_v57 = vadd.f32 %v200_v2, %v6895_v27  ;;  %v202_v61 = vpop.f32.mrb[22].mxu0  ;;  %v7015_v59 = vadd.f32 %v313_v56, %v6887_v17  ;;  %v315_v63 = vpop.f32.mrb[22].mxu1 }
 0x106   :  { %8254 = vst [vmem:[#allocation30_spill] sm:$0xff] %v7006_v10  ;;  %8255 = vst [vmem:[#allocation31_spill] sm:$0xff] %v7009_v39  ;;  %v7018_v1 = vadd.f32 %v202_v61, %v6889_v9  ;;  %v204_v6 = vpop.f32.mrb[23].mxu0  ;;  %v7021_v4 = vadd.f32 %v315_v63, %v6881_v11  ;;  %v317_v10 = vpop.f32.mrb[23].mxu1 }
 0x107   :  { %8256 = vst [vmem:[#allocation32_spill] sm:$0xff] %v7012_v57  ;;  %8257 = vst [vmem:[#allocation33_spill] sm:$0xff] %v7015_v59  ;;  %v7024_v28 = vadd.f32 %v204_v6, %v6895_v27  ;;  %v7027_v39 = vadd.f32 %v317_v10, %v6887_v17 }
 0x108   :  { %8258 = vst [vmem:[#allocation34_spill] sm:$0xff] %v7018_v1  ;;  %8259 = vst [vmem:[#allocation35_spill] sm:$0xff] %v7021_v4 }
 0x109   :  { %8260 = vst [vmem:[#allocation36_spill] sm:$0xff] %v7024_v28  ;;  %8261 = vst [vmem:[#allocation37_spill] sm:$0xff] %v7027_v39 }
 0x10b   :  { %v208_v2 = vpop.f32.mrb[24].mxu0  ;;  %v321_v57 = vpop.f32.mrb[24].mxu1 }
 0x10c   :  { %v7030_v56 = vadd.f32 %v208_v2, %v6889_v9  ;;  %v210_v59 = vpop.f32.mrb[25].mxu0  ;;  %v7033_v61 = vadd.f32 %v321_v57, %v6881_v11  ;;  %v323_v1 = vpop.f32.mrb[25].mxu1 }
 0x10d   :  { %v7036_v63 = vadd.f32 %v210_v59, %v6895_v27  ;;  %v212_v4 = vpop.f32.mrb[26].mxu0  ;;  %v7039_v6 = vadd.f32 %v323_v1, %v6887_v17  ;;  %v325_v28 = vpop.f32.mrb[26].mxu1 }
 0x10e   :  { %8262 = vst [vmem:[#allocation38_spill] sm:$0xff] %v7030_v56  ;;  %8263 = vst [vmem:[#allocation39_spill] sm:$0xff] %v7033_v61  ;;  %v7042_v10 = vadd.f32 %v212_v4, %v6889_v9  ;;  %v214_v39 = vpop.f32.mrb[27].mxu0  ;;  %v7045_v2 = vadd.f32 %v325_v28, %v6881_v11  ;;  %v327_v56 = vpop.f32.mrb[27].mxu1 }
 0x10f   :  { %8264 = vst [vmem:[#allocation40_spill] sm:$0xff] %v7036_v63  ;;  %8265 = vst [vmem:[#allocation41_spill] sm:$0xff] %v7039_v6  ;;  %v7048_v57 = vadd.f32 %v214_v39, %v6895_v27  ;;  %v7051_v61 = vadd.f32 %v327_v56, %v6887_v17 }
 0x110   :  { %8266 = vst [vmem:[#allocation42_spill] sm:$0xff] %v7042_v10  ;;  %8267 = vst [vmem:[#allocation43_spill] sm:$0xff] %v7045_v2 }
 0x111   :  { %8268 = vst [vmem:[#allocation44_spill] sm:$0xff] %v7048_v57  ;;  %8269 = vst [vmem:[#allocation45_spill] sm:$0xff] %v7051_v61 }
 0x113   :  { %v218_v59 = vpop.f32.mrb[28].mxu0  ;;  %v331_v63 = vpop.f32.mrb[28].mxu1 }
 0x114   :  { %v7054_v1 = vadd.f32 %v218_v59, %v6889_v9  ;;  %v220_v6 = vpop.f32.mrb[29].mxu0  ;;  %v7057_v4 = vadd.f32 %v331_v63, %v6881_v11  ;;  %v333_v10 = vpop.f32.mrb[29].mxu1 }
 0x115   :  { %v7060_v28 = vadd.f32 %v220_v6, %v6895_v27  ;;  %v222_v2 = vpop.f32.mrb[30].mxu0  ;;  %v7063_v39 = vadd.f32 %v333_v10, %v6887_v17  ;;  %v335_v57 = vpop.f32.mrb[30].mxu1  ;;  %v149_v6 = vadd.f32 %v6883_v12, %v6889_v9  ;;  %v262_v10 = vadd.f32 %v6885_v15, %v6881_v11 }
 0x116   :  { %8270 = vst [vmem:[#allocation46_spill] sm:$0xff] %v7054_v1  ;;  %8271 = vst [vmem:[#allocation47_spill] sm:$0xff] %v7057_v4  ;;  %v7066_v56 = vadd.f32 %v222_v2, %v6889_v9  ;;  %v224_v61 = vpop.f32.mrb[31].mxu0  ;;  %v7069_v59 = vadd.f32 %v335_v57, %v6881_v11  ;;  %v337_v1 = vpop.f32.mrb[31].mxu1  ;;  %v151_v2 = vadd.f32 %v6891_v16, %v6895_v27 }
 0x117   :  { %8272 = vst [vmem:[#allocation48_spill] sm:$0xff] %v7060_v28  ;;  %8273 = vst [vmem:[#allocation49_spill] sm:$0xff] %v7063_v39  ;;  %v7072_v63 = vadd.f32 %v224_v61, %v6895_v27  ;;  %v7075_v4 = vadd.f32 %v337_v1, %v6887_v17  ;;  %v264_v57 = vadd.f32 %v6893_v22, %v6887_v17 }
 0x118   :  { %8274 = vst [vmem:[#allocation50_spill] sm:$0xff] %v7066_v56  ;;  %8275 = vst [vmem:[#allocation51_spill] sm:$0xff] %v7069_v59 }
 0x119   :  { %8276 = vst [vmem:[#allocation52_spill] sm:$0xff] %v7072_v63  ;;  %8277 = vst [vmem:[#allocation53_spill] sm:$0xff] %v7075_v4 }
 0x11b   :  { %v641_v59 = vpop.f32.mrb[32].mxu0  ;;  %v682_v56 = vpop.f32.mrb[32].mxu1 }
 0x11c   :  { %v689_v39 = vadd.f32 %v641_v59, %v149_v6  ;;  %v691_v61 = vadd.f32 %v682_v56, %v262_v10  ;;  %v643_v63 = vpop.f32.mrb[33].mxu0  ;;  %v684_v28 = vpop.f32.mrb[33].mxu1 }
 0x11d   :  { %v690_v1 = vadd.f32 %v643_v63, %v151_v2  ;;  %v692_v4 = vadd.f32 %v684_v28, %v264_v57  ;;  %v645_v49 = vpop.f32.mrb[34].mxu0  ;;  %v686_v33 = vpop.f32.mrb[34].mxu1  ;;  %v8278_v57 = vmov 0  }
 0x11e   :  { %v5505_v12 = vmul.f32 -1.442695, %v689_v39  ;;  %v646_v9 = vpop.f32.mrb[35].mxu0  ;;  %v687_v8 = vpop.f32.mrb[35].mxu1 }
 0x11f   :  { %v5506_v11 = vmul.f32 -1.442695, %v690_v1  ;;  %v5507_v15 = vmul.f32 -1.442695, %v692_v4  ;;  %v7157_v1 = vld [vmem:[%s8224_s2 + $0x24] ss:$16 sps:$4 sm:$0xff]  }
 0x120   :  { %6279 = vpow2.f32 %v5505_v12  ;;  %v7162_v12 = vld [vmem:[%s8224_s2 + $0x2c] ss:$16 sps:$4 sm:$0xff]   ;;  %v7167_v9 = vld [vmem:[%s8224_s2 + $0x20] ss:$16 sps:$4 sm:$0xff]  }
 0x121   :  { %6281 = vpow2.f32 %v5506_v11  ;;  %v7172_v11 = vld [vmem:[%s8224_s2 + $0x28] ss:$16 sps:$4 sm:$0xff]  }
 0x122   :  { %6283 = vpow2.f32 %v5507_v15  ;;  %v7181_v15 = vld [vmem:[%s8224_s2 + $0x44] ss:$16 sps:$4 sm:$0xff]  }
 0x123   :  { %6285 = vtanh.f32 %v691_v61  ;;  %v7148_v61 = vld [vmem:[%s8224_s2 + $0x8] ss:$16 sps:$4 sm:$0xff]  }
 0x12a   :  { %v6280_v16 = vpop.eup %6279 }
 0x12b   :  { %v6282_v27 = vpop.eup %6281  ;;  %v696_v17 = vadd.f32 1.0, %v6280_v16  ;;  %v7186_v16 = vld [vmem:[%s8224_s2 + $0x4c] ss:$16 sps:$4 sm:$0xff]  }
 0x12c   :  { %v702_v22 = vadd.f32 1.0, %v6282_v27  ;;  %v6284_v56 = vpop.eup %6283  ;;  %v7191_v27 = vld [vmem:[%s8224_s2 + $0x40] ss:$16 sps:$4 sm:$0xff]  }
 0x12d   :  { %6287 = vrcp.f32 %v696_v17  ;;  %v6286_v59 = vpop.eup %6285  ;;  %v709_v39 = vadd.f32 1.0, %v6284_v56  ;;  %v7196_v17 = vld [vmem:[%s8224_s2 + $0x48] ss:$16 sps:$4 sm:$0xff]   ;;  %v7210_v56 = vld [vmem:[%s8224_s2 + $0x6c] ss:$16 sps:$4 sm:$0xff]  }
 0x12e   :  { %6289 = vrcp.f32 %v702_v22  ;;  %v7205_v22 = vld [vmem:[%s8224_s2 + $0x64] ss:$16 sps:$4 sm:$0xff]  }
 0x12f   :  { %6291 = vrcp.f32 %v709_v39  ;;  %v7239_v39 = vld [vmem:[%s8224_s2 + $0x88] ss:$16 sps:$4 sm:$0xff]  }
 0x137   :  { %v6288_v28 = vpop.eup %6287 }
 0x138   :  { %v6290_v49 = vpop.eup %6289  ;;  %v714_v33 = vmul.f32 %v6288_v28, %v6286_v59  ;;  %v7215_v59 = vld [vmem:[%s8224_s2 + $0x60] ss:$16 sps:$4 sm:$0xff]   ;;  %v7220_v28 = vld [vmem:[%s8224_s2 + $0x68] ss:$16 sps:$4 sm:$0xff]  }
 0x139   :  { %v713_v63 = vmul.f32 0.0, %v6290_v49  ;;  %v6292_v4 = vpop.eup %6291  ;;  %v7229_v49 = vld [vmem:[%s8224_s2 + $0x80] ss:$16 sps:$4 sm:$0xff]  }
 0x13b   :  { %v7085_v8 = vadd.f32 %v714_v33, %v713_v63  ;;  %v7234_v33 = vld [vmem:[%s8224_s2 + $0x84] ss:$16 sps:$4 sm:$0xff]   ;;  %v7244_v63 = vld [vmem:[%s8224_s2 + $0x8c] ss:$16 sps:$4 sm:$0xff]  }
 0x13d   :  { %6293 = vtanh.f32 %v7085_v8 }
 0x147   :  { %v6294_v6 = vpop.eup %6293 }
 0x148   :  { %v717_v10 = vmul.f32 %v6294_v6, %v6292_v4  ;;  %v7255_v4 = vld [vmem:[%s8224_s2 + $0xac] ss:$16 sps:$4 sm:$0xff]   ;;  %v7262_v6 = vld [vmem:[%s8224_s2 + $0xa0] ss:$16 sps:$4 sm:$0xff]  }
 0x14a   :  { %v728_v2 = vpack.c.bf16 %v717_v10, %v717_v10  ;;  %v7269_v10 = vld [vmem:[%s8224_s2 + $0xa8] ss:$16 sps:$4 sm:$0xff]  }
 0x14c   :  { %954 = vmatmul.mubr.bf16.vlgmr.msra.gmra.mrb[36].mxu0 %v728_v2  ;;  %995 = vmatmul.mubr.bf16.vlgmr.msra.gmra.mrb[36].mxu1 %v728_v2  ;;  %v7274_v2 = vld [vmem:[%s8224_s2 + $0xc4] ss:$16 sps:$4 sm:$0xff]  }
 0x14d   :  { %1236 = vmatpush1.bf16.msra.mxu0 %v6584_v13  ;;  %1277 = vmatpush1.bf16.msra.mxu1 %v6608_v18 }
 0x14e   :  { %1237 = vmatprep.subr.bf16.mxu0 %v6590_v14  ;;  %1278 = vmatprep.subr.bf16.mxu1 %v6627_v21 }
 0x14f   :  { %1267 = vmatprep.mubr.bf16.mxu0 %v8278_v57  ;;  %1308 = vmatprep.mubr.bf16.mxu1 %v8278_v57 }
 0x151   :  { %1238 = vmatpush1.bf16.msra.mxu0 %v6615_v19  ;;  %1279 = vmatpush1.bf16.msra.mxu1 %v6642_v24 }
 0x152   :  { %1239 = vmatprep.subr.bf16.mxu0 %v6622_v20  ;;  %1280 = vmatprep.subr.bf16.mxu1 %v6652_v26 }
 0x155   :  { %1240 = vmatpush1.bf16.msra.mxu0 %v6635_v23  ;;  %1281 = vmatpush1.bf16.msra.mxu1 %v6674_v30 }
 0x156   :  { %1241 = vmatprep.subr.bf16.mxu0 %v6647_v25  ;;  %1282 = vmatprep.subr.bf16.mxu1 %v6686_v32 }
 0x159   :  { %1242 = vmatpush1.bf16.msra.mxu0 %v6667_v29  ;;  %1283 = vmatpush1.bf16.msra.mxu1 %v6698_v35 }
 0x15a   :  { %1243 = vmatprep.subr.bf16.mxu0 %v6679_v31  ;;  %1284 = vmatprep.subr.bf16.mxu1 %v6710_v37 }
 0x15d   :  { %1244 = vmatpush1.bf16.msra.mxu0 %v6691_v34  ;;  %1285 = vmatpush1.bf16.msra.mxu1 %v6732_v41 }
 0x15e   :  { %1245 = vmatprep.subr.bf16.mxu0 %v6705_v36  ;;  %1286 = vmatprep.subr.bf16.mxu1 %v6744_v43 }
 0x161   :  { %1246 = vmatpush1.bf16.msra.mxu0 %v6725_v40  ;;  %1287 = vmatpush1.bf16.msra.mxu1 %v6754_v46 }
 0x162   :  { %1247 = vmatprep.subr.bf16.mxu0 %v6737_v42  ;;  %1288 = vmatprep.subr.bf16.mxu1 %v6764_v48 }
 0x165   :  { %1248 = vmatpush1.bf16.msra.mxu0 %v6749_v45  ;;  %1289 = vmatpush1.bf16.msra.mxu1 %v6786_v52 }
 0x166   :  { %1249 = vmatprep.subr.bf16.mxu0 %v6759_v47  ;;  %1290 = vmatprep.subr.bf16.mxu1 %v6793_v53 }
 0x169   :  { %1250 = vmatpush1.bf16.msra.mxu0 %v6781_v51  ;;  %1291 = vmatpush1.bf16.msra.mxu1 %v6802_v55 }
 0x21f   :  { %v955_v13 = vpop.f32.mrb[36].mxu0  ;;  %v996_v14 = vpop.f32.mrb[36].mxu1 }
 0x220   :  { %v1003_v18 = vadd.f32 %v955_v13, %v6898_v38  ;;  %v1005_v19 = vadd.f32 %v996_v14, %v6901_v44  ;;  %v957_v20 = vpop.f32.mrb[37].mxu0  ;;  %v998_v21 = vpop.f32.mrb[37].mxu1  ;;  %v7133_v44 = vld [vmem:[%s8224_s2 + $0x4] ss:$16 sps:$4 sm:$0xff]   ;;  %v7280_v13 = vld [vmem:[%s8224_s2 + $0xcc] ss:$16 sps:$4 sm:$0xff]  }
 0x221   :  { %v1004_v23 = vadd.f32 %v957_v20, %v6904_v50  ;;  %v1006_v24 = vadd.f32 %v998_v21, %v6907_v54  ;;  %v959_v25 = vpop.f32.mrb[38].mxu0  ;;  %v1000_v26 = vpop.f32.mrb[38].mxu1  ;;  %v7138_v50 = vld [vmem:[%s8224_s2 + $0xc] ss:$16 sps:$4 sm:$0xff]   ;;  %v7143_v54 = vld [vmem:[%s8224_s2] ss:$16 sps:$4 sm:$0xff]   ;;  %1549 = vmatprep.subr.bf16.mxu0 %v7133_v44 }
 0x222   :  { %v5540_v29 = vmul.f32 -1.442695, %v1003_v18  ;;  %v960_v30 = vpop.f32.mrb[39].mxu0  ;;  %v1001_v31 = vpop.f32.mrb[39].mxu1  ;;  %1590 = vmatprep.subr.bf16.mxu1 %v7138_v50  ;;  %v7286_v14 = vld [vmem:[%s8224_s2 + $0xc0] ss:$16 sps:$4 sm:$0xff]  }
 0x223   :  { %v5541_v32 = vmul.f32 -1.442695, %v1004_v23  ;;  %v5542_v34 = vmul.f32 -1.442695, %v1006_v24  ;;  %v7293_v18 = vld [vmem:[%s8224_s2 + $0xc8] ss:$16 sps:$4 sm:$0xff]  }
 0x224   :  { %6295 = vpow2.f32 %v5540_v29  ;;  %v7304_v20 = vld [vmem:[%s8224_s2 + $0xec] ss:$16 sps:$4 sm:$0xff]   ;;  %v7310_v21 = vld [vmem:[%s8224_s2 + $0xe0] ss:$16 sps:$4 sm:$0xff]   ;;  %v7317_v23 = vld [vmem:[%s8224_s2 + $0xe8] ss:$16 sps:$4 sm:$0xff]  }
 0x225   :  { %6297 = vpow2.f32 %v5541_v32 }
 0x226   :  { %6299 = vpow2.f32 %v5542_v34 }
 0x227   :  { %6301 = vtanh.f32 %v1005_v19  ;;  %v7298_v19 = vld [vmem:[%s8224_s2 + $0xe4] ss:$16 sps:$4 sm:$0xff]  }
 0x22e   :  { %v6296_v35 = vpop.eup %6295 }
 0x22f   :  { %v6298_v36 = vpop.eup %6297  ;;  %v1010_v37 = vadd.f32 1.0, %v6296_v35 }
 0x230   :  { %v1016_v40 = vadd.f32 1.0, %v6298_v36  ;;  %v6300_v41 = vpop.eup %6299 }
 0x231   :  { %6303 = vrcp.f32 %v1010_v37  ;;  %v6302_v42 = vpop.eup %6301  ;;  %v1023_v47 = vadd.f32 1.0, %v6300_v41 }
 0x232   :  { %6305 = vrcp.f32 %v1016_v40 }
 0x233   :  { %6307 = vrcp.f32 %v1023_v47 }
 0x23b   :  { %v6304_v43 = vpop.eup %6303 }
 0x23c   :  { %v6306_v45 = vpop.eup %6305  ;;  %v1028_v46 = vmul.f32 %v6304_v43, %v6302_v42 }
 0x23d   :  { %v1027_v48 = vmul.f32 %v6306_v45, %v7085_v8  ;;  %v6308_v52 = vpop.eup %6307  ;;  %v7249_v8 = vld [vmem:[%s8224_s2 + $0xa4] ss:$16 sps:$4 sm:$0xff]  }
 0x23f   :  { %v7125_v51 = vadd.f32 %v1028_v46, %v1027_v48 }
 0x241   :  { %6309 = vtanh.f32 %v7125_v51 }
 0x24b   :  { %v6310_v53 = vpop.eup %6309 }
 0x24c   :  { %v1031_v55 = vmul.f32 %v6310_v53, %v6308_v52 }
 0x24e   :  { %v1042_v38 = vpack.c.bf16 %v1031_v55, %v1031_v55 }
 0x250   :  { %1268 = vmatmul.mubr.bf16.vlgmr.msra.gmra.mrb[40].mxu0 %v1042_v38  ;;  %1309 = vmatmul.mubr.bf16.vlgmr.msra.gmra.mrb[40].mxu1 %v1042_v38 }
 0x251   :  { %1581 = vmatprep.mubr.bf16.mxu0 %v8278_v57  ;;  %1622 = vmatprep.mubr.bf16.mxu1 %v8278_v57 }
 0x252   :  { %1550 = vmatpush1.bf16.msra.mxu0 %v7143_v54  ;;  %1591 = vmatpush1.bf16.msra.mxu1 %v7148_v61 }
 0x253   :  { %1551 = vmatprep.subr.bf16.mxu0 %v7157_v1  ;;  %1592 = vmatprep.subr.bf16.mxu1 %v7162_v12 }
 0x256   :  { %1552 = vmatpush1.bf16.msra.mxu0 %v7167_v9  ;;  %1593 = vmatpush1.bf16.msra.mxu1 %v7172_v11 }
 0x257   :  { %1553 = vmatprep.subr.bf16.mxu0 %v7181_v15  ;;  %1594 = vmatprep.subr.bf16.mxu1 %v7186_v16 }
 0x25a   :  { %1554 = vmatpush1.bf16.msra.mxu0 %v7191_v27  ;;  %1595 = vmatpush1.bf16.msra.mxu1 %v7196_v17 }
 0x25b   :  { %1555 = vmatprep.subr.bf16.mxu0 %v7205_v22  ;;  %1596 = vmatprep.subr.bf16.mxu1 %v7210_v56 }
 0x25e   :  { %1556 = vmatpush1.bf16.msra.mxu0 %v7215_v59  ;;  %1597 = vmatpush1.bf16.msra.mxu1 %v7220_v28 }
 0x25f   :  { %1557 = vmatprep.subr.bf16.mxu0 %v7234_v33  ;;  %1598 = vmatprep.subr.bf16.mxu1 %v7244_v63 }
 0x262   :  { %1558 = vmatpush1.bf16.msra.mxu0 %v7229_v49  ;;  %1599 = vmatpush1.bf16.msra.mxu1 %v7239_v39 }
 0x263   :  { %1559 = vmatprep.subr.bf16.mxu0 %v7249_v8  ;;  %1600 = vmatprep.subr.bf16.mxu1 %v7255_v4 }
 0x266   :  { %1560 = vmatpush1.bf16.msra.mxu0 %v7262_v6  ;;  %1601 = vmatpush1.bf16.msra.mxu1 %v7269_v10 }
 0x267   :  { %1561 = vmatprep.subr.bf16.mxu0 %v7274_v2  ;;  %1602 = vmatprep.subr.bf16.mxu1 %v7280_v13 }
 0x26a   :  { %1562 = vmatpush1.bf16.msra.mxu0 %v7286_v14  ;;  %1603 = vmatpush1.bf16.msra.mxu1 %v7293_v18 }
 0x26b   :  { %1563 = vmatprep.subr.bf16.mxu0 %v7298_v19  ;;  %1604 = vmatprep.subr.bf16.mxu1 %v7304_v20 }
 0x26e   :  { %1564 = vmatpush1.bf16.msra.mxu0 %v7310_v21  ;;  %1605 = vmatpush1.bf16.msra.mxu1 %v7317_v23 }
 0x26f   :  { %1863 = vmatprep.subr.bf16.mxu0 %v7133_v44  ;;  %1904 = vmatprep.subr.bf16.mxu1 %v7138_v50 }
 0x323   :  { %v1269_v24 = vpop.f32.mrb[40].mxu0  ;;  %v1310_v25 = vpop.f32.mrb[40].mxu1 }
 0x324   :  { %v1317_v26 = vadd.f32 %v1269_v24, %v6910_v58  ;;  %v1319_v29 = vadd.f32 %v1310_v25, %v6913_v60  ;;  %v1271_v30 = vpop.f32.mrb[41].mxu0  ;;  %v1312_v31 = vpop.f32.mrb[41].mxu1 }
 0x325   :  { %v1318_v32 = vadd.f32 %v1271_v30, %v6916_v62  ;;  %v1320_v34 = vadd.f32 %v1312_v31, %v6919_v0  ;;  %v1273_v35 = vpop.f32.mrb[42].mxu0  ;;  %v1314_v36 = vpop.f32.mrb[42].mxu1 }
 0x326   :  { %v5575_v37 = vmul.f32 -1.442695, %v1317_v26  ;;  %v1274_v40 = vpop.f32.mrb[43].mxu0  ;;  %v1315_v41 = vpop.f32.mrb[43].mxu1 }
 0x327   :  { %v5576_v42 = vmul.f32 -1.442695, %v1318_v32  ;;  %v5577_v43 = vmul.f32 -1.442695, %v1320_v34 }
 0x328   :  { %6311 = vpow2.f32 %v5575_v37  ;;  %v8279_v37 = vld [vmem:[#allocation5_spill] sm:$0xff] }
 0x329   :  { %6313 = vpow2.f32 %v5576_v42 }
 0x32a   :  { %6315 = vpow2.f32 %v5577_v43 }
 0x32b   :  { %6317 = vtanh.f32 %v1319_v29 }
 0x332   :  { %v6312_v45 = vpop.eup %6311 }
 0x333   :  { %v6314_v46 = vpop.eup %6313  ;;  %v1324_v58 = vadd.f32 1.0, %v6312_v45 }
 0x334   :  { %v1330_v60 = vadd.f32 1.0, %v6314_v46  ;;  %v6316_v62 = vpop.eup %6315 }
 0x335   :  { %6319 = vrcp.f32 %v1324_v58  ;;  %v6318_v47 = vpop.eup %6317  ;;  %v1337_v53 = vadd.f32 1.0, %v6316_v62 }
 0x336   :  { %6321 = vrcp.f32 %v1330_v60 }
 0x337   :  { %6323 = vrcp.f32 %v1337_v53 }
 0x33f   :  { %v6320_v0 = vpop.eup %6319 }
 0x340   :  { %v6322_v48 = vpop.eup %6321  ;;  %v1342_v52 = vmul.f32 %v6320_v0, %v6318_v47 }
 0x341   :  { %v1341_v55 = vmul.f32 %v6322_v48, %v7125_v51  ;;  %v6324_v24 = vpop.eup %6323 }
 0x343   :  { %v7329_v38 = vadd.f32 %v1342_v52, %v1341_v55 }
 0x345   :  { %6325 = vtanh.f32 %v7329_v38 }
 0x34f   :  { %v6326_v25 = vpop.eup %6325 }
 0x350   :  { %v1345_v26 = vmul.f32 %v6326_v25, %v6324_v24 }
 0x352   :  { %v1356_v29 = vpack.c.bf16 %v1345_v26, %v1345_v26 }
 0x354   :  { %1582 = vmatmul.mubr.bf16.vlgmr.msra.gmra.mrb[44].mxu0 %v1356_v29  ;;  %1623 = vmatmul.mubr.bf16.vlgmr.msra.gmra.mrb[44].mxu1 %v1356_v29 }
 0x355   :  { %1864 = vmatpush1.bf16.msra.mxu0 %v7143_v54  ;;  %1905 = vmatpush1.bf16.msra.mxu1 %v7148_v61 }
 0x356   :  { %1865 = vmatprep.subr.bf16.mxu0 %v7157_v1  ;;  %1906 = vmatprep.subr.bf16.mxu1 %v7162_v12 }
 0x357   :  { %1895 = vmatprep.mubr.bf16.mxu0 %v8278_v57  ;;  %1936 = vmatprep.mubr.bf16.mxu1 %v8278_v57 }
 0x359   :  { %1866 = vmatpush1.bf16.msra.mxu0 %v7167_v9  ;;  %1907 = vmatpush1.bf16.msra.mxu1 %v7172_v11 }
 0x35a   :  { %1867 = vmatprep.subr.bf16.mxu0 %v7181_v15  ;;  %1908 = vmatprep.subr.bf16.mxu1 %v7186_v16 }
 0x35d   :  { %1868 = vmatpush1.bf16.msra.mxu0 %v7191_v27  ;;  %1909 = vmatpush1.bf16.msra.mxu1 %v7196_v17 }
 0x35e   :  { %1869 = vmatprep.subr.bf16.mxu0 %v7205_v22  ;;  %1910 = vmatprep.subr.bf16.mxu1 %v7210_v56 }
 0x361   :  { %1870 = vmatpush1.bf16.msra.mxu0 %v7215_v59  ;;  %1911 = vmatpush1.bf16.msra.mxu1 %v7220_v28 }
 0x362   :  { %1871 = vmatprep.subr.bf16.mxu0 %v7234_v33  ;;  %1912 = vmatprep.subr.bf16.mxu1 %v7244_v63 }
 0x365   :  { %1872 = vmatpush1.bf16.msra.mxu0 %v7229_v49  ;;  %1913 = vmatpush1.bf16.msra.mxu1 %v7239_v39 }
 0x366   :  { %1873 = vmatprep.subr.bf16.mxu0 %v7249_v8  ;;  %1914 = vmatprep.subr.bf16.mxu1 %v7255_v4 }
 0x369   :  { %1874 = vmatpush1.bf16.msra.mxu0 %v7262_v6  ;;  %1915 = vmatpush1.bf16.msra.mxu1 %v7269_v10 }
 0x36a   :  { %1875 = vmatprep.subr.bf16.mxu0 %v7274_v2  ;;  %1916 = vmatprep.subr.bf16.mxu1 %v7280_v13 }
 0x36d   :  { %1876 = vmatpush1.bf16.msra.mxu0 %v7286_v14  ;;  %1917 = vmatpush1.bf16.msra.mxu1 %v7293_v18 }
 0x36e   :  { %1877 = vmatprep.subr.bf16.mxu0 %v7298_v19  ;;  %1918 = vmatprep.subr.bf16.mxu1 %v7304_v20 }
 0x371   :  { %1878 = vmatpush1.bf16.msra.mxu0 %v7310_v21  ;;  %1919 = vmatpush1.bf16.msra.mxu1 %v7317_v23 }
 0x372   :  { %2177 = vmatprep.subr.bf16.mxu0 %v7133_v44  ;;  %2218 = vmatprep.subr.bf16.mxu1 %v7138_v50 }
 0x427   :  { %v1583_v51 = vpop.f32.mrb[44].mxu0  ;;  %v1624_v30 = vpop.f32.mrb[44].mxu1 }
 0x428   :  { %v1631_v31 = vadd.f32 %v1583_v51, %v6922_v3  ;;  %v1633_v32 = vadd.f32 %v1624_v30, %v6925_v5  ;;  %v1585_v34 = vpop.f32.mrb[45].mxu0  ;;  %v1626_v35 = vpop.f32.mrb[45].mxu1 }
 0x429   :  { %v1632_v36 = vadd.f32 %v1585_v34, %v6928_v7  ;;  %v1634_v40 = vadd.f32 %v1626_v35, %v8279_v37  ;;  %v1587_v41 = vpop.f32.mrb[46].mxu0  ;;  %v1628_v42 = vpop.f32.mrb[46].mxu1  ;;  %v8281_v35 = vld [vmem:[#allocation7_spill] sm:$0xff] }
 0x42a   :  { %v5610_v43 = vmul.f32 -1.442695, %v1631_v31  ;;  %v1588_v45 = vpop.f32.mrb[47].mxu0  ;;  %v1629_v46 = vpop.f32.mrb[47].mxu1  ;;  %v8282_v41 = vld [vmem:[#allocation8_spill] sm:$0xff] }
 0x42b   :  { %v5611_v58 = vmul.f32 -1.442695, %v1632_v36  ;;  %v5612_v60 = vmul.f32 -1.442695, %v1634_v40 }
 0x42c   :  { %6327 = vpow2.f32 %v5610_v43  ;;  %v8283_v43 = vld [vmem:[#allocation9_spill] sm:$0xff] }
 0x42d   :  { %6329 = vpow2.f32 %v5611_v58 }
 0x42e   :  { %6331 = vpow2.f32 %v5612_v60 }
 0x42f   :  { %6333 = vtanh.f32 %v1633_v32  ;;  %v8280_v32 = vld [vmem:[#allocation6_spill] sm:$0xff] }
 0x436   :  { %v6328_v62 = vpop.eup %6327 }
 0x437   :  { %v6330_v47 = vpop.eup %6329  ;;  %v1638_v3 = vadd.f32 1.0, %v6328_v62 }
 0x438   :  { %v1644_v5 = vadd.f32 1.0, %v6330_v47  ;;  %v6332_v7 = vpop.eup %6331 }
 0x439   :  { %6335 = vrcp.f32 %v1638_v3  ;;  %v6334_v0 = vpop.eup %6333  ;;  %v1651_v55 = vadd.f32 1.0, %v6332_v7 }
 0x43a   :  { %6337 = vrcp.f32 %v1644_v5 }
 0x43b   :  { %6339 = vrcp.f32 %v1651_v55 }
 0x443   :  { %v6336_v48 = vpop.eup %6335 }
 0x444   :  { %v6338_v52 = vpop.eup %6337  ;;  %v1656_v53 = vmul.f32 %v6336_v48, %v6334_v0 }
 0x445   :  { %v1655_v24 = vmul.f32 %v6338_v52, %v7329_v38  ;;  %v6340_v26 = vpop.eup %6339 }
 0x447   :  { %v7371_v25 = vadd.f32 %v1656_v53, %v1655_v24 }
 0x449   :  { %6341 = vtanh.f32 %v7371_v25 }
 0x453   :  { %v6342_v29 = vpop.eup %6341 }
 0x454   :  { %v1659_v51 = vmul.f32 %v6342_v29, %v6340_v26 }
 0x456   :  { %v1670_v30 = vpack.c.bf16 %v1659_v51, %v1659_v51 }
 0x458   :  { %1896 = vmatmul.mubr.bf16.vlgmr.msra.gmra.mrb[48].mxu0 %v1670_v30  ;;  %1937 = vmatmul.mubr.bf16.vlgmr.msra.gmra.mrb[48].mxu1 %v1670_v30 }
 0x459   :  { %2178 = vmatpush1.bf16.msra.mxu0 %v7143_v54  ;;  %2219 = vmatpush1.bf16.msra.mxu1 %v7148_v61 }
 0x45a   :  { %2179 = vmatprep.subr.bf16.mxu0 %v7157_v1  ;;  %2220 = vmatprep.subr.bf16.mxu1 %v7162_v12 }
 0x45b   :  { %2209 = vmatprep.mubr.bf16.mxu0 %v8278_v57  ;;  %2250 = vmatprep.mubr.bf16.mxu1 %v8278_v57 }
 0x45d   :  { %2180 = vmatpush1.bf16.msra.mxu0 %v7167_v9  ;;  %2221 = vmatpush1.bf16.msra.mxu1 %v7172_v11 }
 0x45e   :  { %2181 = vmatprep.subr.bf16.mxu0 %v7181_v15  ;;  %2222 = vmatprep.subr.bf16.mxu1 %v7186_v16 }
 0x461   :  { %2182 = vmatpush1.bf16.msra.mxu0 %v7191_v27  ;;  %2223 = vmatpush1.bf16.msra.mxu1 %v7196_v17 }
 0x462   :  { %2183 = vmatprep.subr.bf16.mxu0 %v7205_v22  ;;  %2224 = vmatprep.subr.bf16.mxu1 %v7210_v56 }
 0x465   :  { %2184 = vmatpush1.bf16.msra.mxu0 %v7215_v59  ;;  %2225 = vmatpush1.bf16.msra.mxu1 %v7220_v28 }
 0x466   :  { %2185 = vmatprep.subr.bf16.mxu0 %v7234_v33  ;;  %2226 = vmatprep.subr.bf16.mxu1 %v7244_v63 }
 0x469   :  { %2186 = vmatpush1.bf16.msra.mxu0 %v7229_v49  ;;  %2227 = vmatpush1.bf16.msra.mxu1 %v7239_v39 }
 0x46a   :  { %2187 = vmatprep.subr.bf16.mxu0 %v7249_v8  ;;  %2228 = vmatprep.subr.bf16.mxu1 %v7255_v4 }
 0x46d   :  { %2188 = vmatpush1.bf16.msra.mxu0 %v7262_v6  ;;  %2229 = vmatpush1.bf16.msra.mxu1 %v7269_v10 }
 0x46e   :  { %2189 = vmatprep.subr.bf16.mxu0 %v7274_v2  ;;  %2230 = vmatprep.subr.bf16.mxu1 %v7280_v13 }
 0x471   :  { %2190 = vmatpush1.bf16.msra.mxu0 %v7286_v14  ;;  %2231 = vmatpush1.bf16.msra.mxu1 %v7293_v18 }
 0x472   :  { %2191 = vmatprep.subr.bf16.mxu0 %v7298_v19  ;;  %2232 = vmatprep.subr.bf16.mxu1 %v7304_v20 }
 0x475   :  { %2192 = vmatpush1.bf16.msra.mxu0 %v7310_v21  ;;  %2233 = vmatpush1.bf16.msra.mxu1 %v7317_v23 }
 0x476   :  { %2491 = vmatprep.subr.bf16.mxu0 %v7133_v44  ;;  %2532 = vmatprep.subr.bf16.mxu1 %v7138_v50 }
 0x52b   :  { %v1897_v38 = vpop.f32.mrb[48].mxu0  ;;  %v1938_v31 = vpop.f32.mrb[48].mxu1 }
 0x52c   :  { %v1945_v34 = vadd.f32 %v1897_v38, %v8280_v32  ;;  %v1947_v36 = vadd.f32 %v1938_v31, %v8281_v35  ;;  %v1899_v37 = vpop.f32.mrb[49].mxu0  ;;  %v1940_v40 = vpop.f32.mrb[49].mxu1 }
 0x52d   :  { %v1946_v42 = vadd.f32 %v1899_v37, %v8282_v41  ;;  %v1948_v45 = vadd.f32 %v1940_v40, %v8283_v43  ;;  %v1901_v46 = vpop.f32.mrb[50].mxu0  ;;  %v1942_v58 = vpop.f32.mrb[50].mxu1  ;;  %v7461_v40 = vld [vmem:[%s8224_s2 + $0x4] ss:$16 sps:$4 sm:$0xff]   ;;  %v7466_v41 = vld [vmem:[%s8224_s2 + $0xc] ss:$16 sps:$4 sm:$0xff]  }
 0x52e   :  { %v5645_v60 = vmul.f32 -1.442695, %v1945_v34  ;;  %v1902_v62 = vpop.f32.mrb[51].mxu0  ;;  %v1943_v47 = vpop.f32.mrb[51].mxu1  ;;  %v7476_v43 = vld [vmem:[%s8224_s2 + $0x8] ss:$16 sps:$4 sm:$0xff]  }
 0x52f   :  { %v5646_v44 = vmul.f32 -1.442695, %v1946_v42  ;;  %v5647_v50 = vmul.f32 -1.442695, %v1948_v45  ;;  %v7471_v42 = vld [vmem:[%s8224_s2] ss:$16 sps:$4 sm:$0xff]  }
 0x530   :  { %6343 = vpow2.f32 %v5645_v60  ;;  %v7485_v45 = vld [vmem:[%s8224_s2 + $0x24] ss:$16 sps:$4 sm:$0xff]   ;;  %v7490_v46 = vld [vmem:[%s8224_s2 + $0x2c] ss:$16 sps:$4 sm:$0xff]   ;;  %v7495_v58 = vld [vmem:[%s8224_s2 + $0x20] ss:$16 sps:$4 sm:$0xff]  }
 0x531   :  { %6345 = vpow2.f32 %v5646_v44  ;;  %v7500_v60 = vld [vmem:[%s8224_s2 + $0x28] ss:$16 sps:$4 sm:$0xff]   ;;  %v7509_v62 = vld [vmem:[%s8224_s2 + $0x44] ss:$16 sps:$4 sm:$0xff]   ;;  %v7514_v47 = vld [vmem:[%s8224_s2 + $0x4c] ss:$16 sps:$4 sm:$0xff]  }
 0x532   :  { %6347 = vpow2.f32 %v5647_v50  ;;  %v7519_v44 = vld [vmem:[%s8224_s2 + $0x40] ss:$16 sps:$4 sm:$0xff]   ;;  %v7524_v50 = vld [vmem:[%s8224_s2 + $0x48] ss:$16 sps:$4 sm:$0xff]  }
 0x533   :  { %6349 = vtanh.f32 %v1947_v36 }
 0x53a   :  { %v6344_v3 = vpop.eup %6343 }
 0x53b   :  { %v6346_v5 = vpop.eup %6345  ;;  %v1952_v7 = vadd.f32 1.0, %v6344_v3  ;;  %v7533_v3 = vld [vmem:[%s8224_s2 + $0x64] ss:$16 sps:$4 sm:$0xff]  }
 0x53c   :  { %v1958_v0 = vadd.f32 1.0, %v6346_v5  ;;  %v6348_v48 = vpop.eup %6347  ;;  %v7538_v5 = vld [vmem:[%s8224_s2 + $0x6c] ss:$16 sps:$4 sm:$0xff]  }
 0x53d   :  { %6351 = vrcp.f32 %v1952_v7  ;;  %v6350_v52 = vpop.eup %6349  ;;  %v1965_v26 = vadd.f32 1.0, %v6348_v48  ;;  %v7543_v7 = vld [vmem:[%s8224_s2 + $0x60] ss:$16 sps:$4 sm:$0xff]  }
 0x53e   :  { %6353 = vrcp.f32 %v1958_v0  ;;  %v7548_v0 = vld [vmem:[%s8224_s2 + $0x68] ss:$16 sps:$4 sm:$0xff]   ;;  %v7557_v48 = vld [vmem:[%s8224_s2 + $0x80] ss:$16 sps:$4 sm:$0xff]  }
 0x53f   :  { %6355 = vrcp.f32 %v1965_v26  ;;  %v7583_v26 = vld [vmem:[%s8224_s2 + $0xac] ss:$16 sps:$4 sm:$0xff]  }
 0x547   :  { %v6352_v53 = vpop.eup %6351 }
 0x548   :  { %v6354_v55 = vpop.eup %6353  ;;  %v1970_v24 = vmul.f32 %v6352_v53, %v6350_v52  ;;  %v7562_v52 = vld [vmem:[%s8224_s2 + $0x84] ss:$16 sps:$4 sm:$0xff]   ;;  %v7567_v53 = vld [vmem:[%s8224_s2 + $0x88] ss:$16 sps:$4 sm:$0xff]  }
 0x549   :  { %v1969_v29 = vmul.f32 %v6354_v55, %v7371_v25  ;;  %v6356_v30 = vpop.eup %6355  ;;  %v7572_v55 = vld [vmem:[%s8224_s2 + $0x8c] ss:$16 sps:$4 sm:$0xff]  }
 0x54b   :  { %v7413_v51 = vadd.f32 %v1970_v24, %v1969_v29  ;;  %v7577_v24 = vld [vmem:[%s8224_s2 + $0xa4] ss:$16 sps:$4 sm:$0xff]   ;;  %v7590_v29 = vld [vmem:[%s8224_s2 + $0xa0] ss:$16 sps:$4 sm:$0xff]  }
 0x54d   :  { %6357 = vtanh.f32 %v7413_v51 }
 0x557   :  { %v6358_v38 = vpop.eup %6357 }
 0x558   :  { %v1973_v31 = vmul.f32 %v6358_v38, %v6356_v30  ;;  %v7602_v30 = vld [vmem:[%s8224_s2 + $0xc4] ss:$16 sps:$4 sm:$0xff]   ;;  %v7608_v38 = vld [vmem:[%s8224_s2 + $0xcc] ss:$16 sps:$4 sm:$0xff]  }
 0x55a   :  { %v1984_v32 = vpack.c.bf16 %v1973_v31, %v1973_v31  ;;  %v7614_v31 = vld [vmem:[%s8224_s2 + $0xc0] ss:$16 sps:$4 sm:$0xff]  }
 0x55c   :  { %2210 = vmatmul.mubr.bf16.vlgmr.msra.gmra.mrb[52].mxu0 %v1984_v32  ;;  %2251 = vmatmul.mubr.bf16.vlgmr.msra.gmra.mrb[52].mxu1 %v1984_v32  ;;  %v7621_v32 = vld [vmem:[%s8224_s2 + $0xc8] ss:$16 sps:$4 sm:$0xff]  }
 0x55d   :  { %2492 = vmatpush1.bf16.msra.mxu0 %v7143_v54  ;;  %2533 = vmatpush1.bf16.msra.mxu1 %v7148_v61 }
 0x55e   :  { %2493 = vmatprep.subr.bf16.mxu0 %v7157_v1  ;;  %2534 = vmatprep.subr.bf16.mxu1 %v7162_v12  ;;  %v8284_v1 = vld [vmem:[#allocation10_spill] sm:$0xff] }
 0x55f   :  { %2523 = vmatprep.mubr.bf16.mxu0 %v8278_v57  ;;  %2564 = vmatprep.mubr.bf16.mxu1 %v8278_v57 }
 0x561   :  { %2494 = vmatpush1.bf16.msra.mxu0 %v7167_v9  ;;  %2535 = vmatpush1.bf16.msra.mxu1 %v7172_v11  ;;  %v8285_v9 = vld [vmem:[#allocation11_spill] sm:$0xff] }
 0x562   :  { %2495 = vmatprep.subr.bf16.mxu0 %v7181_v15  ;;  %2536 = vmatprep.subr.bf16.mxu1 %v7186_v16 }
 0x565   :  { %2496 = vmatpush1.bf16.msra.mxu0 %v7191_v27  ;;  %2537 = vmatpush1.bf16.msra.mxu1 %v7196_v17  ;;  %v8286_v27 = vld [vmem:[#allocation12_spill] sm:$0xff] }
 0x566   :  { %2497 = vmatprep.subr.bf16.mxu0 %v7205_v22  ;;  %2538 = vmatprep.subr.bf16.mxu1 %v7210_v56  ;;  %v8287_v22 = vld [vmem:[#allocation13_spill] sm:$0xff] }
 0x569   :  { %2498 = vmatpush1.bf16.msra.mxu0 %v7215_v59  ;;  %2539 = vmatpush1.bf16.msra.mxu1 %v7220_v28 }
 0x56a   :  { %2499 = vmatprep.subr.bf16.mxu0 %v7234_v33  ;;  %2540 = vmatprep.subr.bf16.mxu1 %v7244_v63 }
 0x56d   :  { %2500 = vmatpush1.bf16.msra.mxu0 %v7229_v49  ;;  %2541 = vmatpush1.bf16.msra.mxu1 %v7239_v39 }
 0x56e   :  { %2501 = vmatprep.subr.bf16.mxu0 %v7249_v8  ;;  %2542 = vmatprep.subr.bf16.mxu1 %v7255_v4 }
 0x571   :  { %2502 = vmatpush1.bf16.msra.mxu0 %v7262_v6  ;;  %2543 = vmatpush1.bf16.msra.mxu1 %v7269_v10 }
 0x572   :  { %2503 = vmatprep.subr.bf16.mxu0 %v7274_v2  ;;  %2544 = vmatprep.subr.bf16.mxu1 %v7280_v13 }
 0x575   :  { %2504 = vmatpush1.bf16.msra.mxu0 %v7286_v14  ;;  %2545 = vmatpush1.bf16.msra.mxu1 %v7293_v18 }
 0x576   :  { %2505 = vmatprep.subr.bf16.mxu0 %v7298_v19  ;;  %2546 = vmatprep.subr.bf16.mxu1 %v7304_v20 }
 0x579   :  { %2506 = vmatpush1.bf16.msra.mxu0 %v7310_v21  ;;  %2547 = vmatpush1.bf16.msra.mxu1 %v7317_v23 }
 0x57a   :  { %2805 = vmatprep.subr.bf16.mxu0 %v7461_v40  ;;  %2846 = vmatprep.subr.bf16.mxu1 %v7466_v41 }
 0x62f   :  { %v2211_v54 = vpop.f32.mrb[52].mxu0  ;;  %v2252_v61 = vpop.f32.mrb[52].mxu1 }
 0x630   :  { %v2259_v12 = vadd.f32 %v2211_v54, %v8284_v1  ;;  %v2261_v11 = vadd.f32 %v2252_v61, %v8285_v9  ;;  %v2213_v15 = vpop.f32.mrb[53].mxu0  ;;  %v2254_v16 = vpop.f32.mrb[53].mxu1  ;;  %v7626_v54 = vld [vmem:[%s8224_s2 + $0xe4] ss:$16 sps:$4 sm:$0xff]   ;;  %v7632_v61 = vld [vmem:[%s8224_s2 + $0xec] ss:$16 sps:$4 sm:$0xff]  }
 0x631   :  { %v2260_v17 = vadd.f32 %v2213_v15, %v8286_v27  ;;  %v2262_v56 = vadd.f32 %v2254_v16, %v8287_v22  ;;  %v2215_v59 = vpop.f32.mrb[54].mxu0  ;;  %v2256_v28 = vpop.f32.mrb[54].mxu1  ;;  %v7638_v1 = vld [vmem:[%s8224_s2 + $0xe0] ss:$16 sps:$4 sm:$0xff]   ;;  %v8288_v15 = vld [vmem:[#allocation14_spill] sm:$0xff] }
 0x632   :  { %v5680_v49 = vmul.f32 -1.442695, %v2259_v12  ;;  %v2216_v33 = vpop.f32.mrb[55].mxu0  ;;  %v2257_v39 = vpop.f32.mrb[55].mxu1  ;;  %v7645_v12 = vld [vmem:[%s8224_s2 + $0xe8] ss:$16 sps:$4 sm:$0xff]  }
 0x633   :  { %v5681_v63 = vmul.f32 -1.442695, %v2260_v17  ;;  %v5682_v8 = vmul.f32 -1.442695, %v2262_v56  ;;  %v8289_v27 = vld [vmem:[#allocation15_spill] sm:$0xff]  ;;  %v8290_v59 = vld [vmem:[#allocation16_spill] sm:$0xff] }
 0x634   :  { %6359 = vpow2.f32 %v5680_v49  ;;  %v8291_v49 = vld [vmem:[#allocation17_spill] sm:$0xff] }
 0x635   :  { %6361 = vpow2.f32 %v5681_v63 }
 0x636   :  { %6363 = vpow2.f32 %v5682_v8 }
 0x637   :  { %6365 = vtanh.f32 %v2261_v11 }
 0x63e   :  { %v6360_v4 = vpop.eup %6359 }
 0x63f   :  { %v6362_v6 = vpop.eup %6361  ;;  %v2266_v10 = vadd.f32 1.0, %v6360_v4 }
 0x640   :  { %v2272_v2 = vadd.f32 1.0, %v6362_v6  ;;  %v6364_v13 = vpop.eup %6363 }
 0x641   :  { %6367 = vrcp.f32 %v2266_v10  ;;  %v6366_v14 = vpop.eup %6365  ;;  %v2279_v21 = vadd.f32 1.0, %v6364_v13 }
 0x642   :  { %6369 = vrcp.f32 %v2272_v2 }
 0x643   :  { %6371 = vrcp.f32 %v2279_v21 }
 0x64b   :  { %v6368_v18 = vpop.eup %6367 }
 0x64c   :  { %v6370_v19 = vpop.eup %6369  ;;  %v2284_v20 = vmul.f32 %v6368_v18, %v6366_v14 }
 0x64d   :  { %v2283_v23 = vmul.f32 %v6370_v19, %v7413_v51  ;;  %v6372_v34 = vpop.eup %6371  ;;  %v7597_v51 = vld [vmem:[%s8224_s2 + $0xa8] ss:$16 sps:$4 sm:$0xff]  }
 0x64f   :  { %v7453_v25 = vadd.f32 %v2284_v20, %v2283_v23 }
 0x651   :  { %6373 = vtanh.f32 %v7453_v25 }
 0x65b   :  { %v6374_v35 = vpop.eup %6373 }
 0x65c   :  { %v2287_v36 = vmul.f32 %v6374_v35, %v6372_v34 }
 0x65e   :  { %v2298_v37 = vpack.c.bf16 %v2287_v36, %v2287_v36 }
 0x660   :  { %2524 = vmatmul.mubr.bf16.vlgmr.msra.gmra.mrb[56].mxu0 %v2298_v37  ;;  %2565 = vmatmul.mubr.bf16.vlgmr.msra.gmra.mrb[56].mxu1 %v2298_v37 }
 0x661   :  { %2837 = vmatprep.mubr.bf16.mxu0 %v8278_v57  ;;  %2878 = vmatprep.mubr.bf16.mxu1 %v8278_v57 }
 0x662   :  { %2806 = vmatpush1.bf16.msra.mxu0 %v7471_v42  ;;  %2847 = vmatpush1.bf16.msra.mxu1 %v7476_v43 }
 0x663   :  { %2807 = vmatprep.subr.bf16.mxu0 %v7485_v45  ;;  %2848 = vmatprep.subr.bf16.mxu1 %v7490_v46 }
 0x666   :  { %2808 = vmatpush1.bf16.msra.mxu0 %v7495_v58  ;;  %2849 = vmatpush1.bf16.msra.mxu1 %v7500_v60 }
 0x667   :  { %2809 = vmatprep.subr.bf16.mxu0 %v7509_v62  ;;  %2850 = vmatprep.subr.bf16.mxu1 %v7514_v47 }
 0x66a   :  { %2810 = vmatpush1.bf16.msra.mxu0 %v7519_v44  ;;  %2851 = vmatpush1.bf16.msra.mxu1 %v7524_v50 }
 0x66b   :  { %2811 = vmatprep.subr.bf16.mxu0 %v7533_v3  ;;  %2852 = vmatprep.subr.bf16.mxu1 %v7538_v5 }
 0x66e   :  { %2812 = vmatpush1.bf16.msra.mxu0 %v7543_v7  ;;  %2853 = vmatpush1.bf16.msra.mxu1 %v7548_v0 }
 0x66f   :  { %2813 = vmatprep.subr.bf16.mxu0 %v7562_v52  ;;  %2854 = vmatprep.subr.bf16.mxu1 %v7572_v55 }
 0x672   :  { %2814 = vmatpush1.bf16.msra.mxu0 %v7557_v48  ;;  %2855 = vmatpush1.bf16.msra.mxu1 %v7567_v53 }
 0x673   :  { %2815 = vmatprep.subr.bf16.mxu0 %v7577_v24  ;;  %2856 = vmatprep.subr.bf16.mxu1 %v7583_v26 }
 0x676   :  { %2816 = vmatpush1.bf16.msra.mxu0 %v7590_v29  ;;  %2857 = vmatpush1.bf16.msra.mxu1 %v7597_v51 }
 0x677   :  { %2817 = vmatprep.subr.bf16.mxu0 %v7602_v30  ;;  %2858 = vmatprep.subr.bf16.mxu1 %v7608_v38 }
 0x67a   :  { %2818 = vmatpush1.bf16.msra.mxu0 %v7614_v31  ;;  %2859 = vmatpush1.bf16.msra.mxu1 %v7621_v32 }
 0x67b   :  { %2819 = vmatprep.subr.bf16.mxu0 %v7626_v54  ;;  %2860 = vmatprep.subr.bf16.mxu1 %v7632_v61 }
 0x67e   :  { %2820 = vmatpush1.bf16.msra.mxu0 %v7638_v1  ;;  %2861 = vmatpush1.bf16.msra.mxu1 %v7645_v12 }
 0x67f   :  { %3119 = vmatprep.subr.bf16.mxu0 %v7461_v40  ;;  %3160 = vmatprep.subr.bf16.mxu1 %v7466_v41 }
 0x733   :  { %v2525_v9 = vpop.f32.mrb[56].mxu0  ;;  %v2566_v11 = vpop.f32.mrb[56].mxu1 }
 0x734   :  { %v2573_v16 = vadd.f32 %v2525_v9, %v8288_v15  ;;  %v2575_v17 = vadd.f32 %v2566_v11, %v8289_v27  ;;  %v2527_v22 = vpop.f32.mrb[57].mxu0  ;;  %v2568_v56 = vpop.f32.mrb[57].mxu1 }
 0x735   :  { %v2574_v28 = vadd.f32 %v2527_v22, %v8290_v59  ;;  %v2576_v33 = vadd.f32 %v2568_v56, %v8291_v49  ;;  %v2529_v39 = vpop.f32.mrb[58].mxu0  ;;  %v2570_v63 = vpop.f32.mrb[58].mxu1  ;;  %v8292_v22 = vld [vmem:[#allocation18_spill] sm:$0xff]  ;;  %v8293_v59 = vld [vmem:[#allocation19_spill] sm:$0xff] }
 0x736   :  { %v5715_v8 = vmul.f32 -1.442695, %v2573_v16  ;;  %v2530_v4 = vpop.f32.mrb[59].mxu0  ;;  %v2571_v6 = vpop.f32.mrb[59].mxu1  ;;  %v8294_v39 = vld [vmem:[#allocation20_spill] sm:$0xff] }
 0x737   :  { %v5716_v10 = vmul.f32 -1.442695, %v2574_v28  ;;  %v5717_v2 = vmul.f32 -1.442695, %v2576_v33 }
 0x738   :  { %6375 = vpow2.f32 %v5715_v8  ;;  %v8295_v8 = vld [vmem:[#allocation21_spill] sm:$0xff] }
 0x739   :  { %6377 = vpow2.f32 %v5716_v10 }
 0x73a   :  { %6379 = vpow2.f32 %v5717_v2 }
 0x73b   :  { %6381 = vtanh.f32 %v2575_v17 }
 0x742   :  { %v6376_v13 = vpop.eup %6375 }
 0x743   :  { %v6378_v14 = vpop.eup %6377  ;;  %v2580_v18 = vadd.f32 1.0, %v6376_v13 }
 0x744   :  { %v2586_v19 = vadd.f32 1.0, %v6378_v14  ;;  %v6380_v20 = vpop.eup %6379 }
 0x745   :  { %6383 = vrcp.f32 %v2580_v18  ;;  %v6382_v21 = vpop.eup %6381  ;;  %v2593_v36 = vadd.f32 1.0, %v6380_v20 }
 0x746   :  { %6385 = vrcp.f32 %v2586_v19 }
 0x747   :  { %6387 = vrcp.f32 %v2593_v36 }
 0x74f   :  { %v6384_v23 = vpop.eup %6383 }
 0x750   :  { %v6386_v34 = vpop.eup %6385  ;;  %v2598_v35 = vmul.f32 %v6384_v23, %v6382_v21 }
 0x751   :  { %v2597_v37 = vmul.f32 %v6386_v34, %v7453_v25  ;;  %v6388_v11 = vpop.eup %6387 }
 0x753   :  { %v7657_v9 = vadd.f32 %v2598_v35, %v2597_v37 }
 0x755   :  { %6389 = vtanh.f32 %v7657_v9 }
 0x75f   :  { %v6390_v15 = vpop.eup %6389 }
 0x760   :  { %v2601_v16 = vmul.f32 %v6390_v15, %v6388_v11 }
 0x762   :  { %v2612_v27 = vpack.c.bf16 %v2601_v16, %v2601_v16 }
 0x764   :  { %2838 = vmatmul.mubr.bf16.vlgmr.msra.gmra.mrb[60].mxu0 %v2612_v27  ;;  %2879 = vmatmul.mubr.bf16.vlgmr.msra.gmra.mrb[60].mxu1 %v2612_v27 }
 0x765   :  { %3120 = vmatpush1.bf16.msra.mxu0 %v7471_v42  ;;  %3161 = vmatpush1.bf16.msra.mxu1 %v7476_v43 }
 0x766   :  { %3121 = vmatprep.subr.bf16.mxu0 %v7485_v45  ;;  %3162 = vmatprep.subr.bf16.mxu1 %v7490_v46 }
 0x767   :  { %3151 = vmatprep.mubr.bf16.mxu0 %v8278_v57  ;;  %3192 = vmatprep.mubr.bf16.mxu1 %v8278_v57 }
 0x769   :  { %3122 = vmatpush1.bf16.msra.mxu0 %v7495_v58  ;;  %3163 = vmatpush1.bf16.msra.mxu1 %v7500_v60 }
 0x76a   :  { %3123 = vmatprep.subr.bf16.mxu0 %v7509_v62  ;;  %3164 = vmatprep.subr.bf16.mxu1 %v7514_v47 }
 0x76d   :  { %3124 = vmatpush1.bf16.msra.mxu0 %v7519_v44  ;;  %3165 = vmatpush1.bf16.msra.mxu1 %v7524_v50 }
 0x76e   :  { %3125 = vmatprep.subr.bf16.mxu0 %v7533_v3  ;;  %3166 = vmatprep.subr.bf16.mxu1 %v7538_v5 }
 0x771   :  { %3126 = vmatpush1.bf16.msra.mxu0 %v7543_v7  ;;  %3167 = vmatpush1.bf16.msra.mxu1 %v7548_v0 }
 0x772   :  { %3127 = vmatprep.subr.bf16.mxu0 %v7562_v52  ;;  %3168 = vmatprep.subr.bf16.mxu1 %v7572_v55 }
 0x775   :  { %3128 = vmatpush1.bf16.msra.mxu0 %v7557_v48  ;;  %3169 = vmatpush1.bf16.msra.mxu1 %v7567_v53 }
 0x776   :  { %3129 = vmatprep.subr.bf16.mxu0 %v7577_v24  ;;  %3170 = vmatprep.subr.bf16.mxu1 %v7583_v26 }
 0x779   :  { %3130 = vmatpush1.bf16.msra.mxu0 %v7590_v29  ;;  %3171 = vmatpush1.bf16.msra.mxu1 %v7597_v51 }
 0x77a   :  { %3131 = vmatprep.subr.bf16.mxu0 %v7602_v30  ;;  %3172 = vmatprep.subr.bf16.mxu1 %v7608_v38 }
 0x77d   :  { %3132 = vmatpush1.bf16.msra.mxu0 %v7614_v31  ;;  %3173 = vmatpush1.bf16.msra.mxu1 %v7621_v32 }
 0x77e   :  { %3133 = vmatprep.subr.bf16.mxu0 %v7626_v54  ;;  %3174 = vmatprep.subr.bf16.mxu1 %v7632_v61 }
 0x781   :  { %3134 = vmatpush1.bf16.msra.mxu0 %v7638_v1  ;;  %3175 = vmatpush1.bf16.msra.mxu1 %v7645_v12 }
 0x782   :  { %3433 = vmatprep.subr.bf16.mxu0 %v7461_v40  ;;  %3474 = vmatprep.subr.bf16.mxu1 %v7466_v41 }
 0x837   :  { %v2839_v25 = vpop.f32.mrb[60].mxu0  ;;  %v2880_v17 = vpop.f32.mrb[60].mxu1 }
 0x838   :  { %v2887_v56 = vadd.f32 %v2839_v25, %v8292_v22  ;;  %v2889_v28 = vadd.f32 %v2880_v17, %v8293_v59  ;;  %v2841_v49 = vpop.f32.mrb[61].mxu0  ;;  %v2882_v33 = vpop.f32.mrb[61].mxu1 }
 0x839   :  { %v2888_v63 = vadd.f32 %v2841_v49, %v8294_v39  ;;  %v2890_v4 = vadd.f32 %v2882_v33, %v8295_v8  ;;  %v2843_v6 = vpop.f32.mrb[62].mxu0  ;;  %v2884_v10 = vpop.f32.mrb[62].mxu1  ;;  %v8296_v49 = vld [vmem:[#allocation22_spill] sm:$0xff]  ;;  %v8297_v39 = vld [vmem:[#allocation23_spill] sm:$0xff] }
 0x83a   :  { %v5750_v2 = vmul.f32 -1.442695, %v2887_v56  ;;  %v2844_v13 = vpop.f32.mrb[63].mxu0  ;;  %v2885_v14 = vpop.f32.mrb[63].mxu1  ;;  %v8298_v6 = vld [vmem:[#allocation24_spill] sm:$0xff] }
 0x83b   :  { %v5751_v18 = vmul.f32 -1.442695, %v2888_v63  ;;  %v5752_v19 = vmul.f32 -1.442695, %v2890_v4 }
 0x83c   :  { %6391 = vpow2.f32 %v5750_v2  ;;  %v8299_v2 = vld [vmem:[#allocation25_spill] sm:$0xff] }
 0x83d   :  { %6393 = vpow2.f32 %v5751_v18 }
 0x83e   :  { %6395 = vpow2.f32 %v5752_v19 }
 0x83f   :  { %6397 = vtanh.f32 %v2889_v28 }
 0x846   :  { %v6392_v20 = vpop.eup %6391 }
 0x847   :  { %v6394_v21 = vpop.eup %6393  ;;  %v2894_v23 = vadd.f32 1.0, %v6392_v20 }
 0x848   :  { %v2900_v34 = vadd.f32 1.0, %v6394_v21  ;;  %v6396_v35 = vpop.eup %6395 }
 0x849   :  { %6399 = vrcp.f32 %v2894_v23  ;;  %v6398_v36 = vpop.eup %6397  ;;  %v2907_v16 = vadd.f32 1.0, %v6396_v35 }
 0x84a   :  { %6401 = vrcp.f32 %v2900_v34 }
 0x84b   :  { %6403 = vrcp.f32 %v2907_v16 }
 0x853   :  { %v6400_v37 = vpop.eup %6399 }
 0x854   :  { %v6402_v11 = vpop.eup %6401  ;;  %v2912_v15 = vmul.f32 %v6400_v37, %v6398_v36 }
 0x855   :  { %v2911_v27 = vmul.f32 %v6402_v11, %v7657_v9  ;;  %v6404_v17 = vpop.eup %6403 }
 0x857   :  { %v7699_v25 = vadd.f32 %v2912_v15, %v2911_v27 }
 0x859   :  { %6405 = vtanh.f32 %v7699_v25 }
 0x863   :  { %v6406_v22 = vpop.eup %6405 }
 0x864   :  { %v2915_v56 = vmul.f32 %v6406_v22, %v6404_v17 }
 0x866   :  { %v2926_v59 = vpack.c.bf16 %v2915_v56, %v2915_v56 }
 0x868   :  { %3152 = vmatmul.mubr.bf16.vlgmr.msra.gmra.mrb[64].mxu0 %v2926_v59  ;;  %3193 = vmatmul.mubr.bf16.vlgmr.msra.gmra.mrb[64].mxu1 %v2926_v59 }
 0x869   :  { %3434 = vmatpush1.bf16.msra.mxu0 %v7471_v42  ;;  %3475 = vmatpush1.bf16.msra.mxu1 %v7476_v43 }
 0x86a   :  { %3435 = vmatprep.subr.bf16.mxu0 %v7485_v45  ;;  %3476 = vmatprep.subr.bf16.mxu1 %v7490_v46 }
 0x86b   :  { %3465 = vmatprep.mubr.bf16.mxu0 %v8278_v57  ;;  %3506 = vmatprep.mubr.bf16.mxu1 %v8278_v57 }
 0x86d   :  { %3436 = vmatpush1.bf16.msra.mxu0 %v7495_v58  ;;  %3477 = vmatpush1.bf16.msra.mxu1 %v7500_v60 }
 0x86e   :  { %3437 = vmatprep.subr.bf16.mxu0 %v7509_v62  ;;  %3478 = vmatprep.subr.bf16.mxu1 %v7514_v47 }
 0x871   :  { %3438 = vmatpush1.bf16.msra.mxu0 %v7519_v44  ;;  %3479 = vmatpush1.bf16.msra.mxu1 %v7524_v50 }
 0x872   :  { %3439 = vmatprep.subr.bf16.mxu0 %v7533_v3  ;;  %3480 = vmatprep.subr.bf16.mxu1 %v7538_v5 }
 0x875   :  { %3440 = vmatpush1.bf16.msra.mxu0 %v7543_v7  ;;  %3481 = vmatpush1.bf16.msra.mxu1 %v7548_v0 }
 0x876   :  { %3441 = vmatprep.subr.bf16.mxu0 %v7562_v52  ;;  %3482 = vmatprep.subr.bf16.mxu1 %v7572_v55 }
 0x879   :  { %3442 = vmatpush1.bf16.msra.mxu0 %v7557_v48  ;;  %3483 = vmatpush1.bf16.msra.mxu1 %v7567_v53 }
 0x87a   :  { %3443 = vmatprep.subr.bf16.mxu0 %v7577_v24  ;;  %3484 = vmatprep.subr.bf16.mxu1 %v7583_v26 }
 0x87d   :  { %3444 = vmatpush1.bf16.msra.mxu0 %v7590_v29  ;;  %3485 = vmatpush1.bf16.msra.mxu1 %v7597_v51 }
 0x87e   :  { %3445 = vmatprep.subr.bf16.mxu0 %v7602_v30  ;;  %3486 = vmatprep.subr.bf16.mxu1 %v7608_v38 }
 0x881   :  { %3446 = vmatpush1.bf16.msra.mxu0 %v7614_v31  ;;  %3487 = vmatpush1.bf16.msra.mxu1 %v7621_v32 }
 0x882   :  { %3447 = vmatprep.subr.bf16.mxu0 %v7626_v54  ;;  %3488 = vmatprep.subr.bf16.mxu1 %v7632_v61 }
 0x885   :  { %3448 = vmatpush1.bf16.msra.mxu0 %v7638_v1  ;;  %3489 = vmatpush1.bf16.msra.mxu1 %v7645_v12 }
 0x886   :  { %3747 = vmatprep.subr.bf16.mxu0 %v7461_v40  ;;  %3788 = vmatprep.subr.bf16.mxu1 %v7466_v41 }
 0x93b   :  { %v3153_v9 = vpop.f32.mrb[64].mxu0  ;;  %v3194_v28 = vpop.f32.mrb[64].mxu1 }
 0x93c   :  { %v3201_v33 = vadd.f32 %v3153_v9, %v8296_v49  ;;  %v3203_v63 = vadd.f32 %v3194_v28, %v8297_v39  ;;  %v3155_v8 = vpop.f32.mrb[65].mxu0  ;;  %v3196_v4 = vpop.f32.mrb[65].mxu1 }
 0x93d   :  { %v3202_v10 = vadd.f32 %v3155_v8, %v8298_v6  ;;  %v3204_v13 = vadd.f32 %v3196_v4, %v8299_v2  ;;  %v3157_v14 = vpop.f32.mrb[66].mxu0  ;;  %v3198_v18 = vpop.f32.mrb[66].mxu1  ;;  %v7789_v4 = vld [vmem:[%s8224_s2 + $0x4] ss:$16 sps:$4 sm:$0xff]   ;;  %v7794_v6 = vld [vmem:[%s8224_s2 + $0xc] ss:$16 sps:$4 sm:$0xff]  }
 0x93e   :  { %v5785_v19 = vmul.f32 -1.442695, %v3201_v33  ;;  %v3158_v20 = vpop.f32.mrb[67].mxu0  ;;  %v3199_v21 = vpop.f32.mrb[67].mxu1  ;;  %v7804_v2 = vld [vmem:[%s8224_s2 + $0x8] ss:$16 sps:$4 sm:$0xff]  }
 0x93f   :  { %v5786_v40 = vmul.f32 -1.442695, %v3202_v10  ;;  %v5787_v41 = vmul.f32 -1.442695, %v3204_v13  ;;  %v7799_v10 = vld [vmem:[%s8224_s2] ss:$16 sps:$4 sm:$0xff]  }
 0x940   :  { %6407 = vpow2.f32 %v5785_v19  ;;  %v7813_v13 = vld [vmem:[%s8224_s2 + $0x24] ss:$16 sps:$4 sm:$0xff]   ;;  %v7818_v14 = vld [vmem:[%s8224_s2 + $0x2c] ss:$16 sps:$4 sm:$0xff]   ;;  %v7823_v18 = vld [vmem:[%s8224_s2 + $0x20] ss:$16 sps:$4 sm:$0xff]  }
 0x941   :  { %6409 = vpow2.f32 %v5786_v40  ;;  %v7828_v19 = vld [vmem:[%s8224_s2 + $0x28] ss:$16 sps:$4 sm:$0xff]   ;;  %v7837_v20 = vld [vmem:[%s8224_s2 + $0x44] ss:$16 sps:$4 sm:$0xff]   ;;  %v7842_v21 = vld [vmem:[%s8224_s2 + $0x4c] ss:$16 sps:$4 sm:$0xff]  }
 0x942   :  { %6411 = vpow2.f32 %v5787_v41  ;;  %v7847_v40 = vld [vmem:[%s8224_s2 + $0x40] ss:$16 sps:$4 sm:$0xff]   ;;  %v7852_v41 = vld [vmem:[%s8224_s2 + $0x48] ss:$16 sps:$4 sm:$0xff]  }
 0x943   :  { %6413 = vtanh.f32 %v3203_v63 }
 0x94a   :  { %v6408_v23 = vpop.eup %6407 }
 0x94b   :  { %v6410_v34 = vpop.eup %6409  ;;  %v3208_v35 = vadd.f32 1.0, %v6408_v23  ;;  %v7861_v23 = vld [vmem:[%s8224_s2 + $0x64] ss:$16 sps:$4 sm:$0xff]  }
 0x94c   :  { %v3214_v36 = vadd.f32 1.0, %v6410_v34  ;;  %v6412_v37 = vpop.eup %6411  ;;  %v7866_v34 = vld [vmem:[%s8224_s2 + $0x6c] ss:$16 sps:$4 sm:$0xff]  }
 0x94d   :  { %6415 = vrcp.f32 %v3208_v35  ;;  %v6414_v11 = vpop.eup %6413  ;;  %v3221_v17 = vadd.f32 1.0, %v6412_v37  ;;  %v7871_v35 = vld [vmem:[%s8224_s2 + $0x60] ss:$16 sps:$4 sm:$0xff]  }
 0x94e   :  { %6417 = vrcp.f32 %v3214_v36  ;;  %v7876_v36 = vld [vmem:[%s8224_s2 + $0x68] ss:$16 sps:$4 sm:$0xff]   ;;  %v7885_v37 = vld [vmem:[%s8224_s2 + $0x80] ss:$16 sps:$4 sm:$0xff]  }
 0x94f   :  { %6419 = vrcp.f32 %v3221_v17  ;;  %v7911_v17 = vld [vmem:[%s8224_s2 + $0xac] ss:$16 sps:$4 sm:$0xff]  }
 0x957   :  { %v6416_v15 = vpop.eup %6415 }
 0x958   :  { %v6418_v16 = vpop.eup %6417  ;;  %v3226_v27 = vmul.f32 %v6416_v15, %v6414_v11  ;;  %v7890_v11 = vld [vmem:[%s8224_s2 + $0x84] ss:$16 sps:$4 sm:$0xff]   ;;  %v7895_v15 = vld [vmem:[%s8224_s2 + $0x88] ss:$16 sps:$4 sm:$0xff]  }
 0x959   :  { %v3225_v22 = vmul.f32 %v6418_v16, %v7699_v25  ;;  %v6420_v59 = vpop.eup %6419  ;;  %v7900_v16 = vld [vmem:[%s8224_s2 + $0x8c] ss:$16 sps:$4 sm:$0xff]  }
 0x95b   :  { %v7741_v56 = vadd.f32 %v3226_v27, %v3225_v22  ;;  %v7905_v27 = vld [vmem:[%s8224_s2 + $0xa4] ss:$16 sps:$4 sm:$0xff]   ;;  %v7918_v22 = vld [vmem:[%s8224_s2 + $0xa0] ss:$16 sps:$4 sm:$0xff]  }
 0x95d   :  { %6421 = vtanh.f32 %v7741_v56 }
 0x967   :  { %v6422_v9 = vpop.eup %6421 }
 0x968   :  { %v3229_v28 = vmul.f32 %v6422_v9, %v6420_v59  ;;  %v7930_v59 = vld [vmem:[%s8224_s2 + $0xc4] ss:$16 sps:$4 sm:$0xff]   ;;  %v7936_v9 = vld [vmem:[%s8224_s2 + $0xcc] ss:$16 sps:$4 sm:$0xff]  }
 0x96a   :  { %v3240_v49 = vpack.c.bf16 %v3229_v28, %v3229_v28  ;;  %v7942_v28 = vld [vmem:[%s8224_s2 + $0xc0] ss:$16 sps:$4 sm:$0xff]  }
 0x96c   :  { %3466 = vmatmul.mubr.bf16.vlgmr.msra.gmra.mrb[68].mxu0 %v3240_v49  ;;  %3507 = vmatmul.mubr.bf16.vlgmr.msra.gmra.mrb[68].mxu1 %v3240_v49  ;;  %v7949_v49 = vld [vmem:[%s8224_s2 + $0xc8] ss:$16 sps:$4 sm:$0xff]  }
 0x96d   :  { %3748 = vmatpush1.bf16.msra.mxu0 %v7471_v42  ;;  %3789 = vmatpush1.bf16.msra.mxu1 %v7476_v43 }
 0x96e   :  { %3749 = vmatprep.subr.bf16.mxu0 %v7485_v45  ;;  %3790 = vmatprep.subr.bf16.mxu1 %v7490_v46  ;;  %v8300_v45 = vld [vmem:[#allocation26_spill] sm:$0xff] }
 0x96f   :  { %3779 = vmatprep.mubr.bf16.mxu0 %v8278_v57  ;;  %3820 = vmatprep.mubr.bf16.mxu1 %v8278_v57 }
 0x971   :  { %3750 = vmatpush1.bf16.msra.mxu0 %v7495_v58  ;;  %3791 = vmatpush1.bf16.msra.mxu1 %v7500_v60  ;;  %v8301_v58 = vld [vmem:[#allocation27_spill] sm:$0xff] }
 0x972   :  { %3751 = vmatprep.subr.bf16.mxu0 %v7509_v62  ;;  %3792 = vmatprep.subr.bf16.mxu1 %v7514_v47 }
 0x975   :  { %3752 = vmatpush1.bf16.msra.mxu0 %v7519_v44  ;;  %3793 = vmatpush1.bf16.msra.mxu1 %v7524_v50  ;;  %v8302_v44 = vld [vmem:[#allocation28_spill] sm:$0xff] }
 0x976   :  { %3753 = vmatprep.subr.bf16.mxu0 %v7533_v3  ;;  %3794 = vmatprep.subr.bf16.mxu1 %v7538_v5  ;;  %v8303_v3 = vld [vmem:[#allocation29_spill] sm:$0xff] }
 0x979   :  { %3754 = vmatpush1.bf16.msra.mxu0 %v7543_v7  ;;  %3795 = vmatpush1.bf16.msra.mxu1 %v7548_v0 }
 0x97a   :  { %3755 = vmatprep.subr.bf16.mxu0 %v7562_v52  ;;  %3796 = vmatprep.subr.bf16.mxu1 %v7572_v55 }
 0x97d   :  { %3756 = vmatpush1.bf16.msra.mxu0 %v7557_v48  ;;  %3797 = vmatpush1.bf16.msra.mxu1 %v7567_v53 }
 0x97e   :  { %3757 = vmatprep.subr.bf16.mxu0 %v7577_v24  ;;  %3798 = vmatprep.subr.bf16.mxu1 %v7583_v26 }
 0x981   :  { %3758 = vmatpush1.bf16.msra.mxu0 %v7590_v29  ;;  %3799 = vmatpush1.bf16.msra.mxu1 %v7597_v51 }
 0x982   :  { %3759 = vmatprep.subr.bf16.mxu0 %v7602_v30  ;;  %3800 = vmatprep.subr.bf16.mxu1 %v7608_v38 }
 0x985   :  { %3760 = vmatpush1.bf16.msra.mxu0 %v7614_v31  ;;  %3801 = vmatpush1.bf16.msra.mxu1 %v7621_v32 }
 0x986   :  { %3761 = vmatprep.subr.bf16.mxu0 %v7626_v54  ;;  %3802 = vmatprep.subr.bf16.mxu1 %v7632_v61 }
 0x989   :  { %3762 = vmatpush1.bf16.msra.mxu0 %v7638_v1  ;;  %3803 = vmatpush1.bf16.msra.mxu1 %v7645_v12 }
 0x98a   :  { %4061 = vmatprep.subr.bf16.mxu0 %v7789_v4  ;;  %4102 = vmatprep.subr.bf16.mxu1 %v7794_v6 }
 0xa3f   :  { %v3467_v42 = vpop.f32.mrb[68].mxu0  ;;  %v3508_v43 = vpop.f32.mrb[68].mxu1 }
 0xa40   :  { %v3515_v46 = vadd.f32 %v3467_v42, %v8300_v45  ;;  %v3517_v60 = vadd.f32 %v3508_v43, %v8301_v58  ;;  %v3469_v62 = vpop.f32.mrb[69].mxu0  ;;  %v3510_v47 = vpop.f32.mrb[69].mxu1  ;;  %v7954_v42 = vld [vmem:[%s8224_s2 + $0xe4] ss:$16 sps:$4 sm:$0xff]   ;;  %v7960_v43 = vld [vmem:[%s8224_s2 + $0xec] ss:$16 sps:$4 sm:$0xff]  }
 0xa41   :  { %v3516_v50 = vadd.f32 %v3469_v62, %v8302_v44  ;;  %v3518_v5 = vadd.f32 %v3510_v47, %v8303_v3  ;;  %v3471_v7 = vpop.f32.mrb[70].mxu0  ;;  %v3512_v0 = vpop.f32.mrb[70].mxu1  ;;  %v7966_v45 = vld [vmem:[%s8224_s2 + $0xe0] ss:$16 sps:$4 sm:$0xff]   ;;  %v8304_v62 = vld [vmem:[#allocation30_spill] sm:$0xff] }
 0xa42   :  { %v5820_v48 = vmul.f32 -1.442695, %v3515_v46  ;;  %v3472_v52 = vpop.f32.mrb[71].mxu0  ;;  %v3513_v53 = vpop.f32.mrb[71].mxu1  ;;  %v7973_v46 = vld [vmem:[%s8224_s2 + $0xe8] ss:$16 sps:$4 sm:$0xff]  }
 0xa43   :  { %v5821_v55 = vmul.f32 -1.442695, %v3516_v50  ;;  %v5822_v24 = vmul.f32 -1.442695, %v3518_v5  ;;  %v8305_v44 = vld [vmem:[#allocation31_spill] sm:$0xff]  ;;  %v8306_v7 = vld [vmem:[#allocation32_spill] sm:$0xff] }
 0xa44   :  { %6423 = vpow2.f32 %v5820_v48  ;;  %v8307_v48 = vld [vmem:[#allocation33_spill] sm:$0xff] }
 0xa45   :  { %6425 = vpow2.f32 %v5821_v55 }
 0xa46   :  { %6427 = vpow2.f32 %v5822_v24 }
 0xa47   :  { %6429 = vtanh.f32 %v3517_v60 }
 0xa4e   :  { %v6424_v26 = vpop.eup %6423 }
 0xa4f   :  { %v6426_v29 = vpop.eup %6425  ;;  %v3522_v51 = vadd.f32 1.0, %v6424_v26 }
 0xa50   :  { %v3528_v30 = vadd.f32 1.0, %v6426_v29  ;;  %v6428_v38 = vpop.eup %6427 }
 0xa51   :  { %6431 = vrcp.f32 %v3522_v51  ;;  %v6430_v31 = vpop.eup %6429  ;;  %v3535_v1 = vadd.f32 1.0, %v6428_v38 }
 0xa52   :  { %6433 = vrcp.f32 %v3528_v30 }
 0xa53   :  { %6435 = vrcp.f32 %v3535_v1 }
 0xa5b   :  { %v6432_v32 = vpop.eup %6431 }
 0xa5c   :  { %v6434_v54 = vpop.eup %6433  ;;  %v3540_v61 = vmul.f32 %v6432_v32, %v6430_v31 }
 0xa5d   :  { %v3539_v12 = vmul.f32 %v6434_v54, %v7741_v56  ;;  %v6436_v33 = vpop.eup %6435  ;;  %v7925_v56 = vld [vmem:[%s8224_s2 + $0xa8] ss:$16 sps:$4 sm:$0xff]  }
 0xa5f   :  { %v7781_v25 = vadd.f32 %v3540_v61, %v3539_v12 }
 0xa61   :  { %6437 = vtanh.f32 %v7781_v25 }
 0xa6b   :  { %v6438_v39 = vpop.eup %6437 }
 0xa6c   :  { %v3543_v63 = vmul.f32 %v6438_v39, %v6436_v33 }
 0xa6e   :  { %v3554_v8 = vpack.c.bf16 %v3543_v63, %v3543_v63 }
 0xa70   :  { %3780 = vmatmul.mubr.bf16.vlgmr.msra.gmra.mrb[72].mxu0 %v3554_v8  ;;  %3821 = vmatmul.mubr.bf16.vlgmr.msra.gmra.mrb[72].mxu1 %v3554_v8 }
 0xa71   :  { %4093 = vmatprep.mubr.bf16.mxu0 %v8278_v57  ;;  %4134 = vmatprep.mubr.bf16.mxu1 %v8278_v57 }
 0xa72   :  { %4062 = vmatpush1.bf16.msra.mxu0 %v7799_v10  ;;  %4103 = vmatpush1.bf16.msra.mxu1 %v7804_v2 }
 0xa73   :  { %4063 = vmatprep.subr.bf16.mxu0 %v7813_v13  ;;  %4104 = vmatprep.subr.bf16.mxu1 %v7818_v14 }
 0xa76   :  { %4064 = vmatpush1.bf16.msra.mxu0 %v7823_v18  ;;  %4105 = vmatpush1.bf16.msra.mxu1 %v7828_v19 }
 0xa77   :  { %4065 = vmatprep.subr.bf16.mxu0 %v7837_v20  ;;  %4106 = vmatprep.subr.bf16.mxu1 %v7842_v21 }
 0xa7a   :  { %4066 = vmatpush1.bf16.msra.mxu0 %v7847_v40  ;;  %4107 = vmatpush1.bf16.msra.mxu1 %v7852_v41 }
 0xa7b   :  { %4067 = vmatprep.subr.bf16.mxu0 %v7861_v23  ;;  %4108 = vmatprep.subr.bf16.mxu1 %v7866_v34 }
 0xa7e   :  { %4068 = vmatpush1.bf16.msra.mxu0 %v7871_v35  ;;  %4109 = vmatpush1.bf16.msra.mxu1 %v7876_v36 }
 0xa7f   :  { %4069 = vmatprep.subr.bf16.mxu0 %v7890_v11  ;;  %4110 = vmatprep.subr.bf16.mxu1 %v7900_v16 }
 0xa82   :  { %4070 = vmatpush1.bf16.msra.mxu0 %v7885_v37  ;;  %4111 = vmatpush1.bf16.msra.mxu1 %v7895_v15 }
 0xa83   :  { %4071 = vmatprep.subr.bf16.mxu0 %v7905_v27  ;;  %4112 = vmatprep.subr.bf16.mxu1 %v7911_v17 }
 0xa86   :  { %4072 = vmatpush1.bf16.msra.mxu0 %v7918_v22  ;;  %4113 = vmatpush1.bf16.msra.mxu1 %v7925_v56 }
 0xa87   :  { %4073 = vmatprep.subr.bf16.mxu0 %v7930_v59  ;;  %4114 = vmatprep.subr.bf16.mxu1 %v7936_v9 }
 0xa8a   :  { %4074 = vmatpush1.bf16.msra.mxu0 %v7942_v28  ;;  %4115 = vmatpush1.bf16.msra.mxu1 %v7949_v49 }
 0xa8b   :  { %4075 = vmatprep.subr.bf16.mxu0 %v7954_v42  ;;  %4116 = vmatprep.subr.bf16.mxu1 %v7960_v43 }
 0xa8e   :  { %4076 = vmatpush1.bf16.msra.mxu0 %v7966_v45  ;;  %4117 = vmatpush1.bf16.msra.mxu1 %v7973_v46 }
 0xa8f   :  { %4375 = vmatprep.subr.bf16.mxu0 %v7789_v4  ;;  %4416 = vmatprep.subr.bf16.mxu1 %v7794_v6 }
 0xb43   :  { %v3781_v58 = vpop.f32.mrb[72].mxu0  ;;  %v3822_v60 = vpop.f32.mrb[72].mxu1 }
 0xb44   :  { %v3829_v47 = vadd.f32 %v3781_v58, %v8304_v62  ;;  %v3831_v50 = vadd.f32 %v3822_v60, %v8305_v44  ;;  %v3783_v3 = vpop.f32.mrb[73].mxu0  ;;  %v3824_v5 = vpop.f32.mrb[73].mxu1 }
 0xb45   :  { %v3830_v0 = vadd.f32 %v3783_v3, %v8306_v7  ;;  %v3832_v52 = vadd.f32 %v3824_v5, %v8307_v48  ;;  %v3785_v53 = vpop.f32.mrb[74].mxu0  ;;  %v3826_v55 = vpop.f32.mrb[74].mxu1  ;;  %v8308_v3 = vld [vmem:[#allocation34_spill] sm:$0xff]  ;;  %v8309_v7 = vld [vmem:[#allocation35_spill] sm:$0xff] }
 0xb46   :  { %v5855_v24 = vmul.f32 -1.442695, %v3829_v47  ;;  %v3786_v26 = vpop.f32.mrb[75].mxu0  ;;  %v3827_v29 = vpop.f32.mrb[75].mxu1  ;;  %v8310_v53 = vld [vmem:[#allocation36_spill] sm:$0xff] }
 0xb47   :  { %v5856_v51 = vmul.f32 -1.442695, %v3830_v0  ;;  %v5857_v30 = vmul.f32 -1.442695, %v3832_v52 }
 0xb48   :  { %6439 = vpow2.f32 %v5855_v24  ;;  %v8311_v24 = vld [vmem:[#allocation37_spill] sm:$0xff] }
 0xb49   :  { %6441 = vpow2.f32 %v5856_v51 }
 0xb4a   :  { %6443 = vpow2.f32 %v5857_v30 }
 0xb4b   :  { %6445 = vtanh.f32 %v3831_v50 }
 0xb52   :  { %v6440_v38 = vpop.eup %6439 }
 0xb53   :  { %v6442_v31 = vpop.eup %6441  ;;  %v3836_v32 = vadd.f32 1.0, %v6440_v38 }
 0xb54   :  { %v3842_v54 = vadd.f32 1.0, %v6442_v31  ;;  %v6444_v61 = vpop.eup %6443 }
 0xb55   :  { %6447 = vrcp.f32 %v3836_v32  ;;  %v6446_v1 = vpop.eup %6445  ;;  %v3849_v63 = vadd.f32 1.0, %v6444_v61 }
 0xb56   :  { %6449 = vrcp.f32 %v3842_v54 }
 0xb57   :  { %6451 = vrcp.f32 %v3849_v63 }
 0xb5f   :  { %v6448_v12 = vpop.eup %6447 }
 0xb60   :  { %v6450_v33 = vpop.eup %6449  ;;  %v3854_v39 = vmul.f32 %v6448_v12, %v6446_v1 }
 0xb61   :  { %v3853_v8 = vmul.f32 %v6450_v33, %v7781_v25  ;;  %v6452_v60 = vpop.eup %6451 }
 0xb63   :  { %v7985_v58 = vadd.f32 %v3854_v39, %v3853_v8 }
 0xb65   :  { %6453 = vtanh.f32 %v7985_v58 }
 0xb6f   :  { %v6454_v62 = vpop.eup %6453 }
 0xb70   :  { %v3857_v47 = vmul.f32 %v6454_v62, %v6452_v60 }
 0xb72   :  { %v3868_v44 = vpack.c.bf16 %v3857_v47, %v3857_v47 }
 0xb74   :  { %4094 = vmatmul.mubr.bf16.vlgmr.msra.gmra.mrb[76].mxu0 %v3868_v44  ;;  %4135 = vmatmul.mubr.bf16.vlgmr.msra.gmra.mrb[76].mxu1 %v3868_v44 }
 0xb75   :  { %4376 = vmatpush1.bf16.msra.mxu0 %v7799_v10  ;;  %4417 = vmatpush1.bf16.msra.mxu1 %v7804_v2 }
 0xb76   :  { %4377 = vmatprep.subr.bf16.mxu0 %v7813_v13  ;;  %4418 = vmatprep.subr.bf16.mxu1 %v7818_v14 }
 0xb77   :  { %4407 = vmatprep.mubr.bf16.mxu0 %v8278_v57  ;;  %4448 = vmatprep.mubr.bf16.mxu1 %v8278_v57 }
 0xb79   :  { %4378 = vmatpush1.bf16.msra.mxu0 %v7823_v18  ;;  %4419 = vmatpush1.bf16.msra.mxu1 %v7828_v19 }
 0xb7a   :  { %4379 = vmatprep.subr.bf16.mxu0 %v7837_v20  ;;  %4420 = vmatprep.subr.bf16.mxu1 %v7842_v21 }
 0xb7d   :  { %4380 = vmatpush1.bf16.msra.mxu0 %v7847_v40  ;;  %4421 = vmatpush1.bf16.msra.mxu1 %v7852_v41 }
 0xb7e   :  { %4381 = vmatprep.subr.bf16.mxu0 %v7861_v23  ;;  %4422 = vmatprep.subr.bf16.mxu1 %v7866_v34 }
 0xb81   :  { %4382 = vmatpush1.bf16.msra.mxu0 %v7871_v35  ;;  %4423 = vmatpush1.bf16.msra.mxu1 %v7876_v36 }
 0xb82   :  { %4383 = vmatprep.subr.bf16.mxu0 %v7890_v11  ;;  %4424 = vmatprep.subr.bf16.mxu1 %v7900_v16 }
 0xb85   :  { %4384 = vmatpush1.bf16.msra.mxu0 %v7885_v37  ;;  %4425 = vmatpush1.bf16.msra.mxu1 %v7895_v15 }
 0xb86   :  { %4385 = vmatprep.subr.bf16.mxu0 %v7905_v27  ;;  %4426 = vmatprep.subr.bf16.mxu1 %v7911_v17 }
 0xb89   :  { %4386 = vmatpush1.bf16.msra.mxu0 %v7918_v22  ;;  %4427 = vmatpush1.bf16.msra.mxu1 %v7925_v56 }
 0xb8a   :  { %4387 = vmatprep.subr.bf16.mxu0 %v7930_v59  ;;  %4428 = vmatprep.subr.bf16.mxu1 %v7936_v9 }
 0xb8d   :  { %4388 = vmatpush1.bf16.msra.mxu0 %v7942_v28  ;;  %4429 = vmatpush1.bf16.msra.mxu1 %v7949_v49 }
 0xb8e   :  { %4389 = vmatprep.subr.bf16.mxu0 %v7954_v42  ;;  %4430 = vmatprep.subr.bf16.mxu1 %v7960_v43 }
 0xb91   :  { %4390 = vmatpush1.bf16.msra.mxu0 %v7966_v45  ;;  %4431 = vmatpush1.bf16.msra.mxu1 %v7973_v46 }
 0xb92   :  { %4689 = vmatprep.subr.bf16.mxu0 %v7789_v4  ;;  %4730 = vmatprep.subr.bf16.mxu1 %v7794_v6 }
 0xc47   :  { %v4095_v25 = vpop.f32.mrb[76].mxu0  ;;  %v4136_v50 = vpop.f32.mrb[76].mxu1 }
 0xc48   :  { %v4143_v5 = vadd.f32 %v4095_v25, %v8308_v3  ;;  %v4145_v0 = vadd.f32 %v4136_v50, %v8309_v7  ;;  %v4097_v48 = vpop.f32.mrb[77].mxu0  ;;  %v4138_v52 = vpop.f32.mrb[77].mxu1 }
 0xc49   :  { %v4144_v55 = vadd.f32 %v4097_v48, %v8310_v53  ;;  %v4146_v26 = vadd.f32 %v4138_v52, %v8311_v24  ;;  %v4099_v29 = vpop.f32.mrb[78].mxu0  ;;  %v4140_v51 = vpop.f32.mrb[78].mxu1  ;;  %v8312_v48 = vld [vmem:[#allocation38_spill] sm:$0xff]  ;;  %v8313_v53 = vld [vmem:[#allocation39_spill] sm:$0xff] }
 0xc4a   :  { %v5890_v30 = vmul.f32 -1.442695, %v4143_v5  ;;  %v4100_v38 = vpop.f32.mrb[79].mxu0  ;;  %v4141_v31 = vpop.f32.mrb[79].mxu1  ;;  %v8314_v29 = vld [vmem:[#allocation40_spill] sm:$0xff] }
 0xc4b   :  { %v5891_v32 = vmul.f32 -1.442695, %v4144_v55  ;;  %v5892_v54 = vmul.f32 -1.442695, %v4146_v26 }
 0xc4c   :  { %6455 = vpow2.f32 %v5890_v30  ;;  %v8315_v30 = vld [vmem:[#allocation41_spill] sm:$0xff] }
 0xc4d   :  { %6457 = vpow2.f32 %v5891_v32 }
 0xc4e   :  { %6459 = vpow2.f32 %v5892_v54 }
 0xc4f   :  { %6461 = vtanh.f32 %v4145_v0 }
 0xc56   :  { %v6456_v61 = vpop.eup %6455 }
 0xc57   :  { %v6458_v1 = vpop.eup %6457  ;;  %v4150_v12 = vadd.f32 1.0, %v6456_v61 }
 0xc58   :  { %v4156_v33 = vadd.f32 1.0, %v6458_v1  ;;  %v6460_v39 = vpop.eup %6459 }
 0xc59   :  { %6463 = vrcp.f32 %v4150_v12  ;;  %v6462_v63 = vpop.eup %6461  ;;  %v4163_v47 = vadd.f32 1.0, %v6460_v39 }
 0xc5a   :  { %6465 = vrcp.f32 %v4156_v33 }
 0xc5b   :  { %6467 = vrcp.f32 %v4163_v47 }
 0xc63   :  { %v6464_v8 = vpop.eup %6463 }
 0xc64   :  { %v6466_v60 = vpop.eup %6465  ;;  %v4168_v62 = vmul.f32 %v6464_v8, %v6462_v63 }
 0xc65   :  { %v4167_v44 = vmul.f32 %v6466_v60, %v7985_v58  ;;  %v6468_v50 = vpop.eup %6467 }
 0xc67   :  { %v8027_v25 = vadd.f32 %v4168_v62, %v4167_v44 }
 0xc69   :  { %6469 = vtanh.f32 %v8027_v25 }
 0xc73   :  { %v6470_v3 = vpop.eup %6469 }
 0xc74   :  { %v4171_v5 = vmul.f32 %v6470_v3, %v6468_v50 }
 0xc76   :  { %v4182_v7 = vpack.c.bf16 %v4171_v5, %v4171_v5 }
 0xc78   :  { %4408 = vmatmul.mubr.bf16.vlgmr.msra.gmra.mrb[80].mxu0 %v4182_v7  ;;  %4449 = vmatmul.mubr.bf16.vlgmr.msra.gmra.mrb[80].mxu1 %v4182_v7 }
 0xc79   :  { %4690 = vmatpush1.bf16.msra.mxu0 %v7799_v10  ;;  %4731 = vmatpush1.bf16.msra.mxu1 %v7804_v2 }
 0xc7a   :  { %4691 = vmatprep.subr.bf16.mxu0 %v7813_v13  ;;  %4732 = vmatprep.subr.bf16.mxu1 %v7818_v14 }
 0xc7b   :  { %4721 = vmatprep.mubr.bf16.mxu0 %v8278_v57  ;;  %4762 = vmatprep.mubr.bf16.mxu1 %v8278_v57 }
 0xc7d   :  { %4692 = vmatpush1.bf16.msra.mxu0 %v7823_v18  ;;  %4733 = vmatpush1.bf16.msra.mxu1 %v7828_v19 }
 0xc7e   :  { %4693 = vmatprep.subr.bf16.mxu0 %v7837_v20  ;;  %4734 = vmatprep.subr.bf16.mxu1 %v7842_v21 }
 0xc81   :  { %4694 = vmatpush1.bf16.msra.mxu0 %v7847_v40  ;;  %4735 = vmatpush1.bf16.msra.mxu1 %v7852_v41 }
 0xc82   :  { %4695 = vmatprep.subr.bf16.mxu0 %v7861_v23  ;;  %4736 = vmatprep.subr.bf16.mxu1 %v7866_v34 }
 0xc85   :  { %4696 = vmatpush1.bf16.msra.mxu0 %v7871_v35  ;;  %4737 = vmatpush1.bf16.msra.mxu1 %v7876_v36 }
 0xc86   :  { %4697 = vmatprep.subr.bf16.mxu0 %v7890_v11  ;;  %4738 = vmatprep.subr.bf16.mxu1 %v7900_v16 }
 0xc89   :  { %4698 = vmatpush1.bf16.msra.mxu0 %v7885_v37  ;;  %4739 = vmatpush1.bf16.msra.mxu1 %v7895_v15 }
 0xc8a   :  { %4699 = vmatprep.subr.bf16.mxu0 %v7905_v27  ;;  %4740 = vmatprep.subr.bf16.mxu1 %v7911_v17 }
 0xc8d   :  { %4700 = vmatpush1.bf16.msra.mxu0 %v7918_v22  ;;  %4741 = vmatpush1.bf16.msra.mxu1 %v7925_v56 }
 0xc8e   :  { %4701 = vmatprep.subr.bf16.mxu0 %v7930_v59  ;;  %4742 = vmatprep.subr.bf16.mxu1 %v7936_v9 }
 0xc91   :  { %4702 = vmatpush1.bf16.msra.mxu0 %v7942_v28  ;;  %4743 = vmatpush1.bf16.msra.mxu1 %v7949_v49 }
 0xc92   :  { %4703 = vmatprep.subr.bf16.mxu0 %v7954_v42  ;;  %4744 = vmatprep.subr.bf16.mxu1 %v7960_v43 }
 0xc95   :  { %4704 = vmatpush1.bf16.msra.mxu0 %v7966_v45  ;;  %4745 = vmatpush1.bf16.msra.mxu1 %v7973_v46 }
 0xc96   :  { %5003 = vmatprep.subr.bf16.mxu0 %v7789_v4  ;;  %5044 = vmatprep.subr.bf16.mxu1 %v7794_v6 }
 0xd4b   :  { %v4409_v58 = vpop.f32.mrb[80].mxu0  ;;  %v4450_v0 = vpop.f32.mrb[80].mxu1 }
 0xd4c   :  { %v4457_v52 = vadd.f32 %v4409_v58, %v8312_v48  ;;  %v4459_v55 = vadd.f32 %v4450_v0, %v8313_v53  ;;  %v4411_v24 = vpop.f32.mrb[81].mxu0  ;;  %v4452_v26 = vpop.f32.mrb[81].mxu1 }
 0xd4d   :  { %v4458_v51 = vadd.f32 %v4411_v24, %v8314_v29  ;;  %v4460_v38 = vadd.f32 %v4452_v26, %v8315_v30  ;;  %v4413_v31 = vpop.f32.mrb[82].mxu0  ;;  %v4454_v32 = vpop.f32.mrb[82].mxu1  ;;  %v6233_v26 = vld [vmem:[%s8224_s2 + $0x4] ss:$16 sps:$4 sm:$0xff]   ;;  %v6236_v29 = vld [vmem:[%s8224_s2 + $0xc] ss:$16 sps:$4 sm:$0xff]  }
 0xd4e   :  { %v5925_v54 = vmul.f32 -1.442695, %v4457_v52  ;;  %v4414_v61 = vpop.f32.mrb[83].mxu0  ;;  %v4455_v1 = vpop.f32.mrb[83].mxu1  ;;  %v6234_v30 = vld [vmem:[%s8224_s2 + $0x8] ss:$16 sps:$4 sm:$0xff]  }
 0xd4f   :  { %v5926_v4 = vmul.f32 -1.442695, %v4458_v51  ;;  %v5927_v6 = vmul.f32 -1.442695, %v4460_v38  ;;  %v6231_v51 = vld [vmem:[%s8224_s2] ss:$16 sps:$4 sm:$0xff]  }
 0xd50   :  { %6471 = vpow2.f32 %v5925_v54  ;;  %v6242_v38 = vld [vmem:[%s8224_s2 + $0x2c] ss:$16 sps:$4 sm:$0xff]   ;;  %v6237_v31 = vld [vmem:[%s8224_s2 + $0x20] ss:$16 sps:$4 sm:$0xff]   ;;  %v6240_v32 = vld [vmem:[%s8224_s2 + $0x28] ss:$16 sps:$4 sm:$0xff]  }
 0xd51   :  { %6473 = vpow2.f32 %v5926_v4  ;;  %v6245_v54 = vld [vmem:[%s8224_s2 + $0x44] ss:$16 sps:$4 sm:$0xff]   ;;  %v6248_v61 = vld [vmem:[%s8224_s2 + $0x4c] ss:$16 sps:$4 sm:$0xff]   ;;  %v6243_v1 = vld [vmem:[%s8224_s2 + $0x40] ss:$16 sps:$4 sm:$0xff]  }
 0xd52   :  { %6475 = vpow2.f32 %v5927_v6  ;;  %v6246_v4 = vld [vmem:[%s8224_s2 + $0x48] ss:$16 sps:$4 sm:$0xff]   ;;  %v6251_v6 = vld [vmem:[%s8224_s2 + $0x64] ss:$16 sps:$4 sm:$0xff]  }
 0xd53   :  { %6477 = vtanh.f32 %v4459_v55 }
 0xd5a   :  { %v6472_v12 = vpop.eup %6471 }
 0xd5b   :  { %v6474_v33 = vpop.eup %6473  ;;  %v4464_v39 = vadd.f32 1.0, %v6472_v12  ;;  %v6254_v12 = vld [vmem:[%s8224_s2 + $0x6c] ss:$16 sps:$4 sm:$0xff]  }
 0xd5c   :  { %v4470_v63 = vadd.f32 1.0, %v6474_v33  ;;  %v6476_v8 = vpop.eup %6475  ;;  %v6249_v33 = vld [vmem:[%s8224_s2 + $0x60] ss:$16 sps:$4 sm:$0xff]  }
 0xd5d   :  { %6479 = vrcp.f32 %v4464_v39  ;;  %v6478_v60 = vpop.eup %6477  ;;  %v4477_v50 = vadd.f32 1.0, %v6476_v8  ;;  %v6252_v39 = vld [vmem:[%s8224_s2 + $0x68] ss:$16 sps:$4 sm:$0xff]   ;;  %v6257_v8 = vld [vmem:[%s8224_s2 + $0x84] ss:$16 sps:$4 sm:$0xff]  }
 0xd5e   :  { %6481 = vrcp.f32 %v4470_v63  ;;  %v6255_v63 = vld [vmem:[%s8224_s2 + $0x80] ss:$16 sps:$4 sm:$0xff]  }
 0xd5f   :  { %6483 = vrcp.f32 %v4477_v50  ;;  %v6261_v50 = vld [vmem:[%s8224_s2 + $0xa0] ss:$16 sps:$4 sm:$0xff]  }
 0xd67   :  { %v6480_v62 = vpop.eup %6479 }
 0xd68   :  { %v6482_v47 = vpop.eup %6481  ;;  %v4482_v44 = vmul.f32 %v6480_v62, %v6478_v60  ;;  %v6258_v60 = vld [vmem:[%s8224_s2 + $0x88] ss:$16 sps:$4 sm:$0xff]   ;;  %v6260_v62 = vld [vmem:[%s8224_s2 + $0x8c] ss:$16 sps:$4 sm:$0xff]  }
 0xd69   :  { %v4481_v3 = vmul.f32 %v6482_v47, %v8027_v25  ;;  %v6484_v7 = vpop.eup %6483  ;;  %v6263_v47 = vld [vmem:[%s8224_s2 + $0xa4] ss:$16 sps:$4 sm:$0xff]  }
 0xd6b   :  { %v8069_v5 = vadd.f32 %v4482_v44, %v4481_v3  ;;  %v6266_v44 = vld [vmem:[%s8224_s2 + $0xac] ss:$16 sps:$4 sm:$0xff]   ;;  %v6264_v3 = vld [vmem:[%s8224_s2 + $0xa8] ss:$16 sps:$4 sm:$0xff]  }
 0xd6d   :  { %6485 = vtanh.f32 %v8069_v5 }
 0xd77   :  { %v6486_v58 = vpop.eup %6485 }
 0xd78   :  { %v4485_v0 = vmul.f32 %v6486_v58, %v6484_v7  ;;  %v6272_v7 = vld [vmem:[%s8224_s2 + $0xcc] ss:$16 sps:$4 sm:$0xff]   ;;  %v6267_v58 = vld [vmem:[%s8224_s2 + $0xc0] ss:$16 sps:$4 sm:$0xff]  }
 0xd7a   :  { %v4496_v48 = vpack.c.bf16 %v4485_v0, %v4485_v0  ;;  %v6270_v0 = vld [vmem:[%s8224_s2 + $0xc8] ss:$16 sps:$4 sm:$0xff]  }
 0xd7c   :  { %4722 = vmatmul.mubr.bf16.vlgmr.msra.gmra.mrb[84].mxu0 %v4496_v48  ;;  %4763 = vmatmul.mubr.bf16.vlgmr.msra.gmra.mrb[84].mxu1 %v4496_v48  ;;  %v6275_v48 = vld [vmem:[%s8224_s2 + $0xe4] ss:$16 sps:$4 sm:$0xff]  }
 0xd7d   :  { %5004 = vmatpush1.bf16.msra.mxu0 %v7799_v10  ;;  %5045 = vmatpush1.bf16.msra.mxu1 %v7804_v2 }
 0xd7e   :  { %5005 = vmatprep.subr.bf16.mxu0 %v7813_v13  ;;  %5046 = vmatprep.subr.bf16.mxu1 %v7818_v14  ;;  %v8316_v13 = vld [vmem:[#allocation42_spill] sm:$0xff] }
 0xd7f   :  { %5035 = vmatprep.mubr.bf16.mxu0 %v8278_v57  ;;  %5076 = vmatprep.mubr.bf16.mxu1 %v8278_v57 }
 0xd81   :  { %5006 = vmatpush1.bf16.msra.mxu0 %v7823_v18  ;;  %5047 = vmatpush1.bf16.msra.mxu1 %v7828_v19  ;;  %v8317_v18 = vld [vmem:[#allocation43_spill] sm:$0xff] }
 0xd82   :  { %5007 = vmatprep.subr.bf16.mxu0 %v7837_v20  ;;  %5048 = vmatprep.subr.bf16.mxu1 %v7842_v21 }
 0xd85   :  { %5008 = vmatpush1.bf16.msra.mxu0 %v7847_v40  ;;  %5049 = vmatpush1.bf16.msra.mxu1 %v7852_v41  ;;  %v8318_v40 = vld [vmem:[#allocation44_spill] sm:$0xff] }
 0xd86   :  { %5009 = vmatprep.subr.bf16.mxu0 %v7861_v23  ;;  %5050 = vmatprep.subr.bf16.mxu1 %v7866_v34  ;;  %v8319_v23 = vld [vmem:[#allocation45_spill] sm:$0xff] }
 0xd89   :  { %5010 = vmatpush1.bf16.msra.mxu0 %v7871_v35  ;;  %5051 = vmatpush1.bf16.msra.mxu1 %v7876_v36 }
 0xd8a   :  { %5011 = vmatprep.subr.bf16.mxu0 %v7890_v11  ;;  %5052 = vmatprep.subr.bf16.mxu1 %v7900_v16 }
 0xd8d   :  { %5012 = vmatpush1.bf16.msra.mxu0 %v7885_v37  ;;  %5053 = vmatpush1.bf16.msra.mxu1 %v7895_v15 }
 0xd8e   :  { %5013 = vmatprep.subr.bf16.mxu0 %v7905_v27  ;;  %5054 = vmatprep.subr.bf16.mxu1 %v7911_v17 }
 0xd91   :  { %5014 = vmatpush1.bf16.msra.mxu0 %v7918_v22  ;;  %5055 = vmatpush1.bf16.msra.mxu1 %v7925_v56 }
 0xd92   :  { %5015 = vmatprep.subr.bf16.mxu0 %v7930_v59  ;;  %5056 = vmatprep.subr.bf16.mxu1 %v7936_v9 }
 0xd95   :  { %5016 = vmatpush1.bf16.msra.mxu0 %v7942_v28  ;;  %5057 = vmatpush1.bf16.msra.mxu1 %v7949_v49 }
 0xd96   :  { %5017 = vmatprep.subr.bf16.mxu0 %v7954_v42  ;;  %5058 = vmatprep.subr.bf16.mxu1 %v7960_v43 }
 0xd99   :  { %5018 = vmatpush1.bf16.msra.mxu0 %v7966_v45  ;;  %5059 = vmatpush1.bf16.msra.mxu1 %v7973_v46 }
 0xd9a   :  { %5317 = vmatprep.subr.bf16.mxu0 %v6233_v26  ;;  %5358 = vmatprep.subr.bf16.mxu1 %v6236_v29 }
 0xe4f   :  { %v4723_v10 = vpop.f32.mrb[84].mxu0  ;;  %v4764_v2 = vpop.f32.mrb[84].mxu1 }
 0xe50   :  { %v4771_v14 = vadd.f32 %v4723_v10, %v8316_v13  ;;  %v4773_v19 = vadd.f32 %v4764_v2, %v8317_v18  ;;  %v4725_v20 = vpop.f32.mrb[85].mxu0  ;;  %v4766_v21 = vpop.f32.mrb[85].mxu1  ;;  %v6278_v10 = vld [vmem:[%s8224_s2 + $0xec] ss:$16 sps:$4 sm:$0xff]   ;;  %v6273_v2 = vld [vmem:[%s8224_s2 + $0xe0] ss:$16 sps:$4 sm:$0xff]  }
 0xe51   :  { %v4772_v41 = vadd.f32 %v4725_v20, %v8318_v40  ;;  %v4774_v34 = vadd.f32 %v4766_v21, %v8319_v23  ;;  %v4727_v35 = vpop.f32.mrb[86].mxu0  ;;  %v4768_v36 = vpop.f32.mrb[86].mxu1  ;;  %v6276_v13 = vld [vmem:[%s8224_s2 + $0xe8] ss:$16 sps:$4 sm:$0xff]   ;;  %v8321_v21 = vld [vmem:[#allocation47_spill] sm:$0xff] }
 0xe52   :  { %v5960_v37 = vmul.f32 -1.442695, %v4771_v14  ;;  %v4728_v11 = vpop.f32.mrb[87].mxu0  ;;  %v4769_v15 = vpop.f32.mrb[87].mxu1  ;;  %v8323_v36 = vld [vmem:[#allocation49_spill] sm:$0xff] }
 0xe53   :  { %v5961_v16 = vmul.f32 -1.442695, %v4772_v41  ;;  %v5962_v27 = vmul.f32 -1.442695, %v4774_v34  ;;  %v8322_v34 = vld [vmem:[#allocation48_spill] sm:$0xff] }
 0xe54   :  { %6487 = vpow2.f32 %v5960_v37 }
 0xe55   :  { %6489 = vpow2.f32 %v5961_v16 }
 0xe56   :  { %6491 = vpow2.f32 %v5962_v27 }
 0xe57   :  { %6493 = vtanh.f32 %v4773_v19  ;;  %v8320_v19 = vld [vmem:[#allocation46_spill] sm:$0xff] }
 0xe5e   :  { %v6488_v17 = vpop.eup %6487 }
 0xe5f   :  { %v6490_v22 = vpop.eup %6489  ;;  %v4778_v56 = vadd.f32 1.0, %v6488_v17 }
 0xe60   :  { %v4784_v59 = vadd.f32 1.0, %v6490_v22  ;;  %v6492_v9 = vpop.eup %6491 }
 0xe61   :  { %6495 = vrcp.f32 %v4778_v56  ;;  %v6494_v28 = vpop.eup %6493  ;;  %v4791_v45 = vadd.f32 1.0, %v6492_v9 }
 0xe62   :  { %6497 = vrcp.f32 %v4784_v59 }
 0xe63   :  { %6499 = vrcp.f32 %v4791_v45 }
 0xe6b   :  { %v6496_v49 = vpop.eup %6495 }
 0xe6c   :  { %v6498_v42 = vpop.eup %6497  ;;  %v4796_v43 = vmul.f32 %v6496_v49, %v6494_v28 }
 0xe6d   :  { %v4795_v46 = vmul.f32 %v6498_v42, %v8069_v5  ;;  %v6500_v52 = vpop.eup %6499  ;;  %v6269_v5 = vld [vmem:[%s8224_s2 + $0xc4] ss:$16 sps:$4 sm:$0xff]  }
 0xe6f   :  { %v8109_v25 = vadd.f32 %v4796_v43, %v4795_v46 }
 0xe71   :  { %6501 = vtanh.f32 %v8109_v25 }
 0xe7b   :  { %v6502_v53 = vpop.eup %6501 }
 0xe7c   :  { %v4799_v55 = vmul.f32 %v6502_v53, %v6500_v52 }
 0xe7e   :  { %v4810_v24 = vpack.c.bf16 %v4799_v55, %v4799_v55 }
 0xe80   :  { %5036 = vmatmul.mubr.bf16.vlgmr.msra.gmra.mrb[88].mxu0 %v4810_v24  ;;  %5077 = vmatmul.mubr.bf16.vlgmr.msra.gmra.mrb[88].mxu1 %v4810_v24 }
 0xe81   :  { %5349 = vmatprep.mubr.bf16.mxu0 %v8278_v57  ;;  %5390 = vmatprep.mubr.bf16.mxu1 %v8278_v57  ;;  %v6239_v57 = vld [vmem:[%s8224_s2 + $0x24] ss:$16 sps:$4 sm:$0xff]  }
 0xe82   :  { %5318 = vmatpush1.bf16.msra.mxu0 %v6231_v51  ;;  %5359 = vmatpush1.bf16.msra.mxu1 %v6234_v30 }
 0xe83   :  { %5319 = vmatprep.subr.bf16.mxu0 %v6239_v57  ;;  %5360 = vmatprep.subr.bf16.mxu1 %v6242_v38 }
 0xe86   :  { %5320 = vmatpush1.bf16.msra.mxu0 %v6237_v31  ;;  %5361 = vmatpush1.bf16.msra.mxu1 %v6240_v32  ;;  %v8324_v31 = vld [vmem:[#allocation50_spill] sm:$0xff] }
 0xe87   :  { %5321 = vmatprep.subr.bf16.mxu0 %v6245_v54  ;;  %5362 = vmatprep.subr.bf16.mxu1 %v6248_v61  ;;  %v8325_v54 = vld [vmem:[#allocation51_spill] sm:$0xff] }
 0xe8a   :  { %5322 = vmatpush1.bf16.msra.mxu0 %v6243_v1  ;;  %5363 = vmatpush1.bf16.msra.mxu1 %v6246_v4 }
 0xe8b   :  { %5323 = vmatprep.subr.bf16.mxu0 %v6251_v6  ;;  %5364 = vmatprep.subr.bf16.mxu1 %v6254_v12  ;;  %v8326_v6 = vld [vmem:[#allocation52_spill] sm:$0xff] }
 0xe8e   :  { %5324 = vmatpush1.bf16.msra.mxu0 %v6249_v33  ;;  %5365 = vmatpush1.bf16.msra.mxu1 %v6252_v39 }
 0xe8f   :  { %5325 = vmatprep.subr.bf16.mxu0 %v6257_v8  ;;  %5366 = vmatprep.subr.bf16.mxu1 %v6260_v62 }
 0xe92   :  { %5326 = vmatpush1.bf16.msra.mxu0 %v6255_v63  ;;  %5367 = vmatpush1.bf16.msra.mxu1 %v6258_v60 }
 0xe93   :  { %5327 = vmatprep.subr.bf16.mxu0 %v6263_v47  ;;  %5368 = vmatprep.subr.bf16.mxu1 %v6266_v44 }
 0xe96   :  { %5328 = vmatpush1.bf16.msra.mxu0 %v6261_v50  ;;  %5369 = vmatpush1.bf16.msra.mxu1 %v6264_v3 }
 0xe97   :  { %5329 = vmatprep.subr.bf16.mxu0 %v6269_v5  ;;  %5370 = vmatprep.subr.bf16.mxu1 %v6272_v7 }
 0xe9a   :  { %5330 = vmatpush1.bf16.msra.mxu0 %v6267_v58  ;;  %5371 = vmatpush1.bf16.msra.mxu1 %v6270_v0 }
 0xe9b   :  { %5331 = vmatprep.subr.bf16.mxu0 %v6275_v48  ;;  %5372 = vmatprep.subr.bf16.mxu1 %v6278_v10 }
 0xe9e   :  { %5332 = vmatpush1.bf16.msra.mxu0 %v6273_v2  ;;  %5373 = vmatpush1.bf16.msra.mxu1 %v6276_v13 }
 0xf53   :  { %v5037_v14 = vpop.f32.mrb[88].mxu0  ;;  %v5078_v18 = vpop.f32.mrb[88].mxu1 }
 0xf54   :  { %v5085_v20 = vadd.f32 %v5037_v14, %v8320_v19  ;;  %v5087_v40 = vadd.f32 %v5078_v18, %v8321_v21  ;;  %v5039_v41 = vpop.f32.mrb[89].mxu0  ;;  %v5080_v23 = vpop.f32.mrb[89].mxu1 }
 0xf55   :  { %v5086_v35 = vadd.f32 %v5039_v41, %v8322_v34  ;;  %v5088_v37 = vadd.f32 %v5080_v23, %v8323_v36  ;;  %v5041_v11 = vpop.f32.mrb[90].mxu0  ;;  %v5082_v15 = vpop.f32.mrb[90].mxu1 }
 0xf56   :  { %v5995_v16 = vmul.f32 -1.442695, %v5085_v20  ;;  %v5042_v27 = vpop.f32.mrb[91].mxu0  ;;  %v5083_v17 = vpop.f32.mrb[91].mxu1 }
 0xf57   :  { %v5996_v22 = vmul.f32 -1.442695, %v5086_v35  ;;  %v5997_v56 = vmul.f32 -1.442695, %v5088_v37 }
 0xf58   :  { %6503 = vpow2.f32 %v5995_v16 }
 0xf59   :  { %6505 = vpow2.f32 %v5996_v22 }
 0xf5a   :  { %6507 = vpow2.f32 %v5997_v56 }
 0xf5b   :  { %6509 = vtanh.f32 %v5087_v40 }
 0xf62   :  { %v6504_v59 = vpop.eup %6503 }
 0xf63   :  { %v6506_v9 = vpop.eup %6505  ;;  %v5092_v28 = vadd.f32 1.0, %v6504_v59 }
 0xf64   :  { %v5098_v49 = vadd.f32 1.0, %v6506_v9  ;;  %v6508_v42 = vpop.eup %6507 }
 0xf65   :  { %6511 = vrcp.f32 %v5092_v28  ;;  %v6510_v43 = vpop.eup %6509  ;;  %v5105_v53 = vadd.f32 1.0, %v6508_v42 }
 0xf66   :  { %6513 = vrcp.f32 %v5098_v49 }
 0xf67   :  { %6515 = vrcp.f32 %v5105_v53 }
 0xf6f   :  { %v6512_v45 = vpop.eup %6511 }
 0xf70   :  { %v6514_v46 = vpop.eup %6513  ;;  %v5110_v52 = vmul.f32 %v6512_v45, %v6510_v43 }
 0xf71   :  { %v5109_v55 = vmul.f32 %v6514_v46, %v8109_v25  ;;  %v6516_v26 = vpop.eup %6515  ;;  %v8327_v25 = vld [vmem:[#allocation53_spill] sm:$0xff] }
 0xf73   :  { %v5111_v24 = vadd.f32 %v5110_v52, %v5109_v55 }
 0xf75   :  { %6517 = vtanh.f32 %v5111_v24 }
 0xf7f   :  { %v6518_v29 = vpop.eup %6517 }
 0xf80   :  { %v5113_v51 = vmul.f32 %v6518_v29, %v6516_v26 }
 0xf82   :  { %v5124_v30 = vpack.c.bf16 %v5113_v51, %v5113_v51 }
 0xf84   :  { %5350 = vmatmul.mubr.bf16.vlgmr.msra.gmra.mrb[92].mxu0 %v5124_v30  ;;  %5391 = vmatmul.mubr.bf16.vlgmr.msra.gmra.mrb[92].mxu1 %v5124_v30 }
0x1057   :  { %v5351_v57 = vpop.f32.mrb[92].mxu0  ;;  %v5392_v38 = vpop.f32.mrb[92].mxu1 }
0x1058   :  { %v5399_v32 = vadd.f32 %v5351_v57, %v8324_v31  ;;  %v5401_v61 = vadd.f32 %v5392_v38, %v8325_v54  ;;  %v5353_v1 = vpop.f32.mrb[93].mxu0  ;;  %v5394_v4 = vpop.f32.mrb[93].mxu1 }
0x1059   :  { %v5400_v12 = vadd.f32 %v5353_v1, %v8326_v6  ;;  %v5402_v33 = vadd.f32 %v5394_v4, %v8327_v25  ;;  %v5355_v39 = vpop.f32.mrb[94].mxu0  ;;  %v5396_v63 = vpop.f32.mrb[94].mxu1 }
0x105a   :  { %v6030_v8 = vmul.f32 -1.442695, %v5399_v32  ;;  %v5356_v60 = vpop.f32.mrb[95].mxu0  ;;  %v5397_v62 = vpop.f32.mrb[95].mxu1 }
0x105b   :  { %v6031_v47 = vmul.f32 -1.442695, %v5400_v12  ;;  %v6032_v44 = vmul.f32 -1.442695, %v5402_v33 }
0x105c   :  { %6519 = vpow2.f32 %v6030_v8 }
0x105d   :  { %6521 = vpow2.f32 %v6031_v47 }
0x105e   :  { %6523 = vpow2.f32 %v6032_v44 }
0x105f   :  { %6525 = vtanh.f32 %v5401_v61 }
0x1066   :  { %v6520_v50 = vpop.eup %6519 }
0x1067   :  { %v6522_v3 = vpop.eup %6521  ;;  %v5406_v5 = vadd.f32 1.0, %v6520_v50 }
0x1068   :  { %v5412_v7 = vadd.f32 1.0, %v6522_v3  ;;  %v6524_v58 = vpop.eup %6523 }
0x1069   :  { %6527 = vrcp.f32 %v5406_v5  ;;  %v6526_v0 = vpop.eup %6525  ;;  %v5419_v13 = vadd.f32 1.0, %v6524_v58 }
0x106a   :  { %6529 = vrcp.f32 %v5412_v7 }
0x106b   :  { %6531 = vrcp.f32 %v5419_v13 }
0x1073   :  { %v6528_v48 = vpop.eup %6527 }
0x1074   :  { %v6530_v10 = vpop.eup %6529  ;;  %v5424_v2 = vmul.f32 %v6528_v48, %v6526_v0 }
0x1075   :  { %v5423_v14 = vmul.f32 %v6530_v10, %v5111_v24  ;;  %v6532_v19 = vpop.eup %6531 }
0x1077   :  { %v5425_v18 = vadd.f32 %v5424_v2, %v5423_v14 }
0x1079   :  { %6533 = vtanh.f32 %v5425_v18 }
0x1083   :  { %v6534_v20 = vpop.eup %6533 }
0x1084   :  { %v5427_v21 = vmul.f32 %v6534_v20, %v6532_v19 }
0x1086   :  { %5431 = vst [vmem:[%s8226_s4] sm:$0xff] %v5427_v21 }

</bundles_post_ra>
